<compile_context>
chip_gen: v7x
topology: tpu7x:2x2x1
jax: 0.10.0
libtpu: 0.0.40
codegen_flags: <defaults>
</compile_context>

<pallas_src>
import functools

import jax
import jax.numpy as jnp
from jax.experimental import pallas as pl
from jax.experimental.pallas import tpu as pltpu


def _round_up(v, m):
    return (v + m - 1) // m * m


# ----------------------------------------------------------------------------
# Fused kernel: num_layers LSTM layers + output Linear in a single invocation.
# ----------------------------------------------------------------------------
def _fused_rnn_kernel(x_ref, *refs, num_layers, T, Bp, Hp):
    nw = 3 * num_layers
    lstm_refs = refs[:nw]                      # (w_ih, w_hh, bias) per layer
    wout_ref = refs[nw]
    bout_ref = refs[nw + 1]
    out_ref = refs[nw + 2]
    pre_sc, hseq_sc, h_sc, c_sc = refs[nw + 3:]

    for layer in range(num_layers):
        wih_ref = lstm_refs[3 * layer + 0]
        whh_ref = lstm_refs[3 * layer + 1]
        b_ref = lstm_refs[3 * layer + 2]

        # ---- one big MXU matmul: input projection for every timestep -------
        if layer == 0:
            xin = x_ref[...]                   # (T, Bp, I)
        else:
            xin = hseq_sc[...]                 # (T, Bp, Hp)
        in_f = xin.shape[-1]
        pre = jnp.dot(xin.reshape(T * Bp, in_f), wih_ref[...],
                      preferred_element_type=jnp.float32) + b_ref[...]
        pre_sc[...] = pre.reshape(T, Bp, 4 * Hp)

        # ---- sequential recurrence: only h @ W_hh per step ------------------
        h_sc[...] = jnp.zeros_like(h_sc)
        c_sc[...] = jnp.zeros_like(c_sc)
        write_seq = layer < num_layers - 1     # last layer: only h[T-1] is used

        def step(t, carry):
            gates = pre_sc[t] + jnp.dot(h_sc[...], whh_ref[...],
                                        preferred_element_type=jnp.float32)
            # 128-lane-aligned gate slices (each gate padded to Hp lanes).
            i_g = jax.nn.sigmoid(gates[:, 0 * Hp:1 * Hp])
            f_g = jax.nn.sigmoid(gates[:, 1 * Hp:2 * Hp])
            g_g = jnp.tanh(gates[:, 2 * Hp:3 * Hp])
            o_g = jax.nn.sigmoid(gates[:, 3 * Hp:4 * Hp])
            c_new = f_g * c_sc[...] + i_g * g_g
            h_new = o_g * jnp.tanh(c_new)
            c_sc[...] = c_new
            h_sc[...] = h_new
            if write_seq:
                hseq_sc[t] = h_new
            return carry

        jax.lax.fori_loop(0, T, step, 0, unroll=True)

    # ---- fused output head on the final hidden state -------------------------
    out_ref[...] = (jnp.dot(h_sc[...], wout_ref[...],
                            preferred_element_type=jnp.float32)
                    + bout_ref[...]).astype(out_ref.dtype)


# ----------------------------------------------------------------------------
# Weight preparation: PyTorch layouts -> lane/sublane padded kernel layouts.
# ----------------------------------------------------------------------------
def _prep_lstm_weights(w_ih, w_hh, b_ih, b_hh, in_pad, Hp):
    fourH, in_f = w_ih.shape
    H = fourH // 4
    # (4H, in_f) -> (in_pad, 4*Hp): each gate padded to Hp lanes, zero pad rows.
    w = jnp.pad(w_ih.astype(jnp.float32).reshape(4, H, in_f),
                ((0, 0), (0, Hp - H), (0, in_pad - in_f)))
    w = jnp.transpose(w, (2, 0, 1)).reshape(in_pad, 4 * Hp)
    # (4H, H) -> (Hp, 4*Hp)
    wh = jnp.pad(w_hh.astype(jnp.float32).reshape(4, H, H),
                 ((0, 0), (0, Hp - H), (0, Hp - H)))
    wh = jnp.transpose(wh, (2, 0, 1)).reshape(Hp, 4 * Hp)
    # fused bias -> (1, 4*Hp); padded gate lanes get 0 (keeps pad lanes finite).
    b = jnp.pad((b_ih + b_hh).astype(jnp.float32).reshape(4, H),
                ((0, 0), (0, Hp - H))).reshape(1, 4 * Hp)
    return w, wh, b


def _full_spec(shape):
    nd = len(shape)
    return pl.BlockSpec(shape, lambda i: (0,) * nd)


# ----------------------------------------------------------------------------
# Wrapper: whole forward pass = one pallas_call.
# ----------------------------------------------------------------------------
def franpena_forward(input_sequence, params):
    """input_sequence: (B, T, input_size), batch_first like the PyTorch module.
    Returns (B, output_size) == output_layer(rnn_output)[:, -1, :]."""
    B, T, I = input_sequence.shape
    lstm_params = params["lstm"]
    num_layers = len(lstm_params)
    H = lstm_params[0][1].shape[1]
    O = params["w_out"].shape[0]

    Bp = _round_up(B, 8)        # f32 sublane count
    Hp = _round_up(H, 128)      # per-gate lane width -> vreg-aligned gate slices
    Op = _round_up(O, 128)      # lane-dense final store

    # Time-major + batch pad in a single XLA pass; kernel never sees (B, T, .).
    x = jnp.transpose(input_sequence.astype(jnp.float32), (1, 0, 2))
    x = jnp.pad(x, ((0, 0), (0, Bp - B), (0, 0)))

    flat = []
    in_pad = I
    for (w_ih, w_hh, b_ih, b_hh) in lstm_params:
        flat += list(_prep_lstm_weights(w_ih, w_hh, b_ih, b_hh, in_pad, Hp))
        in_pad = Hp
    w_out_p = jnp.pad(jnp.transpose(params["w_out"]).astype(jnp.float32),
                      ((0, Hp - H), (0, Op - O)))
    b_out_p = jnp.pad(params["b_out"].astype(jnp.float32).reshape(1, O),
                      ((0, 0), (0, Op - O)))
    flat += [w_out_p, b_out_p]

    kernel = functools.partial(_fused_rnn_kernel, num_layers=num_layers,
                               T=T, Bp=Bp, Hp=Hp)
    out = pl.pallas_call(
        kernel,
        out_shape=jax.ShapeDtypeStruct((Bp, Op), jnp.float32),
        grid=(1,),
        in_specs=[_full_spec(x.shape)] + [_full_spec(w.shape) for w in flat],
        out_specs=pl.BlockSpec((Bp, Op), lambda i: (0, 0)),
        scratch_shapes=[
            pltpu.VMEM((T, Bp, 4 * Hp), jnp.float32),   # per-layer x@W_ih + b
            pltpu.VMEM((T, Bp, Hp), jnp.float32),       # inter-layer h sequence
            pltpu.VMEM((Bp, Hp), jnp.float32),          # h state
            pltpu.VMEM((Bp, Hp), jnp.float32),          # c state
        ],
        compiler_params=pltpu.CompilerParams(
            dimension_semantics=("arbitrary",)),
    )(x, *flat)
    return out[:B, :O]


# ----------------------------------------------------------------------------
# Pure-JAX reference (for verification)
# ----------------------------------------------------------------------------
def franpena_reference(input_sequence, params):
    B, T, _ = input_sequence.shape
    x = input_sequence
    for (w_ih, w_hh, b_ih, b_hh) in params["lstm"]:
        H = w_hh.shape[1]
        h = jnp.zeros((B, H), jnp.float32)
        c = jnp.zeros((B, H), jnp.float32)

        def step(carry, x_t):
            h, c = carry
            gates = x_t @ w_ih.T + h @ w_hh.T + b_ih + b_hh
            i_g = jax.nn.sigmoid(gates[:, 0 * H:1 * H])
            f_g = jax.nn.sigmoid(gates[:, 1 * H:2 * H])
            g_g = jnp.tanh(gates[:, 2 * H:3 * H])
            o_g = jax.nn.sigmoid(gates[:, 3 * H:4 * H])
            c_new = f_g * c + i_g * g_g
            h_new = o_g * jnp.tanh(c_new)
            return (h_new, c_new), h_new

        (_, _), h_seq = jax.lax.scan(step, (h, c),
                                     jnp.transpose(x, (1, 0, 2)))
        x = jnp.transpose(h_seq, (1, 0, 2))        # (B, T, H)
    out = x @ params["w_out"].T + params["b_out"]
    return out[:, -1, :]


# ----------------------------------------------------------------------------
# Deterministic parameter init (matches nn.LSTM / nn.Linear shapes)
# ----------------------------------------------------------------------------
def init_params(key, input_size, hidden_size, output_size, num_layers):
    k = 1.0 / jnp.sqrt(hidden_size)
    params = {"lstm": []}
    for layer in range(num_layers):
        in_sz = input_size if layer == 0 else hidden_size
        key, k1, k2, k3, k4 = jax.random.split(key, 5)
        params["lstm"].append((
            jax.random.uniform(k1, (4 * hidden_size, in_sz), jnp.float32, -k, k),
            jax.random.uniform(k2, (4 * hidden_size, hidden_size), jnp.float32, -k, k),
            jax.random.uniform(k3, (4 * hidden_size,), jnp.float32, -k, k),
            jax.random.uniform(k4, (4 * hidden_size,), jnp.float32, -k, k),
        ))
    key, k5, k6 = jax.random.split(key, 3)
    kl = 1.0 / jnp.sqrt(hidden_size)
    params["w_out"] = jax.random.uniform(k5, (output_size, hidden_size),
                                         jnp.float32, -kl, kl)
    params["b_out"] = jax.random.uniform(k6, (output_size,), jnp.float32, -kl, kl)
    return params


if __name__ == "__main__":
    B, T = 2, 8
    INPUT_SIZE, HIDDEN, OUTPUT_SIZE, NUM_LAYERS = 16, 32, 4, 2

    key = jax.random.PRNGKey(0)
    key, pkey, xkey = jax.random.split(key, 3)
    params = init_params(pkey, INPUT_SIZE, HIDDEN, OUTPUT_SIZE, NUM_LAYERS)
    x = jax.random.normal(xkey, (B, T, INPUT_SIZE), jnp.float32)

    fwd = jax.jit(franpena_forward)
    ref_fn = jax.jit(franpena_reference)

    out = jax.block_until_ready(fwd(x, params))
    ref = jax.block_until_ready(ref_fn(x, params))

    assert out.shape == (B, OUTPUT_SIZE), out.shape
    assert jnp.allclose(out, ref, atol=1e-5, rtol=1e-5), (out, ref)
    print("KERNEL_OK")
</pallas_src>

<mosaic_0001>
module attributes {stable_mosaic.version = 11 : i64} {
  func.func @_fused_rnn_kernel(%arg0: i32, %arg1: memref<8x8x16xf32, #tpu.memory_space<vmem>>, %arg2: memref<16x512xf32, #tpu.memory_space<vmem>>, %arg3: memref<128x512xf32, #tpu.memory_space<vmem>>, %arg4: memref<1x512xf32, #tpu.memory_space<vmem>>, %arg5: memref<128x512xf32, #tpu.memory_space<vmem>>, %arg6: memref<128x512xf32, #tpu.memory_space<vmem>>, %arg7: memref<1x512xf32, #tpu.memory_space<vmem>>, %arg8: memref<128x128xf32, #tpu.memory_space<vmem>>, %arg9: memref<1x128xf32, #tpu.memory_space<vmem>>, %arg10: memref<8x128xf32, #tpu.memory_space<vmem>>, %arg11: memref<8x8x512xf32, #tpu.memory_space<vmem>>, %arg12: memref<8x8x128xf32, #tpu.memory_space<vmem>>, %arg13: memref<8x128xf32, #tpu.memory_space<vmem>>, %arg14: memref<8x128xf32, #tpu.memory_space<vmem>>) attributes {dimension_semantics = [#tpu.dimension_semantics<arbitrary>], iteration_bounds = array<i64: 1>, scalar_prefetch = 0 : i64, scratch_operands = 4 : i64, tpu.core_type = #tpu.core_type<tc>, window_params = [{pipeline_mode = #tpu.pipeline_mode<synchronous>, transform_indices = @transform_0, window_bounds = array<i64: 8, 8, 16>}, {pipeline_mode = #tpu.pipeline_mode<synchronous>, transform_indices = @transform_1, window_bounds = array<i64: 16, 512>}, {pipeline_mode = #tpu.pipeline_mode<synchronous>, transform_indices = @transform_2, window_bounds = array<i64: 128, 512>}, {pipeline_mode = #tpu.pipeline_mode<synchronous>, transform_indices = @transform_3, window_bounds = array<i64: 1, 512>}, {pipeline_mode = #tpu.pipeline_mode<synchronous>, transform_indices = @transform_4, window_bounds = array<i64: 128, 512>}, {pipeline_mode = #tpu.pipeline_mode<synchronous>, transform_indices = @transform_5, window_bounds = array<i64: 128, 512>}, {pipeline_mode = #tpu.pipeline_mode<synchronous>, transform_indices = @transform_6, window_bounds = array<i64: 1, 512>}, {pipeline_mode = #tpu.pipeline_mode<synchronous>, transform_indices = @transform_7, window_bounds = array<i64: 128, 128>}, {pipeline_mode = #tpu.pipeline_mode<synchronous>, transform_indices = @transform_8, window_bounds = array<i64: 1, 128>}, {pipeline_mode = #tpu.pipeline_mode<synchronous>, transform_indices = @transform_9, window_bounds = array<i64: 8, 128>}]} {
    %c0 = arith.constant 0 : index
    %c0_0 = arith.constant 0 : index
    %c0_1 = arith.constant 0 : index
    %0 = vector.load %arg1[%c0, %c0_0, %c0_1] : memref<8x8x16xf32, #tpu.memory_space<vmem>>, vector<8x8x16xf32>
    %1 = vector.shape_cast %0 : vector<8x8x16xf32> to vector<64x16xf32>
    %c0_2 = arith.constant 0 : index
    %c0_3 = arith.constant 0 : index
    %2 = vector.load %arg2[%c0_2, %c0_3] : memref<16x512xf32, #tpu.memory_space<vmem>>, vector<16x512xf32>
    %cst = arith.constant dense<0.000000e+00> : vector<64x512xf32>
    %3 = tpu.matmul %1, %2, %cst {dimension_numbers = #tpu.dot_dimension_numbers<[1], [0], [0], [1], [0, 0, 1, 1], [], []>} : vector<64x16xf32>, vector<16x512xf32>, vector<64x512xf32> -> vector<64x512xf32>
    %c0_4 = arith.constant 0 : index
    %c0_5 = arith.constant 0 : index
    %4 = vector.load %arg4[%c0_4, %c0_5] : memref<1x512xf32, #tpu.memory_space<vmem>>, vector<1x512xf32>
    %5 = vector.broadcast %4 : vector<1x512xf32> to vector<64x512xf32>
    %6 = arith.addf %3, %5 : vector<64x512xf32>
    %7 = vector.shape_cast %6 : vector<64x512xf32> to vector<8x8x512xf32>
    %c0_6 = arith.constant 0 : index
    %c0_7 = arith.constant 0 : index
    %c0_8 = arith.constant 0 : index
    %8 = vector.load %arg11[%c0_6, %c0_7, %c0_8] : memref<8x8x512xf32, #tpu.memory_space<vmem>>, vector<8x8x512xf32>
    tpu.vector_store %arg11[%c0_6, %c0_7, %c0_8], %7 {strides = array<i32>} : memref<8x8x512xf32, #tpu.memory_space<vmem>>, vector<8x8x512xf32>,
    %cst_9 = arith.constant 0.000000e+00 : f32
    %9 = vector.broadcast %cst_9 : f32 to vector<8x128xf32>
    %c0_10 = arith.constant 0 : index
    %c0_11 = arith.constant 0 : index
    %10 = vector.load %arg13[%c0_10, %c0_11] : memref<8x128xf32, #tpu.memory_space<vmem>>, vector<8x128xf32>
    tpu.vector_store %arg13[%c0_10, %c0_11], %9 {strides = array<i32>} : memref<8x128xf32, #tpu.memory_space<vmem>>, vector<8x128xf32>,
    %cst_12 = arith.constant 0.000000e+00 : f32
    %11 = vector.broadcast %cst_12 : f32 to vector<8x128xf32>
    %c0_13 = arith.constant 0 : index
    %c0_14 = arith.constant 0 : index
    %12 = vector.load %arg14[%c0_13, %c0_14] : memref<8x128xf32, #tpu.memory_space<vmem>>, vector<8x128xf32>
    tpu.vector_store %arg14[%c0_13, %c0_14], %11 {strides = array<i32>} : memref<8x128xf32, #tpu.memory_space<vmem>>, vector<8x128xf32>,
    %c0_i32 = arith.constant 0 : i32
    %13 = arith.index_cast %c0_i32 : i32 to index
    %c0_15 = arith.constant 0 : index
    %c0_16 = arith.constant 0 : index
    %14 = vector.load %arg11[%13, %c0_15, %c0_16] : memref<8x8x512xf32, #tpu.memory_space<vmem>>, vector<1x8x512xf32>
    %15 = vector.shape_cast %14 : vector<1x8x512xf32> to vector<8x512xf32>
    %c0_17 = arith.constant 0 : index
    %c0_18 = arith.constant 0 : index
    %16 = vector.load %arg13[%c0_17, %c0_18] : memref<8x128xf32, #tpu.memory_space<vmem>>, vector<8x128xf32>
    %c0_19 = arith.constant 0 : index
    %c0_20 = arith.constant 0 : index
    %17 = vector.load %arg3[%c0_19, %c0_20] : memref<128x512xf32, #tpu.memory_space<vmem>>, vector<128x512xf32>
    %cst_21 = arith.constant dense<0.000000e+00> : vector<8x512xf32>
    %18 = tpu.matmul %16, %17, %cst_21 {dimension_numbers = #tpu.dot_dimension_numbers<[1], [0], [0], [1], [0, 0, 1, 1], [], []>} : vector<8x128xf32>, vector<128x512xf32>, vector<8x512xf32> -> vector<8x512xf32>
    %19 = arith.addf %15, %18 : vector<8x512xf32>
    %20 = vector.extract_strided_slice %19 {offsets = [0, 0], sizes = [8, 128], strides = [1, 1]} : vector<8x512xf32> to vector<8x128xf32>
    %21 = arith.negf %20 : vector<8x128xf32>
    %22 = math.exp %21 : vector<8x128xf32>
    %cst_22 = arith.constant 1.000000e+00 : f32
    %23 = vector.broadcast %cst_22 : f32 to vector<8x128xf32>
    %24 = arith.addf %23, %22 : vector<8x128xf32>
    %25 = arith.divf %23, %24 : vector<8x128xf32>
    %26 = vector.extract_strided_slice %19 {offsets = [0, 128], sizes = [8, 128], strides = [1, 1]} : vector<8x512xf32> to vector<8x128xf32>
    %27 = arith.negf %26 : vector<8x128xf32>
    %28 = math.exp %27 : vector<8x128xf32>
    %cst_23 = arith.constant 1.000000e+00 : f32
    %29 = vector.broadcast %cst_23 : f32 to vector<8x128xf32>
    %30 = arith.addf %29, %28 : vector<8x128xf32>
    %31 = arith.divf %29, %30 : vector<8x128xf32>
    %32 = vector.extract_strided_slice %19 {offsets = [0, 256], sizes = [8, 128], strides = [1, 1]} : vector<8x512xf32> to vector<8x128xf32>
    %33 = math.tanh %32 : vector<8x128xf32>
    %34 = vector.extract_strided_slice %19 {offsets = [0, 384], sizes = [8, 128], strides = [1, 1]} : vector<8x512xf32> to vector<8x128xf32>
    %35 = arith.negf %34 : vector<8x128xf32>
    %36 = math.exp %35 : vector<8x128xf32>
    %cst_24 = arith.constant 1.000000e+00 : f32
    %37 = vector.broadcast %cst_24 : f32 to vector<8x128xf32>
    %38 = arith.addf %37, %36 : vector<8x128xf32>
    %39 = arith.divf %37, %38 : vector<8x128xf32>
    %c0_25 = arith.constant 0 : index
    %c0_26 = arith.constant 0 : index
    %40 = vector.load %arg14[%c0_25, %c0_26] : memref<8x128xf32, #tpu.memory_space<vmem>>, vector<8x128xf32>
    %41 = arith.mulf %31, %40 : vector<8x128xf32>
    %42 = arith.mulf %25, %33 : vector<8x128xf32>
    %43 = arith.addf %41, %42 : vector<8x128xf32>
    %44 = math.tanh %43 : vector<8x128xf32>
    %45 = arith.mulf %39, %44 : vector<8x128xf32>
    %c0_27 = arith.constant 0 : index
    %c0_28 = arith.constant 0 : index
    %46 = vector.load %arg14[%c0_27, %c0_28] : memref<8x128xf32, #tpu.memory_space<vmem>>, vector<8x128xf32>
    tpu.vector_store %arg14[%c0_27, %c0_28], %43 {strides = array<i32>} : memref<8x128xf32, #tpu.memory_space<vmem>>, vector<8x128xf32>,
    %c0_29 = arith.constant 0 : index
    %c0_30 = arith.constant 0 : index
    %47 = vector.load %arg13[%c0_29, %c0_30] : memref<8x128xf32, #tpu.memory_space<vmem>>, vector<8x128xf32>
    tpu.vector_store %arg13[%c0_29, %c0_30], %45 {strides = array<i32>} : memref<8x128xf32, #tpu.memory_space<vmem>>, vector<8x128xf32>,
    %48 = arith.index_cast %c0_i32 : i32 to index
    %c0_31 = arith.constant 0 : index
    %c0_32 = arith.constant 0 : index
    %49 = vector.load %arg12[%48, %c0_31, %c0_32] : memref<8x8x128xf32, #tpu.memory_space<vmem>>, vector<1x8x128xf32>
    %50 = vector.shape_cast %49 : vector<1x8x128xf32> to vector<8x128xf32>
    %51 = vector.shape_cast %45 : vector<8x128xf32> to vector<1x8x128xf32>
    tpu.vector_store %arg12[%48, %c0_31, %c0_32], %51 {strides = array<i32>} : memref<8x8x128xf32, #tpu.memory_space<vmem>>, vector<1x8x128xf32>,
    %c1_i32 = arith.constant 1 : i32
    %52 = arith.index_cast %c1_i32 : i32 to index
    %c0_33 = arith.constant 0 : index
    %c0_34 = arith.constant 0 : index
    %53 = vector.load %arg11[%52, %c0_33, %c0_34] : memref<8x8x512xf32, #tpu.memory_space<vmem>>, vector<1x8x512xf32>
    %54 = vector.shape_cast %53 : vector<1x8x512xf32> to vector<8x512xf32>
    %c0_35 = arith.constant 0 : index
    %c0_36 = arith.constant 0 : index
    %55 = vector.load %arg13[%c0_35, %c0_36] : memref<8x128xf32, #tpu.memory_space<vmem>>, vector<8x128xf32>
    %c0_37 = arith.constant 0 : index
    %c0_38 = arith.constant 0 : index
    %56 = vector.load %arg3[%c0_37, %c0_38] : memref<128x512xf32, #tpu.memory_space<vmem>>, vector<128x512xf32>
    %cst_39 = arith.constant dense<0.000000e+00> : vector<8x512xf32>
    %57 = tpu.matmul %55, %56, %cst_39 {dimension_numbers = #tpu.dot_dimension_numbers<[1], [0], [0], [1], [0, 0, 1, 1], [], []>} : vector<8x128xf32>, vector<128x512xf32>, vector<8x512xf32> -> vector<8x512xf32>
    %58 = arith.addf %54, %57 : vector<8x512xf32>
    %59 = vector.extract_strided_slice %58 {offsets = [0, 0], sizes = [8, 128], strides = [1, 1]} : vector<8x512xf32> to vector<8x128xf32>
    %60 = arith.negf %59 : vector<8x128xf32>
    %61 = math.exp %60 : vector<8x128xf32>
    %cst_40 = arith.constant 1.000000e+00 : f32
    %62 = vector.broadcast %cst_40 : f32 to vector<8x128xf32>
    %63 = arith.addf %62, %61 : vector<8x128xf32>
    %64 = arith.divf %62, %63 : vector<8x128xf32>
    %65 = vector.extract_strided_slice %58 {offsets = [0, 128], sizes = [8, 128], strides = [1, 1]} : vector<8x512xf32> to vector<8x128xf32>
    %66 = arith.negf %65 : vector<8x128xf32>
    %67 = math.exp %66 : vector<8x128xf32>
    %cst_41 = arith.constant 1.000000e+00 : f32
    %68 = vector.broadcast %cst_41 : f32 to vector<8x128xf32>
    %69 = arith.addf %68, %67 : vector<8x128xf32>
    %70 = arith.divf %68, %69 : vector<8x128xf32>
    %71 = vector.extract_strided_slice %58 {offsets = [0, 256], sizes = [8, 128], strides = [1, 1]} : vector<8x512xf32> to vector<8x128xf32>
    %72 = math.tanh %71 : vector<8x128xf32>
    %73 = vector.extract_strided_slice %58 {offsets = [0, 384], sizes = [8, 128], strides = [1, 1]} : vector<8x512xf32> to vector<8x128xf32>
    %74 = arith.negf %73 : vector<8x128xf32>
    %75 = math.exp %74 : vector<8x128xf32>
    %cst_42 = arith.constant 1.000000e+00 : f32
    %76 = vector.broadcast %cst_42 : f32 to vector<8x128xf32>
    %77 = arith.addf %76, %75 : vector<8x128xf32>
    %78 = arith.divf %76, %77 : vector<8x128xf32>
    %c0_43 = arith.constant 0 : index
    %c0_44 = arith.constant 0 : index
    %79 = vector.load %arg14[%c0_43, %c0_44] : memref<8x128xf32, #tpu.memory_space<vmem>>, vector<8x128xf32>
    %80 = arith.mulf %70, %79 : vector<8x128xf32>
    %81 = arith.mulf %64, %72 : vector<8x128xf32>
    %82 = arith.addf %80, %81 : vector<8x128xf32>
    %83 = math.tanh %82 : vector<8x128xf32>
    %84 = arith.mulf %78, %83 : vector<8x128xf32>
    %c0_45 = arith.constant 0 : index
    %c0_46 = arith.constant 0 : index
    %85 = vector.load %arg14[%c0_45, %c0_46] : memref<8x128xf32, #tpu.memory_space<vmem>>, vector<8x128xf32>
    tpu.vector_store %arg14[%c0_45, %c0_46], %82 {strides = array<i32>} : memref<8x128xf32, #tpu.memory_space<vmem>>, vector<8x128xf32>,
    %c0_47 = arith.constant 0 : index
    %c0_48 = arith.constant 0 : index
    %86 = vector.load %arg13[%c0_47, %c0_48] : memref<8x128xf32, #tpu.memory_space<vmem>>, vector<8x128xf32>
    tpu.vector_store %arg13[%c0_47, %c0_48], %84 {strides = array<i32>} : memref<8x128xf32, #tpu.memory_space<vmem>>, vector<8x128xf32>,
    %87 = arith.index_cast %c1_i32 : i32 to index
    %c0_49 = arith.constant 0 : index
    %c0_50 = arith.constant 0 : index
    %88 = vector.load %arg12[%87, %c0_49, %c0_50] : memref<8x8x128xf32, #tpu.memory_space<vmem>>, vector<1x8x128xf32>
    %89 = vector.shape_cast %88 : vector<1x8x128xf32> to vector<8x128xf32>
    %90 = vector.shape_cast %84 : vector<8x128xf32> to vector<1x8x128xf32>
    tpu.vector_store %arg12[%87, %c0_49, %c0_50], %90 {strides = array<i32>} : memref<8x8x128xf32, #tpu.memory_space<vmem>>, vector<1x8x128xf32>,
    %c2_i32 = arith.constant 2 : i32
    %91 = arith.index_cast %c2_i32 : i32 to index
    %c0_51 = arith.constant 0 : index
    %c0_52 = arith.constant 0 : index
    %92 = vector.load %arg11[%91, %c0_51, %c0_52] : memref<8x8x512xf32, #tpu.memory_space<vmem>>, vector<1x8x512xf32>
    %93 = vector.shape_cast %92 : vector<1x8x512xf32> to vector<8x512xf32>
    %c0_53 = arith.constant 0 : index
    %c0_54 = arith.constant 0 : index
    %94 = vector.load %arg13[%c0_53, %c0_54] : memref<8x128xf32, #tpu.memory_space<vmem>>, vector<8x128xf32>
    %c0_55 = arith.constant 0 : index
    %c0_56 = arith.constant 0 : index
    %95 = vector.load %arg3[%c0_55, %c0_56] : memref<128x512xf32, #tpu.memory_space<vmem>>, vector<128x512xf32>
    %cst_57 = arith.constant dense<0.000000e+00> : vector<8x512xf32>
    %96 = tpu.matmul %94, %95, %cst_57 {dimension_numbers = #tpu.dot_dimension_numbers<[1], [0], [0], [1], [0, 0, 1, 1], [], []>} : vector<8x128xf32>, vector<128x512xf32>, vector<8x512xf32> -> vector<8x512xf32>
    %97 = arith.addf %93, %96 : vector<8x512xf32>
    %98 = vector.extract_strided_slice %97 {offsets = [0, 0], sizes = [8, 128], strides = [1, 1]} : vector<8x512xf32> to vector<8x128xf32>
    %99 = arith.negf %98 : vector<8x128xf32>
    %100 = math.exp %99 : vector<8x128xf32>
    %cst_58 = arith.constant 1.000000e+00 : f32
    %101 = vector.broadcast %cst_58 : f32 to vector<8x128xf32>
    %102 = arith.addf %101, %100 : vector<8x128xf32>
    %103 = arith.divf %101, %102 : vector<8x128xf32>
    %104 = vector.extract_strided_slice %97 {offsets = [0, 128], sizes = [8, 128], strides = [1, 1]} : vector<8x512xf32> to vector<8x128xf32>
    %105 = arith.negf %104 : vector<8x128xf32>
    %106 = math.exp %105 : vector<8x128xf32>
    %cst_59 = arith.constant 1.000000e+00 : f32
    %107 = vector.broadcast %cst_59 : f32 to vector<8x128xf32>
    %108 = arith.addf %107, %106 : vector<8x128xf32>
    %109 = arith.divf %107, %108 : vector<8x128xf32>
    %110 = vector.extract_strided_slice %97 {offsets = [0, 256], sizes = [8, 128], strides = [1, 1]} : vector<8x512xf32> to vector<8x128xf32>
    %111 = math.tanh %110 : vector<8x128xf32>
    %112 = vector.extract_strided_slice %97 {offsets = [0, 384], sizes = [8, 128], strides = [1, 1]} : vector<8x512xf32> to vector<8x128xf32>
    %113 = arith.negf %112 : vector<8x128xf32>
    %114 = math.exp %113 : vector<8x128xf32>
    %cst_60 = arith.constant 1.000000e+00 : f32
    %115 = vector.broadcast %cst_60 : f32 to vector<8x128xf32>
    %116 = arith.addf %115, %114 : vector<8x128xf32>
    %117 = arith.divf %115, %116 : vector<8x128xf32>
    %c0_61 = arith.constant 0 : index
    %c0_62 = arith.constant 0 : index
    %118 = vector.load %arg14[%c0_61, %c0_62] : memref<8x128xf32, #tpu.memory_space<vmem>>, vector<8x128xf32>
    %119 = arith.mulf %109, %118 : vector<8x128xf32>
    %120 = arith.mulf %103, %111 : vector<8x128xf32>
    %121 = arith.addf %119, %120 : vector<8x128xf32>
    %122 = math.tanh %121 : vector<8x128xf32>
    %123 = arith.mulf %117, %122 : vector<8x128xf32>
    %c0_63 = arith.constant 0 : index
    %c0_64 = arith.constant 0 : index
    %124 = vector.load %arg14[%c0_63, %c0_64] : memref<8x128xf32, #tpu.memory_space<vmem>>, vector<8x128xf32>
    tpu.vector_store %arg14[%c0_63, %c0_64], %121 {strides = array<i32>} : memref<8x128xf32, #tpu.memory_space<vmem>>, vector<8x128xf32>,
    %c0_65 = arith.constant 0 : index
    %c0_66 = arith.constant 0 : index
    %125 = vector.load %arg13[%c0_65, %c0_66] : memref<8x128xf32, #tpu.memory_space<vmem>>, vector<8x128xf32>
    tpu.vector_store %arg13[%c0_65, %c0_66], %123 {strides = array<i32>} : memref<8x128xf32, #tpu.memory_space<vmem>>, vector<8x128xf32>,
    %126 = arith.index_cast %c2_i32 : i32 to index
    %c0_67 = arith.constant 0 : index
    %c0_68 = arith.constant 0 : index
    %127 = vector.load %arg12[%126, %c0_67, %c0_68] : memref<8x8x128xf32, #tpu.memory_space<vmem>>, vector<1x8x128xf32>
    %128 = vector.shape_cast %127 : vector<1x8x128xf32> to vector<8x128xf32>
    %129 = vector.shape_cast %123 : vector<8x128xf32> to vector<1x8x128xf32>
    tpu.vector_store %arg12[%126, %c0_67, %c0_68], %129 {strides = array<i32>} : memref<8x8x128xf32, #tpu.memory_space<vmem>>, vector<1x8x128xf32>,
    %c3_i32 = arith.constant 3 : i32
    %130 = arith.index_cast %c3_i32 : i32 to index
    %c0_69 = arith.constant 0 : index
    %c0_70 = arith.constant 0 : index
    %131 = vector.load %arg11[%130, %c0_69, %c0_70] : memref<8x8x512xf32, #tpu.memory_space<vmem>>, vector<1x8x512xf32>
    %132 = vector.shape_cast %131 : vector<1x8x512xf32> to vector<8x512xf32>
    %c0_71 = arith.constant 0 : index
    %c0_72 = arith.constant 0 : index
    %133 = vector.load %arg13[%c0_71, %c0_72] : memref<8x128xf32, #tpu.memory_space<vmem>>, vector<8x128xf32>
    %c0_73 = arith.constant 0 : index
    %c0_74 = arith.constant 0 : index
    %134 = vector.load %arg3[%c0_73, %c0_74] : memref<128x512xf32, #tpu.memory_space<vmem>>, vector<128x512xf32>
    %cst_75 = arith.constant dense<0.000000e+00> : vector<8x512xf32>
    %135 = tpu.matmul %133, %134, %cst_75 {dimension_numbers = #tpu.dot_dimension_numbers<[1], [0], [0], [1], [0, 0, 1, 1], [], []>} : vector<8x128xf32>, vector<128x512xf32>, vector<8x512xf32> -> vector<8x512xf32>
    %136 = arith.addf %132, %135 : vector<8x512xf32>
    %137 = vector.extract_strided_slice %136 {offsets = [0, 0], sizes = [8, 128], strides = [1, 1]} : vector<8x512xf32> to vector<8x128xf32>
    %138 = arith.negf %137 : vector<8x128xf32>
    %139 = math.exp %138 : vector<8x128xf32>
    %cst_76 = arith.constant 1.000000e+00 : f32
    %140 = vector.broadcast %cst_76 : f32 to vector<8x128xf32>
    %141 = arith.addf %140, %139 : vector<8x128xf32>
    %142 = arith.divf %140, %141 : vector<8x128xf32>
    %143 = vector.extract_strided_slice %136 {offsets = [0, 128], sizes = [8, 128], strides = [1, 1]} : vector<8x512xf32> to vector<8x128xf32>
    %144 = arith.negf %143 : vector<8x128xf32>
    %145 = math.exp %144 : vector<8x128xf32>
    %cst_77 = arith.constant 1.000000e+00 : f32
    %146 = vector.broadcast %cst_77 : f32 to vector<8x128xf32>
    %147 = arith.addf %146, %145 : vector<8x128xf32>
    %148 = arith.divf %146, %147 : vector<8x128xf32>
    %149 = vector.extract_strided_slice %136 {offsets = [0, 256], sizes = [8, 128], strides = [1, 1]} : vector<8x512xf32> to vector<8x128xf32>
    %150 = math.tanh %149 : vector<8x128xf32>
    %151 = vector.extract_strided_slice %136 {offsets = [0, 384], sizes = [8, 128], strides = [1, 1]} : vector<8x512xf32> to vector<8x128xf32>
    %152 = arith.negf %151 : vector<8x128xf32>
    %153 = math.exp %152 : vector<8x128xf32>
    %cst_78 = arith.constant 1.000000e+00 : f32
    %154 = vector.broadcast %cst_78 : f32 to vector<8x128xf32>
    %155 = arith.addf %154, %153 : vector<8x128xf32>
    %156 = arith.divf %154, %155 : vector<8x128xf32>
    %c0_79 = arith.constant 0 : index
    %c0_80 = arith.constant 0 : index
    %157 = vector.load %arg14[%c0_79, %c0_80] : memref<8x128xf32, #tpu.memory_space<vmem>>, vector<8x128xf32>
    %158 = arith.mulf %148, %157 : vector<8x128xf32>
    %159 = arith.mulf %142, %150 : vector<8x128xf32>
    %160 = arith.addf %158, %159 : vector<8x128xf32>
    %161 = math.tanh %160 : vector<8x128xf32>
    %162 = arith.mulf %156, %161 : vector<8x128xf32>
    %c0_81 = arith.constant 0 : index
    %c0_82 = arith.constant 0 : index
    %163 = vector.load %arg14[%c0_81, %c0_82] : memref<8x128xf32, #tpu.memory_space<vmem>>, vector<8x128xf32>
    tpu.vector_store %arg14[%c0_81, %c0_82], %160 {strides = array<i32>} : memref<8x128xf32, #tpu.memory_space<vmem>>, vector<8x128xf32>,
    %c0_83 = arith.constant 0 : index
    %c0_84 = arith.constant 0 : index
    %164 = vector.load %arg13[%c0_83, %c0_84] : memref<8x128xf32, #tpu.memory_space<vmem>>, vector<8x128xf32>
    tpu.vector_store %arg13[%c0_83, %c0_84], %162 {strides = array<i32>} : memref<8x128xf32, #tpu.memory_space<vmem>>, vector<8x128xf32>,
    %165 = arith.index_cast %c3_i32 : i32 to index
    %c0_85 = arith.constant 0 : index
    %c0_86 = arith.constant 0 : index
    %166 = vector.load %arg12[%165, %c0_85, %c0_86] : memref<8x8x128xf32, #tpu.memory_space<vmem>>, vector<1x8x128xf32>
    %167 = vector.shape_cast %166 : vector<1x8x128xf32> to vector<8x128xf32>
    %168 = vector.shape_cast %162 : vector<8x128xf32> to vector<1x8x128xf32>
    tpu.vector_store %arg12[%165, %c0_85, %c0_86], %168 {strides = array<i32>} : memref<8x8x128xf32, #tpu.memory_space<vmem>>, vector<1x8x128xf32>,
    %c4_i32 = arith.constant 4 : i32
    %169 = arith.index_cast %c4_i32 : i32 to index
    %c0_87 = arith.constant 0 : index
    %c0_88 = arith.constant 0 : index
    %170 = vector.load %arg11[%169, %c0_87, %c0_88] : memref<8x8x512xf32, #tpu.memory_space<vmem>>, vector<1x8x512xf32>
    %171 = vector.shape_cast %170 : vector<1x8x512xf32> to vector<8x512xf32>
    %c0_89 = arith.constant 0 : index
    %c0_90 = arith.constant 0 : index
    %172 = vector.load %arg13[%c0_89, %c0_90] : memref<8x128xf32, #tpu.memory_space<vmem>>, vector<8x128xf32>
    %c0_91 = arith.constant 0 : index
    %c0_92 = arith.constant 0 : index
    %173 = vector.load %arg3[%c0_91, %c0_92] : memref<128x512xf32, #tpu.memory_space<vmem>>, vector<128x512xf32>
    %cst_93 = arith.constant dense<0.000000e+00> : vector<8x512xf32>
    %174 = tpu.matmul %172, %173, %cst_93 {dimension_numbers = #tpu.dot_dimension_numbers<[1], [0], [0], [1], [0, 0, 1, 1], [], []>} : vector<8x128xf32>, vector<128x512xf32>, vector<8x512xf32> -> vector<8x512xf32>
    %175 = arith.addf %171, %174 : vector<8x512xf32>
    %176 = vector.extract_strided_slice %175 {offsets = [0, 0], sizes = [8, 128], strides = [1, 1]} : vector<8x512xf32> to vector<8x128xf32>
    %177 = arith.negf %176 : vector<8x128xf32>
    %178 = math.exp %177 : vector<8x128xf32>
    %cst_94 = arith.constant 1.000000e+00 : f32
    %179 = vector.broadcast %cst_94 : f32 to vector<8x128xf32>
    %180 = arith.addf %179, %178 : vector<8x128xf32>
    %181 = arith.divf %179, %180 : vector<8x128xf32>
    %182 = vector.extract_strided_slice %175 {offsets = [0, 128], sizes = [8, 128], strides = [1, 1]} : vector<8x512xf32> to vector<8x128xf32>
    %183 = arith.negf %182 : vector<8x128xf32>
    %184 = math.exp %183 : vector<8x128xf32>
    %cst_95 = arith.constant 1.000000e+00 : f32
    %185 = vector.broadcast %cst_95 : f32 to vector<8x128xf32>
    %186 = arith.addf %185, %184 : vector<8x128xf32>
    %187 = arith.divf %185, %186 : vector<8x128xf32>
    %188 = vector.extract_strided_slice %175 {offsets = [0, 256], sizes = [8, 128], strides = [1, 1]} : vector<8x512xf32> to vector<8x128xf32>
    %189 = math.tanh %188 : vector<8x128xf32>
    %190 = vector.extract_strided_slice %175 {offsets = [0, 384], sizes = [8, 128], strides = [1, 1]} : vector<8x512xf32> to vector<8x128xf32>
    %191 = arith.negf %190 : vector<8x128xf32>
    %192 = math.exp %191 : vector<8x128xf32>
    %cst_96 = arith.constant 1.000000e+00 : f32
    %193 = vector.broadcast %cst_96 : f32 to vector<8x128xf32>
    %194 = arith.addf %193, %192 : vector<8x128xf32>
    %195 = arith.divf %193, %194 : vector<8x128xf32>
    %c0_97 = arith.constant 0 : index
    %c0_98 = arith.constant 0 : index
    %196 = vector.load %arg14[%c0_97, %c0_98] : memref<8x128xf32, #tpu.memory_space<vmem>>, vector<8x128xf32>
    %197 = arith.mulf %187, %196 : vector<8x128xf32>
    %198 = arith.mulf %181, %189 : vector<8x128xf32>
    %199 = arith.addf %197, %198 : vector<8x128xf32>
    %200 = math.tanh %199 : vector<8x128xf32>
    %201 = arith.mulf %195, %200 : vector<8x128xf32>
    %c0_99 = arith.constant 0 : index
    %c0_100 = arith.constant 0 : index
    %202 = vector.load %arg14[%c0_99, %c0_100] : memref<8x128xf32, #tpu.memory_space<vmem>>, vector<8x128xf32>
    tpu.vector_store %arg14[%c0_99, %c0_100], %199 {strides = array<i32>} : memref<8x128xf32, #tpu.memory_space<vmem>>, vector<8x128xf32>,
    %c0_101 = arith.constant 0 : index
    %c0_102 = arith.constant 0 : index
    %203 = vector.load %arg13[%c0_101, %c0_102] : memref<8x128xf32, #tpu.memory_space<vmem>>, vector<8x128xf32>
    tpu.vector_store %arg13[%c0_101, %c0_102], %201 {strides = array<i32>} : memref<8x128xf32, #tpu.memory_space<vmem>>, vector<8x128xf32>,
    %204 = arith.index_cast %c4_i32 : i32 to index
    %c0_103 = arith.constant 0 : index
    %c0_104 = arith.constant 0 : index
    %205 = vector.load %arg12[%204, %c0_103, %c0_104] : memref<8x8x128xf32, #tpu.memory_space<vmem>>, vector<1x8x128xf32>
    %206 = vector.shape_cast %205 : vector<1x8x128xf32> to vector<8x128xf32>
    %207 = vector.shape_cast %201 : vector<8x128xf32> to vector<1x8x128xf32>
    tpu.vector_store %arg12[%204, %c0_103, %c0_104], %207 {strides = array<i32>} : memref<8x8x128xf32, #tpu.memory_space<vmem>>, vector<1x8x128xf32>,
    %c5_i32 = arith.constant 5 : i32
    %208 = arith.index_cast %c5_i32 : i32 to index
    %c0_105 = arith.constant 0 : index
    %c0_106 = arith.constant 0 : index
    %209 = vector.load %arg11[%208, %c0_105, %c0_106] : memref<8x8x512xf32, #tpu.memory_space<vmem>>, vector<1x8x512xf32>
    %210 = vector.shape_cast %209 : vector<1x8x512xf32> to vector<8x512xf32>
    %c0_107 = arith.constant 0 : index
    %c0_108 = arith.constant 0 : index
    %211 = vector.load %arg13[%c0_107, %c0_108] : memref<8x128xf32, #tpu.memory_space<vmem>>, vector<8x128xf32>
    %c0_109 = arith.constant 0 : index
    %c0_110 = arith.constant 0 : index
    %212 = vector.load %arg3[%c0_109, %c0_110] : memref<128x512xf32, #tpu.memory_space<vmem>>, vector<128x512xf32>
    %cst_111 = arith.constant dense<0.000000e+00> : vector<8x512xf32>
    %213 = tpu.matmul %211, %212, %cst_111 {dimension_numbers = #tpu.dot_dimension_numbers<[1], [0], [0], [1], [0, 0, 1, 1], [], []>} : vector<8x128xf32>, vector<128x512xf32>, vector<8x512xf32> -> vector<8x512xf32>
    %214 = arith.addf %210, %213 : vector<8x512xf32>
    %215 = vector.extract_strided_slice %214 {offsets = [0, 0], sizes = [8, 128], strides = [1, 1]} : vector<8x512xf32> to vector<8x128xf32>
    %216 = arith.negf %215 : vector<8x128xf32>
    %217 = math.exp %216 : vector<8x128xf32>
    %cst_112 = arith.constant 1.000000e+00 : f32
    %218 = vector.broadcast %cst_112 : f32 to vector<8x128xf32>
    %219 = arith.addf %218, %217 : vector<8x128xf32>
    %220 = arith.divf %218, %219 : vector<8x128xf32>
    %221 = vector.extract_strided_slice %214 {offsets = [0, 128], sizes = [8, 128], strides = [1, 1]} : vector<8x512xf32> to vector<8x128xf32>
    %222 = arith.negf %221 : vector<8x128xf32>
    %223 = math.exp %222 : vector<8x128xf32>
    %cst_113 = arith.constant 1.000000e+00 : f32
    %224 = vector.broadcast %cst_113 : f32 to vector<8x128xf32>
    %225 = arith.addf %224, %223 : vector<8x128xf32>
    %226 = arith.divf %224, %225 : vector<8x128xf32>
    %227 = vector.extract_strided_slice %214 {offsets = [0, 256], sizes = [8, 128], strides = [1, 1]} : vector<8x512xf32> to vector<8x128xf32>
    %228 = math.tanh %227 : vector<8x128xf32>
    %229 = vector.extract_strided_slice %214 {offsets = [0, 384], sizes = [8, 128], strides = [1, 1]} : vector<8x512xf32> to vector<8x128xf32>
    %230 = arith.negf %229 : vector<8x128xf32>
    %231 = math.exp %230 : vector<8x128xf32>
    %cst_114 = arith.constant 1.000000e+00 : f32
    %232 = vector.broadcast %cst_114 : f32 to vector<8x128xf32>
    %233 = arith.addf %232, %231 : vector<8x128xf32>
    %234 = arith.divf %232, %233 : vector<8x128xf32>
    %c0_115 = arith.constant 0 : index
    %c0_116 = arith.constant 0 : index
    %235 = vector.load %arg14[%c0_115, %c0_116] : memref<8x128xf32, #tpu.memory_space<vmem>>, vector<8x128xf32>
    %236 = arith.mulf %226, %235 : vector<8x128xf32>
    %237 = arith.mulf %220, %228 : vector<8x128xf32>
    %238 = arith.addf %236, %237 : vector<8x128xf32>
    %239 = math.tanh %238 : vector<8x128xf32>
    %240 = arith.mulf %234, %239 : vector<8x128xf32>
    %c0_117 = arith.constant 0 : index
    %c0_118 = arith.constant 0 : index
    %241 = vector.load %arg14[%c0_117, %c0_118] : memref<8x128xf32, #tpu.memory_space<vmem>>, vector<8x128xf32>
    tpu.vector_store %arg14[%c0_117, %c0_118], %238 {strides = array<i32>} : memref<8x128xf32, #tpu.memory_space<vmem>>, vector<8x128xf32>,
    %c0_119 = arith.constant 0 : index
    %c0_120 = arith.constant 0 : index
    %242 = vector.load %arg13[%c0_119, %c0_120] : memref<8x128xf32, #tpu.memory_space<vmem>>, vector<8x128xf32>
    tpu.vector_store %arg13[%c0_119, %c0_120], %240 {strides = array<i32>} : memref<8x128xf32, #tpu.memory_space<vmem>>, vector<8x128xf32>,
    %243 = arith.index_cast %c5_i32 : i32 to index
    %c0_121 = arith.constant 0 : index
    %c0_122 = arith.constant 0 : index
    %244 = vector.load %arg12[%243, %c0_121, %c0_122] : memref<8x8x128xf32, #tpu.memory_space<vmem>>, vector<1x8x128xf32>
    %245 = vector.shape_cast %244 : vector<1x8x128xf32> to vector<8x128xf32>
    %246 = vector.shape_cast %240 : vector<8x128xf32> to vector<1x8x128xf32>
    tpu.vector_store %arg12[%243, %c0_121, %c0_122], %246 {strides = array<i32>} : memref<8x8x128xf32, #tpu.memory_space<vmem>>, vector<1x8x128xf32>,
    %c6_i32 = arith.constant 6 : i32
    %247 = arith.index_cast %c6_i32 : i32 to index
    %c0_123 = arith.constant 0 : index
    %c0_124 = arith.constant 0 : index
    %248 = vector.load %arg11[%247, %c0_123, %c0_124] : memref<8x8x512xf32, #tpu.memory_space<vmem>>, vector<1x8x512xf32>
    %249 = vector.shape_cast %248 : vector<1x8x512xf32> to vector<8x512xf32>
    %c0_125 = arith.constant 0 : index
    %c0_126 = arith.constant 0 : index
    %250 = vector.load %arg13[%c0_125, %c0_126] : memref<8x128xf32, #tpu.memory_space<vmem>>, vector<8x128xf32>
    %c0_127 = arith.constant 0 : index
    %c0_128 = arith.constant 0 : index
    %251 = vector.load %arg3[%c0_127, %c0_128] : memref<128x512xf32, #tpu.memory_space<vmem>>, vector<128x512xf32>
    %cst_129 = arith.constant dense<0.000000e+00> : vector<8x512xf32>
    %252 = tpu.matmul %250, %251, %cst_129 {dimension_numbers = #tpu.dot_dimension_numbers<[1], [0], [0], [1], [0, 0, 1, 1], [], []>} : vector<8x128xf32>, vector<128x512xf32>, vector<8x512xf32> -> vector<8x512xf32>
    %253 = arith.addf %249, %252 : vector<8x512xf32>
    %254 = vector.extract_strided_slice %253 {offsets = [0, 0], sizes = [8, 128], strides = [1, 1]} : vector<8x512xf32> to vector<8x128xf32>
    %255 = arith.negf %254 : vector<8x128xf32>
    %256 = math.exp %255 : vector<8x128xf32>
    %cst_130 = arith.constant 1.000000e+00 : f32
    %257 = vector.broadcast %cst_130 : f32 to vector<8x128xf32>
    %258 = arith.addf %257, %256 : vector<8x128xf32>
    %259 = arith.divf %257, %258 : vector<8x128xf32>
    %260 = vector.extract_strided_slice %253 {offsets = [0, 128], sizes = [8, 128], strides = [1, 1]} : vector<8x512xf32> to vector<8x128xf32>
    %261 = arith.negf %260 : vector<8x128xf32>
    %262 = math.exp %261 : vector<8x128xf32>
    %cst_131 = arith.constant 1.000000e+00 : f32
    %263 = vector.broadcast %cst_131 : f32 to vector<8x128xf32>
    %264 = arith.addf %263, %262 : vector<8x128xf32>
    %265 = arith.divf %263, %264 : vector<8x128xf32>
    %266 = vector.extract_strided_slice %253 {offsets = [0, 256], sizes = [8, 128], strides = [1, 1]} : vector<8x512xf32> to vector<8x128xf32>
    %267 = math.tanh %266 : vector<8x128xf32>
    %268 = vector.extract_strided_slice %253 {offsets = [0, 384], sizes = [8, 128], strides = [1, 1]} : vector<8x512xf32> to vector<8x128xf32>
    %269 = arith.negf %268 : vector<8x128xf32>
    %270 = math.exp %269 : vector<8x128xf32>
    %cst_132 = arith.constant 1.000000e+00 : f32
    %271 = vector.broadcast %cst_132 : f32 to vector<8x128xf32>
    %272 = arith.addf %271, %270 : vector<8x128xf32>
    %273 = arith.divf %271, %272 : vector<8x128xf32>
    %c0_133 = arith.constant 0 : index
    %c0_134 = arith.constant 0 : index
    %274 = vector.load %arg14[%c0_133, %c0_134] : memref<8x128xf32, #tpu.memory_space<vmem>>, vector<8x128xf32>
    %275 = arith.mulf %265, %274 : vector<8x128xf32>
    %276 = arith.mulf %259, %267 : vector<8x128xf32>
    %277 = arith.addf %275, %276 : vector<8x128xf32>
    %278 = math.tanh %277 : vector<8x128xf32>
    %279 = arith.mulf %273, %278 : vector<8x128xf32>
    %c0_135 = arith.constant 0 : index
    %c0_136 = arith.constant 0 : index
    %280 = vector.load %arg14[%c0_135, %c0_136] : memref<8x128xf32, #tpu.memory_space<vmem>>, vector<8x128xf32>
    tpu.vector_store %arg14[%c0_135, %c0_136], %277 {strides = array<i32>} : memref<8x128xf32, #tpu.memory_space<vmem>>, vector<8x128xf32>,
    %c0_137 = arith.constant 0 : index
    %c0_138 = arith.constant 0 : index
    %281 = vector.load %arg13[%c0_137, %c0_138] : memref<8x128xf32, #tpu.memory_space<vmem>>, vector<8x128xf32>
    tpu.vector_store %arg13[%c0_137, %c0_138], %279 {strides = array<i32>} : memref<8x128xf32, #tpu.memory_space<vmem>>, vector<8x128xf32>,
    %282 = arith.index_cast %c6_i32 : i32 to index
    %c0_139 = arith.constant 0 : index
    %c0_140 = arith.constant 0 : index
    %283 = vector.load %arg12[%282, %c0_139, %c0_140] : memref<8x8x128xf32, #tpu.memory_space<vmem>>, vector<1x8x128xf32>
    %284 = vector.shape_cast %283 : vector<1x8x128xf32> to vector<8x128xf32>
    %285 = vector.shape_cast %279 : vector<8x128xf32> to vector<1x8x128xf32>
    tpu.vector_store %arg12[%282, %c0_139, %c0_140], %285 {strides = array<i32>} : memref<8x8x128xf32, #tpu.memory_space<vmem>>, vector<1x8x128xf32>,
    %c7_i32 = arith.constant 7 : i32
    %286 = arith.index_cast %c7_i32 : i32 to index
    %c0_141 = arith.constant 0 : index
    %c0_142 = arith.constant 0 : index
    %287 = vector.load %arg11[%286, %c0_141, %c0_142] : memref<8x8x512xf32, #tpu.memory_space<vmem>>, vector<1x8x512xf32>
    %288 = vector.shape_cast %287 : vector<1x8x512xf32> to vector<8x512xf32>
    %c0_143 = arith.constant 0 : index
    %c0_144 = arith.constant 0 : index
    %289 = vector.load %arg13[%c0_143, %c0_144] : memref<8x128xf32, #tpu.memory_space<vmem>>, vector<8x128xf32>
    %c0_145 = arith.constant 0 : index
    %c0_146 = arith.constant 0 : index
    %290 = vector.load %arg3[%c0_145, %c0_146] : memref<128x512xf32, #tpu.memory_space<vmem>>, vector<128x512xf32>
    %cst_147 = arith.constant dense<0.000000e+00> : vector<8x512xf32>
    %291 = tpu.matmul %289, %290, %cst_147 {dimension_numbers = #tpu.dot_dimension_numbers<[1], [0], [0], [1], [0, 0, 1, 1], [], []>} : vector<8x128xf32>, vector<128x512xf32>, vector<8x512xf32> -> vector<8x512xf32>
    %292 = arith.addf %288, %291 : vector<8x512xf32>
    %293 = vector.extract_strided_slice %292 {offsets = [0, 0], sizes = [8, 128], strides = [1, 1]} : vector<8x512xf32> to vector<8x128xf32>
    %294 = arith.negf %293 : vector<8x128xf32>
    %295 = math.exp %294 : vector<8x128xf32>
    %cst_148 = arith.constant 1.000000e+00 : f32
    %296 = vector.broadcast %cst_148 : f32 to vector<8x128xf32>
    %297 = arith.addf %296, %295 : vector<8x128xf32>
    %298 = arith.divf %296, %297 : vector<8x128xf32>
    %299 = vector.extract_strided_slice %292 {offsets = [0, 128], sizes = [8, 128], strides = [1, 1]} : vector<8x512xf32> to vector<8x128xf32>
    %300 = arith.negf %299 : vector<8x128xf32>
    %301 = math.exp %300 : vector<8x128xf32>
    %cst_149 = arith.constant 1.000000e+00 : f32
    %302 = vector.broadcast %cst_149 : f32 to vector<8x128xf32>
    %303 = arith.addf %302, %301 : vector<8x128xf32>
    %304 = arith.divf %302, %303 : vector<8x128xf32>
    %305 = vector.extract_strided_slice %292 {offsets = [0, 256], sizes = [8, 128], strides = [1, 1]} : vector<8x512xf32> to vector<8x128xf32>
    %306 = math.tanh %305 : vector<8x128xf32>
    %307 = vector.extract_strided_slice %292 {offsets = [0, 384], sizes = [8, 128], strides = [1, 1]} : vector<8x512xf32> to vector<8x128xf32>
    %308 = arith.negf %307 : vector<8x128xf32>
    %309 = math.exp %308 : vector<8x128xf32>
    %cst_150 = arith.constant 1.000000e+00 : f32
    %310 = vector.broadcast %cst_150 : f32 to vector<8x128xf32>
    %311 = arith.addf %310, %309 : vector<8x128xf32>
    %312 = arith.divf %310, %311 : vector<8x128xf32>
    %c0_151 = arith.constant 0 : index
    %c0_152 = arith.constant 0 : index
    %313 = vector.load %arg14[%c0_151, %c0_152] : memref<8x128xf32, #tpu.memory_space<vmem>>, vector<8x128xf32>
    %314 = arith.mulf %304, %313 : vector<8x128xf32>
    %315 = arith.mulf %298, %306 : vector<8x128xf32>
    %316 = arith.addf %314, %315 : vector<8x128xf32>
    %317 = math.tanh %316 : vector<8x128xf32>
    %318 = arith.mulf %312, %317 : vector<8x128xf32>
    %c0_153 = arith.constant 0 : index
    %c0_154 = arith.constant 0 : index
    %319 = vector.load %arg14[%c0_153, %c0_154] : memref<8x128xf32, #tpu.memory_space<vmem>>, vector<8x128xf32>
    tpu.vector_store %arg14[%c0_153, %c0_154], %316 {strides = array<i32>} : memref<8x128xf32, #tpu.memory_space<vmem>>, vector<8x128xf32>,
    %c0_155 = arith.constant 0 : index
    %c0_156 = arith.constant 0 : index
    %320 = vector.load %arg13[%c0_155, %c0_156] : memref<8x128xf32, #tpu.memory_space<vmem>>, vector<8x128xf32>
    tpu.vector_store %arg13[%c0_155, %c0_156], %318 {strides = array<i32>} : memref<8x128xf32, #tpu.memory_space<vmem>>, vector<8x128xf32>,
    %321 = arith.index_cast %c7_i32 : i32 to index
    %c0_157 = arith.constant 0 : index
    %c0_158 = arith.constant 0 : index
    %322 = vector.load %arg12[%321, %c0_157, %c0_158] : memref<8x8x128xf32, #tpu.memory_space<vmem>>, vector<1x8x128xf32>
    %323 = vector.shape_cast %322 : vector<1x8x128xf32> to vector<8x128xf32>
    %324 = vector.shape_cast %318 : vector<8x128xf32> to vector<1x8x128xf32>
    tpu.vector_store %arg12[%321, %c0_157, %c0_158], %324 {strides = array<i32>} : memref<8x8x128xf32, #tpu.memory_space<vmem>>, vector<1x8x128xf32>,
    %c8_i32 = arith.constant 8 : i32
    %c0_159 = arith.constant 0 : index
    %c0_160 = arith.constant 0 : index
    %c0_161 = arith.constant 0 : index
    %325 = vector.load %arg12[%c0_159, %c0_160, %c0_161] : memref<8x8x128xf32, #tpu.memory_space<vmem>>, vector<8x8x128xf32>
    %326 = vector.shape_cast %325 : vector<8x8x128xf32> to vector<64x128xf32>
    %c0_162 = arith.constant 0 : index
    %c0_163 = arith.constant 0 : index
    %327 = vector.load %arg5[%c0_162, %c0_163] : memref<128x512xf32, #tpu.memory_space<vmem>>, vector<128x512xf32>
    %cst_164 = arith.constant dense<0.000000e+00> : vector<64x512xf32>
    %328 = tpu.matmul %326, %327, %cst_164 {dimension_numbers = #tpu.dot_dimension_numbers<[1], [0], [0], [1], [0, 0, 1, 1], [], []>} : vector<64x128xf32>, vector<128x512xf32>, vector<64x512xf32> -> vector<64x512xf32>
    %c0_165 = arith.constant 0 : index
    %c0_166 = arith.constant 0 : index
    %329 = vector.load %arg7[%c0_165, %c0_166] : memref<1x512xf32, #tpu.memory_space<vmem>>, vector<1x512xf32>
    %330 = vector.broadcast %329 : vector<1x512xf32> to vector<64x512xf32>
    %331 = arith.addf %328, %330 : vector<64x512xf32>
    %332 = vector.shape_cast %331 : vector<64x512xf32> to vector<8x8x512xf32>
    %c0_167 = arith.constant 0 : index
    %c0_168 = arith.constant 0 : index
    %c0_169 = arith.constant 0 : index
    %333 = vector.load %arg11[%c0_167, %c0_168, %c0_169] : memref<8x8x512xf32, #tpu.memory_space<vmem>>, vector<8x8x512xf32>
    tpu.vector_store %arg11[%c0_167, %c0_168, %c0_169], %332 {strides = array<i32>} : memref<8x8x512xf32, #tpu.memory_space<vmem>>, vector<8x8x512xf32>,
    %cst_170 = arith.constant 0.000000e+00 : f32
    %334 = vector.broadcast %cst_170 : f32 to vector<8x128xf32>
    %c0_171 = arith.constant 0 : index
    %c0_172 = arith.constant 0 : index
    %335 = vector.load %arg13[%c0_171, %c0_172] : memref<8x128xf32, #tpu.memory_space<vmem>>, vector<8x128xf32>
    tpu.vector_store %arg13[%c0_171, %c0_172], %334 {strides = array<i32>} : memref<8x128xf32, #tpu.memory_space<vmem>>, vector<8x128xf32>,
    %cst_173 = arith.constant 0.000000e+00 : f32
    %336 = vector.broadcast %cst_173 : f32 to vector<8x128xf32>
    %c0_174 = arith.constant 0 : index
    %c0_175 = arith.constant 0 : index
    %337 = vector.load %arg14[%c0_174, %c0_175] : memref<8x128xf32, #tpu.memory_space<vmem>>, vector<8x128xf32>
    tpu.vector_store %arg14[%c0_174, %c0_175], %336 {strides = array<i32>} : memref<8x128xf32, #tpu.memory_space<vmem>>, vector<8x128xf32>,
    %c0_i32_176 = arith.constant 0 : i32
    %338 = arith.index_cast %c0_i32_176 : i32 to index
    %c0_177 = arith.constant 0 : index
    %c0_178 = arith.constant 0 : index
    %339 = vector.load %arg11[%338, %c0_177, %c0_178] : memref<8x8x512xf32, #tpu.memory_space<vmem>>, vector<1x8x512xf32>
    %340 = vector.shape_cast %339 : vector<1x8x512xf32> to vector<8x512xf32>
    %c0_179 = arith.constant 0 : index
    %c0_180 = arith.constant 0 : index
    %341 = vector.load %arg13[%c0_179, %c0_180] : memref<8x128xf32, #tpu.memory_space<vmem>>, vector<8x128xf32>
    %c0_181 = arith.constant 0 : index
    %c0_182 = arith.constant 0 : index
    %342 = vector.load %arg6[%c0_181, %c0_182] : memref<128x512xf32, #tpu.memory_space<vmem>>, vector<128x512xf32>
    %cst_183 = arith.constant dense<0.000000e+00> : vector<8x512xf32>
    %343 = tpu.matmul %341, %342, %cst_183 {dimension_numbers = #tpu.dot_dimension_numbers<[1], [0], [0], [1], [0, 0, 1, 1], [], []>} : vector<8x128xf32>, vector<128x512xf32>, vector<8x512xf32> -> vector<8x512xf32>
    %344 = arith.addf %340, %343 : vector<8x512xf32>
    %345 = vector.extract_strided_slice %344 {offsets = [0, 0], sizes = [8, 128], strides = [1, 1]} : vector<8x512xf32> to vector<8x128xf32>
    %346 = arith.negf %345 : vector<8x128xf32>
    %347 = math.exp %346 : vector<8x128xf32>
    %cst_184 = arith.constant 1.000000e+00 : f32
    %348 = vector.broadcast %cst_184 : f32 to vector<8x128xf32>
    %349 = arith.addf %348, %347 : vector<8x128xf32>
    %350 = arith.divf %348, %349 : vector<8x128xf32>
    %351 = vector.extract_strided_slice %344 {offsets = [0, 128], sizes = [8, 128], strides = [1, 1]} : vector<8x512xf32> to vector<8x128xf32>
    %352 = arith.negf %351 : vector<8x128xf32>
    %353 = math.exp %352 : vector<8x128xf32>
    %cst_185 = arith.constant 1.000000e+00 : f32
    %354 = vector.broadcast %cst_185 : f32 to vector<8x128xf32>
    %355 = arith.addf %354, %353 : vector<8x128xf32>
    %356 = arith.divf %354, %355 : vector<8x128xf32>
    %357 = vector.extract_strided_slice %344 {offsets = [0, 256], sizes = [8, 128], strides = [1, 1]} : vector<8x512xf32> to vector<8x128xf32>
    %358 = math.tanh %357 : vector<8x128xf32>
    %359 = vector.extract_strided_slice %344 {offsets = [0, 384], sizes = [8, 128], strides = [1, 1]} : vector<8x512xf32> to vector<8x128xf32>
    %360 = arith.negf %359 : vector<8x128xf32>
    %361 = math.exp %360 : vector<8x128xf32>
    %cst_186 = arith.constant 1.000000e+00 : f32
    %362 = vector.broadcast %cst_186 : f32 to vector<8x128xf32>
    %363 = arith.addf %362, %361 : vector<8x128xf32>
    %364 = arith.divf %362, %363 : vector<8x128xf32>
    %c0_187 = arith.constant 0 : index
    %c0_188 = arith.constant 0 : index
    %365 = vector.load %arg14[%c0_187, %c0_188] : memref<8x128xf32, #tpu.memory_space<vmem>>, vector<8x128xf32>
    %366 = arith.mulf %356, %365 : vector<8x128xf32>
    %367 = arith.mulf %350, %358 : vector<8x128xf32>
    %368 = arith.addf %366, %367 : vector<8x128xf32>
    %369 = math.tanh %368 : vector<8x128xf32>
    %370 = arith.mulf %364, %369 : vector<8x128xf32>
    %c0_189 = arith.constant 0 : index
    %c0_190 = arith.constant 0 : index
    %371 = vector.load %arg14[%c0_189, %c0_190] : memref<8x128xf32, #tpu.memory_space<vmem>>, vector<8x128xf32>
    tpu.vector_store %arg14[%c0_189, %c0_190], %368 {strides = array<i32>} : memref<8x128xf32, #tpu.memory_space<vmem>>, vector<8x128xf32>,
    %c0_191 = arith.constant 0 : index
    %c0_192 = arith.constant 0 : index
    %372 = vector.load %arg13[%c0_191, %c0_192] : memref<8x128xf32, #tpu.memory_space<vmem>>, vector<8x128xf32>
    tpu.vector_store %arg13[%c0_191, %c0_192], %370 {strides = array<i32>} : memref<8x128xf32, #tpu.memory_space<vmem>>, vector<8x128xf32>,
    %c1_i32_193 = arith.constant 1 : i32
    %373 = arith.index_cast %c1_i32_193 : i32 to index
    %c0_194 = arith.constant 0 : index
    %c0_195 = arith.constant 0 : index
    %374 = vector.load %arg11[%373, %c0_194, %c0_195] : memref<8x8x512xf32, #tpu.memory_space<vmem>>, vector<1x8x512xf32>
    %375 = vector.shape_cast %374 : vector<1x8x512xf32> to vector<8x512xf32>
    %c0_196 = arith.constant 0 : index
    %c0_197 = arith.constant 0 : index
    %376 = vector.load %arg13[%c0_196, %c0_197] : memref<8x128xf32, #tpu.memory_space<vmem>>, vector<8x128xf32>
    %c0_198 = arith.constant 0 : index
    %c0_199 = arith.constant 0 : index
    %377 = vector.load %arg6[%c0_198, %c0_199] : memref<128x512xf32, #tpu.memory_space<vmem>>, vector<128x512xf32>
    %cst_200 = arith.constant dense<0.000000e+00> : vector<8x512xf32>
    %378 = tpu.matmul %376, %377, %cst_200 {dimension_numbers = #tpu.dot_dimension_numbers<[1], [0], [0], [1], [0, 0, 1, 1], [], []>} : vector<8x128xf32>, vector<128x512xf32>, vector<8x512xf32> -> vector<8x512xf32>
    %379 = arith.addf %375, %378 : vector<8x512xf32>
    %380 = vector.extract_strided_slice %379 {offsets = [0, 0], sizes = [8, 128], strides = [1, 1]} : vector<8x512xf32> to vector<8x128xf32>
    %381 = arith.negf %380 : vector<8x128xf32>
    %382 = math.exp %381 : vector<8x128xf32>
    %cst_201 = arith.constant 1.000000e+00 : f32
    %383 = vector.broadcast %cst_201 : f32 to vector<8x128xf32>
    %384 = arith.addf %383, %382 : vector<8x128xf32>
    %385 = arith.divf %383, %384 : vector<8x128xf32>
    %386 = vector.extract_strided_slice %379 {offsets = [0, 128], sizes = [8, 128], strides = [1, 1]} : vector<8x512xf32> to vector<8x128xf32>
    %387 = arith.negf %386 : vector<8x128xf32>
    %388 = math.exp %387 : vector<8x128xf32>
    %cst_202 = arith.constant 1.000000e+00 : f32
    %389 = vector.broadcast %cst_202 : f32 to vector<8x128xf32>
    %390 = arith.addf %389, %388 : vector<8x128xf32>
    %391 = arith.divf %389, %390 : vector<8x128xf32>
    %392 = vector.extract_strided_slice %379 {offsets = [0, 256], sizes = [8, 128], strides = [1, 1]} : vector<8x512xf32> to vector<8x128xf32>
    %393 = math.tanh %392 : vector<8x128xf32>
    %394 = vector.extract_strided_slice %379 {offsets = [0, 384], sizes = [8, 128], strides = [1, 1]} : vector<8x512xf32> to vector<8x128xf32>
    %395 = arith.negf %394 : vector<8x128xf32>
    %396 = math.exp %395 : vector<8x128xf32>
    %cst_203 = arith.constant 1.000000e+00 : f32
    %397 = vector.broadcast %cst_203 : f32 to vector<8x128xf32>
    %398 = arith.addf %397, %396 : vector<8x128xf32>
    %399 = arith.divf %397, %398 : vector<8x128xf32>
    %c0_204 = arith.constant 0 : index
    %c0_205 = arith.constant 0 : index
    %400 = vector.load %arg14[%c0_204, %c0_205] : memref<8x128xf32, #tpu.memory_space<vmem>>, vector<8x128xf32>
    %401 = arith.mulf %391, %400 : vector<8x128xf32>
    %402 = arith.mulf %385, %393 : vector<8x128xf32>
    %403 = arith.addf %401, %402 : vector<8x128xf32>
    %404 = math.tanh %403 : vector<8x128xf32>
    %405 = arith.mulf %399, %404 : vector<8x128xf32>
    %c0_206 = arith.constant 0 : index
    %c0_207 = arith.constant 0 : index
    %406 = vector.load %arg14[%c0_206, %c0_207] : memref<8x128xf32, #tpu.memory_space<vmem>>, vector<8x128xf32>
    tpu.vector_store %arg14[%c0_206, %c0_207], %403 {strides = array<i32>} : memref<8x128xf32, #tpu.memory_space<vmem>>, vector<8x128xf32>,
    %c0_208 = arith.constant 0 : index
    %c0_209 = arith.constant 0 : index
    %407 = vector.load %arg13[%c0_208, %c0_209] : memref<8x128xf32, #tpu.memory_space<vmem>>, vector<8x128xf32>
    tpu.vector_store %arg13[%c0_208, %c0_209], %405 {strides = array<i32>} : memref<8x128xf32, #tpu.memory_space<vmem>>, vector<8x128xf32>,
    %c2_i32_210 = arith.constant 2 : i32
    %408 = arith.index_cast %c2_i32_210 : i32 to index
    %c0_211 = arith.constant 0 : index
    %c0_212 = arith.constant 0 : index
    %409 = vector.load %arg11[%408, %c0_211, %c0_212] : memref<8x8x512xf32, #tpu.memory_space<vmem>>, vector<1x8x512xf32>
    %410 = vector.shape_cast %409 : vector<1x8x512xf32> to vector<8x512xf32>
    %c0_213 = arith.constant 0 : index
    %c0_214 = arith.constant 0 : index
    %411 = vector.load %arg13[%c0_213, %c0_214] : memref<8x128xf32, #tpu.memory_space<vmem>>, vector<8x128xf32>
    %c0_215 = arith.constant 0 : index
    %c0_216 = arith.constant 0 : index
    %412 = vector.load %arg6[%c0_215, %c0_216] : memref<128x512xf32, #tpu.memory_space<vmem>>, vector<128x512xf32>
    %cst_217 = arith.constant dense<0.000000e+00> : vector<8x512xf32>
    %413 = tpu.matmul %411, %412, %cst_217 {dimension_numbers = #tpu.dot_dimension_numbers<[1], [0], [0], [1], [0, 0, 1, 1], [], []>} : vector<8x128xf32>, vector<128x512xf32>, vector<8x512xf32> -> vector<8x512xf32>
    %414 = arith.addf %410, %413 : vector<8x512xf32>
    %415 = vector.extract_strided_slice %414 {offsets = [0, 0], sizes = [8, 128], strides = [1, 1]} : vector<8x512xf32> to vector<8x128xf32>
    %416 = arith.negf %415 : vector<8x128xf32>
    %417 = math.exp %416 : vector<8x128xf32>
    %cst_218 = arith.constant 1.000000e+00 : f32
    %418 = vector.broadcast %cst_218 : f32 to vector<8x128xf32>
    %419 = arith.addf %418, %417 : vector<8x128xf32>
    %420 = arith.divf %418, %419 : vector<8x128xf32>
    %421 = vector.extract_strided_slice %414 {offsets = [0, 128], sizes = [8, 128], strides = [1, 1]} : vector<8x512xf32> to vector<8x128xf32>
    %422 = arith.negf %421 : vector<8x128xf32>
    %423 = math.exp %422 : vector<8x128xf32>
    %cst_219 = arith.constant 1.000000e+00 : f32
    %424 = vector.broadcast %cst_219 : f32 to vector<8x128xf32>
    %425 = arith.addf %424, %423 : vector<8x128xf32>
    %426 = arith.divf %424, %425 : vector<8x128xf32>
    %427 = vector.extract_strided_slice %414 {offsets = [0, 256], sizes = [8, 128], strides = [1, 1]} : vector<8x512xf32> to vector<8x128xf32>
    %428 = math.tanh %427 : vector<8x128xf32>
    %429 = vector.extract_strided_slice %414 {offsets = [0, 384], sizes = [8, 128], strides = [1, 1]} : vector<8x512xf32> to vector<8x128xf32>
    %430 = arith.negf %429 : vector<8x128xf32>
    %431 = math.exp %430 : vector<8x128xf32>
    %cst_220 = arith.constant 1.000000e+00 : f32
    %432 = vector.broadcast %cst_220 : f32 to vector<8x128xf32>
    %433 = arith.addf %432, %431 : vector<8x128xf32>
    %434 = arith.divf %432, %433 : vector<8x128xf32>
    %c0_221 = arith.constant 0 : index
    %c0_222 = arith.constant 0 : index
    %435 = vector.load %arg14[%c0_221, %c0_222] : memref<8x128xf32, #tpu.memory_space<vmem>>, vector<8x128xf32>
    %436 = arith.mulf %426, %435 : vector<8x128xf32>
    %437 = arith.mulf %420, %428 : vector<8x128xf32>
    %438 = arith.addf %436, %437 : vector<8x128xf32>
    %439 = math.tanh %438 : vector<8x128xf32>
    %440 = arith.mulf %434, %439 : vector<8x128xf32>
    %c0_223 = arith.constant 0 : index
    %c0_224 = arith.constant 0 : index
    %441 = vector.load %arg14[%c0_223, %c0_224] : memref<8x128xf32, #tpu.memory_space<vmem>>, vector<8x128xf32>
    tpu.vector_store %arg14[%c0_223, %c0_224], %438 {strides = array<i32>} : memref<8x128xf32, #tpu.memory_space<vmem>>, vector<8x128xf32>,
    %c0_225 = arith.constant 0 : index
    %c0_226 = arith.constant 0 : index
    %442 = vector.load %arg13[%c0_225, %c0_226] : memref<8x128xf32, #tpu.memory_space<vmem>>, vector<8x128xf32>
    tpu.vector_store %arg13[%c0_225, %c0_226], %440 {strides = array<i32>} : memref<8x128xf32, #tpu.memory_space<vmem>>, vector<8x128xf32>,
    %c3_i32_227 = arith.constant 3 : i32
    %443 = arith.index_cast %c3_i32_227 : i32 to index
    %c0_228 = arith.constant 0 : index
    %c0_229 = arith.constant 0 : index
    %444 = vector.load %arg11[%443, %c0_228, %c0_229] : memref<8x8x512xf32, #tpu.memory_space<vmem>>, vector<1x8x512xf32>
    %445 = vector.shape_cast %444 : vector<1x8x512xf32> to vector<8x512xf32>
    %c0_230 = arith.constant 0 : index
    %c0_231 = arith.constant 0 : index
    %446 = vector.load %arg13[%c0_230, %c0_231] : memref<8x128xf32, #tpu.memory_space<vmem>>, vector<8x128xf32>
    %c0_232 = arith.constant 0 : index
    %c0_233 = arith.constant 0 : index
    %447 = vector.load %arg6[%c0_232, %c0_233] : memref<128x512xf32, #tpu.memory_space<vmem>>, vector<128x512xf32>
    %cst_234 = arith.constant dense<0.000000e+00> : vector<8x512xf32>
    %448 = tpu.matmul %446, %447, %cst_234 {dimension_numbers = #tpu.dot_dimension_numbers<[1], [0], [0], [1], [0, 0, 1, 1], [], []>} : vector<8x128xf32>, vector<128x512xf32>, vector<8x512xf32> -> vector<8x512xf32>
    %449 = arith.addf %445, %448 : vector<8x512xf32>
    %450 = vector.extract_strided_slice %449 {offsets = [0, 0], sizes = [8, 128], strides = [1, 1]} : vector<8x512xf32> to vector<8x128xf32>
    %451 = arith.negf %450 : vector<8x128xf32>
    %452 = math.exp %451 : vector<8x128xf32>
    %cst_235 = arith.constant 1.000000e+00 : f32
    %453 = vector.broadcast %cst_235 : f32 to vector<8x128xf32>
    %454 = arith.addf %453, %452 : vector<8x128xf32>
    %455 = arith.divf %453, %454 : vector<8x128xf32>
    %456 = vector.extract_strided_slice %449 {offsets = [0, 128], sizes = [8, 128], strides = [1, 1]} : vector<8x512xf32> to vector<8x128xf32>
    %457 = arith.negf %456 : vector<8x128xf32>
    %458 = math.exp %457 : vector<8x128xf32>
    %cst_236 = arith.constant 1.000000e+00 : f32
    %459 = vector.broadcast %cst_236 : f32 to vector<8x128xf32>
    %460 = arith.addf %459, %458 : vector<8x128xf32>
    %461 = arith.divf %459, %460 : vector<8x128xf32>
    %462 = vector.extract_strided_slice %449 {offsets = [0, 256], sizes = [8, 128], strides = [1, 1]} : vector<8x512xf32> to vector<8x128xf32>
    %463 = math.tanh %462 : vector<8x128xf32>
    %464 = vector.extract_strided_slice %449 {offsets = [0, 384], sizes = [8, 128], strides = [1, 1]} : vector<8x512xf32> to vector<8x128xf32>
    %465 = arith.negf %464 : vector<8x128xf32>
    %466 = math.exp %465 : vector<8x128xf32>
    %cst_237 = arith.constant 1.000000e+00 : f32
    %467 = vector.broadcast %cst_237 : f32 to vector<8x128xf32>
    %468 = arith.addf %467, %466 : vector<8x128xf32>
    %469 = arith.divf %467, %468 : vector<8x128xf32>
    %c0_238 = arith.constant 0 : index
    %c0_239 = arith.constant 0 : index
    %470 = vector.load %arg14[%c0_238, %c0_239] : memref<8x128xf32, #tpu.memory_space<vmem>>, vector<8x128xf32>
    %471 = arith.mulf %461, %470 : vector<8x128xf32>
    %472 = arith.mulf %455, %463 : vector<8x128xf32>
    %473 = arith.addf %471, %472 : vector<8x128xf32>
    %474 = math.tanh %473 : vector<8x128xf32>
    %475 = arith.mulf %469, %474 : vector<8x128xf32>
    %c0_240 = arith.constant 0 : index
    %c0_241 = arith.constant 0 : index
    %476 = vector.load %arg14[%c0_240, %c0_241] : memref<8x128xf32, #tpu.memory_space<vmem>>, vector<8x128xf32>
    tpu.vector_store %arg14[%c0_240, %c0_241], %473 {strides = array<i32>} : memref<8x128xf32, #tpu.memory_space<vmem>>, vector<8x128xf32>,
    %c0_242 = arith.constant 0 : index
    %c0_243 = arith.constant 0 : index
    %477 = vector.load %arg13[%c0_242, %c0_243] : memref<8x128xf32, #tpu.memory_space<vmem>>, vector<8x128xf32>
    tpu.vector_store %arg13[%c0_242, %c0_243], %475 {strides = array<i32>} : memref<8x128xf32, #tpu.memory_space<vmem>>, vector<8x128xf32>,
    %c4_i32_244 = arith.constant 4 : i32
    %478 = arith.index_cast %c4_i32_244 : i32 to index
    %c0_245 = arith.constant 0 : index
    %c0_246 = arith.constant 0 : index
    %479 = vector.load %arg11[%478, %c0_245, %c0_246] : memref<8x8x512xf32, #tpu.memory_space<vmem>>, vector<1x8x512xf32>
    %480 = vector.shape_cast %479 : vector<1x8x512xf32> to vector<8x512xf32>
    %c0_247 = arith.constant 0 : index
    %c0_248 = arith.constant 0 : index
    %481 = vector.load %arg13[%c0_247, %c0_248] : memref<8x128xf32, #tpu.memory_space<vmem>>, vector<8x128xf32>
    %c0_249 = arith.constant 0 : index
    %c0_250 = arith.constant 0 : index
    %482 = vector.load %arg6[%c0_249, %c0_250] : memref<128x512xf32, #tpu.memory_space<vmem>>, vector<128x512xf32>
    %cst_251 = arith.constant dense<0.000000e+00> : vector<8x512xf32>
    %483 = tpu.matmul %481, %482, %cst_251 {dimension_numbers = #tpu.dot_dimension_numbers<[1], [0], [0], [1], [0, 0, 1, 1], [], []>} : vector<8x128xf32>, vector<128x512xf32>, vector<8x512xf32> -> vector<8x512xf32>
    %484 = arith.addf %480, %483 : vector<8x512xf32>
    %485 = vector.extract_strided_slice %484 {offsets = [0, 0], sizes = [8, 128], strides = [1, 1]} : vector<8x512xf32> to vector<8x128xf32>
    %486 = arith.negf %485 : vector<8x128xf32>
    %487 = math.exp %486 : vector<8x128xf32>
    %cst_252 = arith.constant 1.000000e+00 : f32
    %488 = vector.broadcast %cst_252 : f32 to vector<8x128xf32>
    %489 = arith.addf %488, %487 : vector<8x128xf32>
    %490 = arith.divf %488, %489 : vector<8x128xf32>
    %491 = vector.extract_strided_slice %484 {offsets = [0, 128], sizes = [8, 128], strides = [1, 1]} : vector<8x512xf32> to vector<8x128xf32>
    %492 = arith.negf %491 : vector<8x128xf32>
    %493 = math.exp %492 : vector<8x128xf32>
    %cst_253 = arith.constant 1.000000e+00 : f32
    %494 = vector.broadcast %cst_253 : f32 to vector<8x128xf32>
    %495 = arith.addf %494, %493 : vector<8x128xf32>
    %496 = arith.divf %494, %495 : vector<8x128xf32>
    %497 = vector.extract_strided_slice %484 {offsets = [0, 256], sizes = [8, 128], strides = [1, 1]} : vector<8x512xf32> to vector<8x128xf32>
    %498 = math.tanh %497 : vector<8x128xf32>
    %499 = vector.extract_strided_slice %484 {offsets = [0, 384], sizes = [8, 128], strides = [1, 1]} : vector<8x512xf32> to vector<8x128xf32>
    %500 = arith.negf %499 : vector<8x128xf32>
    %501 = math.exp %500 : vector<8x128xf32>
    %cst_254 = arith.constant 1.000000e+00 : f32
    %502 = vector.broadcast %cst_254 : f32 to vector<8x128xf32>
    %503 = arith.addf %502, %501 : vector<8x128xf32>
    %504 = arith.divf %502, %503 : vector<8x128xf32>
    %c0_255 = arith.constant 0 : index
    %c0_256 = arith.constant 0 : index
    %505 = vector.load %arg14[%c0_255, %c0_256] : memref<8x128xf32, #tpu.memory_space<vmem>>, vector<8x128xf32>
    %506 = arith.mulf %496, %505 : vector<8x128xf32>
    %507 = arith.mulf %490, %498 : vector<8x128xf32>
    %508 = arith.addf %506, %507 : vector<8x128xf32>
    %509 = math.tanh %508 : vector<8x128xf32>
    %510 = arith.mulf %504, %509 : vector<8x128xf32>
    %c0_257 = arith.constant 0 : index
    %c0_258 = arith.constant 0 : index
    %511 = vector.load %arg14[%c0_257, %c0_258] : memref<8x128xf32, #tpu.memory_space<vmem>>, vector<8x128xf32>
    tpu.vector_store %arg14[%c0_257, %c0_258], %508 {strides = array<i32>} : memref<8x128xf32, #tpu.memory_space<vmem>>, vector<8x128xf32>,
    %c0_259 = arith.constant 0 : index
    %c0_260 = arith.constant 0 : index
    %512 = vector.load %arg13[%c0_259, %c0_260] : memref<8x128xf32, #tpu.memory_space<vmem>>, vector<8x128xf32>
    tpu.vector_store %arg13[%c0_259, %c0_260], %510 {strides = array<i32>} : memref<8x128xf32, #tpu.memory_space<vmem>>, vector<8x128xf32>,
    %c5_i32_261 = arith.constant 5 : i32
    %513 = arith.index_cast %c5_i32_261 : i32 to index
    %c0_262 = arith.constant 0 : index
    %c0_263 = arith.constant 0 : index
    %514 = vector.load %arg11[%513, %c0_262, %c0_263] : memref<8x8x512xf32, #tpu.memory_space<vmem>>, vector<1x8x512xf32>
    %515 = vector.shape_cast %514 : vector<1x8x512xf32> to vector<8x512xf32>
    %c0_264 = arith.constant 0 : index
    %c0_265 = arith.constant 0 : index
    %516 = vector.load %arg13[%c0_264, %c0_265] : memref<8x128xf32, #tpu.memory_space<vmem>>, vector<8x128xf32>
    %c0_266 = arith.constant 0 : index
    %c0_267 = arith.constant 0 : index
    %517 = vector.load %arg6[%c0_266, %c0_267] : memref<128x512xf32, #tpu.memory_space<vmem>>, vector<128x512xf32>
    %cst_268 = arith.constant dense<0.000000e+00> : vector<8x512xf32>
    %518 = tpu.matmul %516, %517, %cst_268 {dimension_numbers = #tpu.dot_dimension_numbers<[1], [0], [0], [1], [0, 0, 1, 1], [], []>} : vector<8x128xf32>, vector<128x512xf32>, vector<8x512xf32> -> vector<8x512xf32>
    %519 = arith.addf %515, %518 : vector<8x512xf32>
    %520 = vector.extract_strided_slice %519 {offsets = [0, 0], sizes = [8, 128], strides = [1, 1]} : vector<8x512xf32> to vector<8x128xf32>
    %521 = arith.negf %520 : vector<8x128xf32>
    %522 = math.exp %521 : vector<8x128xf32>
    %cst_269 = arith.constant 1.000000e+00 : f32
    %523 = vector.broadcast %cst_269 : f32 to vector<8x128xf32>
    %524 = arith.addf %523, %522 : vector<8x128xf32>
    %525 = arith.divf %523, %524 : vector<8x128xf32>
    %526 = vector.extract_strided_slice %519 {offsets = [0, 128], sizes = [8, 128], strides = [1, 1]} : vector<8x512xf32> to vector<8x128xf32>
    %527 = arith.negf %526 : vector<8x128xf32>
    %528 = math.exp %527 : vector<8x128xf32>
    %cst_270 = arith.constant 1.000000e+00 : f32
    %529 = vector.broadcast %cst_270 : f32 to vector<8x128xf32>
    %530 = arith.addf %529, %528 : vector<8x128xf32>
    %531 = arith.divf %529, %530 : vector<8x128xf32>
    %532 = vector.extract_strided_slice %519 {offsets = [0, 256], sizes = [8, 128], strides = [1, 1]} : vector<8x512xf32> to vector<8x128xf32>
    %533 = math.tanh %532 : vector<8x128xf32>
    %534 = vector.extract_strided_slice %519 {offsets = [0, 384], sizes = [8, 128], strides = [1, 1]} : vector<8x512xf32> to vector<8x128xf32>
    %535 = arith.negf %534 : vector<8x128xf32>
    %536 = math.exp %535 : vector<8x128xf32>
    %cst_271 = arith.constant 1.000000e+00 : f32
    %537 = vector.broadcast %cst_271 : f32 to vector<8x128xf32>
    %538 = arith.addf %537, %536 : vector<8x128xf32>
    %539 = arith.divf %537, %538 : vector<8x128xf32>
    %c0_272 = arith.constant 0 : index
    %c0_273 = arith.constant 0 : index
    %540 = vector.load %arg14[%c0_272, %c0_273] : memref<8x128xf32, #tpu.memory_space<vmem>>, vector<8x128xf32>
    %541 = arith.mulf %531, %540 : vector<8x128xf32>
    %542 = arith.mulf %525, %533 : vector<8x128xf32>
    %543 = arith.addf %541, %542 : vector<8x128xf32>
    %544 = math.tanh %543 : vector<8x128xf32>
    %545 = arith.mulf %539, %544 : vector<8x128xf32>
    %c0_274 = arith.constant 0 : index
    %c0_275 = arith.constant 0 : index
    %546 = vector.load %arg14[%c0_274, %c0_275] : memref<8x128xf32, #tpu.memory_space<vmem>>, vector<8x128xf32>
    tpu.vector_store %arg14[%c0_274, %c0_275], %543 {strides = array<i32>} : memref<8x128xf32, #tpu.memory_space<vmem>>, vector<8x128xf32>,
    %c0_276 = arith.constant 0 : index
    %c0_277 = arith.constant 0 : index
    %547 = vector.load %arg13[%c0_276, %c0_277] : memref<8x128xf32, #tpu.memory_space<vmem>>, vector<8x128xf32>
    tpu.vector_store %arg13[%c0_276, %c0_277], %545 {strides = array<i32>} : memref<8x128xf32, #tpu.memory_space<vmem>>, vector<8x128xf32>,
    %c6_i32_278 = arith.constant 6 : i32
    %548 = arith.index_cast %c6_i32_278 : i32 to index
    %c0_279 = arith.constant 0 : index
    %c0_280 = arith.constant 0 : index
    %549 = vector.load %arg11[%548, %c0_279, %c0_280] : memref<8x8x512xf32, #tpu.memory_space<vmem>>, vector<1x8x512xf32>
    %550 = vector.shape_cast %549 : vector<1x8x512xf32> to vector<8x512xf32>
    %c0_281 = arith.constant 0 : index
    %c0_282 = arith.constant 0 : index
    %551 = vector.load %arg13[%c0_281, %c0_282] : memref<8x128xf32, #tpu.memory_space<vmem>>, vector<8x128xf32>
    %c0_283 = arith.constant 0 : index
    %c0_284 = arith.constant 0 : index
    %552 = vector.load %arg6[%c0_283, %c0_284] : memref<128x512xf32, #tpu.memory_space<vmem>>, vector<128x512xf32>
    %cst_285 = arith.constant dense<0.000000e+00> : vector<8x512xf32>
    %553 = tpu.matmul %551, %552, %cst_285 {dimension_numbers = #tpu.dot_dimension_numbers<[1], [0], [0], [1], [0, 0, 1, 1], [], []>} : vector<8x128xf32>, vector<128x512xf32>, vector<8x512xf32> -> vector<8x512xf32>
    %554 = arith.addf %550, %553 : vector<8x512xf32>
    %555 = vector.extract_strided_slice %554 {offsets = [0, 0], sizes = [8, 128], strides = [1, 1]} : vector<8x512xf32> to vector<8x128xf32>
    %556 = arith.negf %555 : vector<8x128xf32>
    %557 = math.exp %556 : vector<8x128xf32>
    %cst_286 = arith.constant 1.000000e+00 : f32
    %558 = vector.broadcast %cst_286 : f32 to vector<8x128xf32>
    %559 = arith.addf %558, %557 : vector<8x128xf32>
    %560 = arith.divf %558, %559 : vector<8x128xf32>
    %561 = vector.extract_strided_slice %554 {offsets = [0, 128], sizes = [8, 128], strides = [1, 1]} : vector<8x512xf32> to vector<8x128xf32>
    %562 = arith.negf %561 : vector<8x128xf32>
    %563 = math.exp %562 : vector<8x128xf32>
    %cst_287 = arith.constant 1.000000e+00 : f32
    %564 = vector.broadcast %cst_287 : f32 to vector<8x128xf32>
    %565 = arith.addf %564, %563 : vector<8x128xf32>
    %566 = arith.divf %564, %565 : vector<8x128xf32>
    %567 = vector.extract_strided_slice %554 {offsets = [0, 256], sizes = [8, 128], strides = [1, 1]} : vector<8x512xf32> to vector<8x128xf32>
    %568 = math.tanh %567 : vector<8x128xf32>
    %569 = vector.extract_strided_slice %554 {offsets = [0, 384], sizes = [8, 128], strides = [1, 1]} : vector<8x512xf32> to vector<8x128xf32>
    %570 = arith.negf %569 : vector<8x128xf32>
    %571 = math.exp %570 : vector<8x128xf32>
    %cst_288 = arith.constant 1.000000e+00 : f32
    %572 = vector.broadcast %cst_288 : f32 to vector<8x128xf32>
    %573 = arith.addf %572, %571 : vector<8x128xf32>
    %574 = arith.divf %572, %573 : vector<8x128xf32>
    %c0_289 = arith.constant 0 : index
    %c0_290 = arith.constant 0 : index
    %575 = vector.load %arg14[%c0_289, %c0_290] : memref<8x128xf32, #tpu.memory_space<vmem>>, vector<8x128xf32>
    %576 = arith.mulf %566, %575 : vector<8x128xf32>
    %577 = arith.mulf %560, %568 : vector<8x128xf32>
    %578 = arith.addf %576, %577 : vector<8x128xf32>
    %579 = math.tanh %578 : vector<8x128xf32>
    %580 = arith.mulf %574, %579 : vector<8x128xf32>
    %c0_291 = arith.constant 0 : index
    %c0_292 = arith.constant 0 : index
    %581 = vector.load %arg14[%c0_291, %c0_292] : memref<8x128xf32, #tpu.memory_space<vmem>>, vector<8x128xf32>
    tpu.vector_store %arg14[%c0_291, %c0_292], %578 {strides = array<i32>} : memref<8x128xf32, #tpu.memory_space<vmem>>, vector<8x128xf32>,
    %c0_293 = arith.constant 0 : index
    %c0_294 = arith.constant 0 : index
    %582 = vector.load %arg13[%c0_293, %c0_294] : memref<8x128xf32, #tpu.memory_space<vmem>>, vector<8x128xf32>
    tpu.vector_store %arg13[%c0_293, %c0_294], %580 {strides = array<i32>} : memref<8x128xf32, #tpu.memory_space<vmem>>, vector<8x128xf32>,
    %c7_i32_295 = arith.constant 7 : i32
    %583 = arith.index_cast %c7_i32_295 : i32 to index
    %c0_296 = arith.constant 0 : index
    %c0_297 = arith.constant 0 : index
    %584 = vector.load %arg11[%583, %c0_296, %c0_297] : memref<8x8x512xf32, #tpu.memory_space<vmem>>, vector<1x8x512xf32>
    %585 = vector.shape_cast %584 : vector<1x8x512xf32> to vector<8x512xf32>
    %c0_298 = arith.constant 0 : index
    %c0_299 = arith.constant 0 : index
    %586 = vector.load %arg13[%c0_298, %c0_299] : memref<8x128xf32, #tpu.memory_space<vmem>>, vector<8x128xf32>
    %c0_300 = arith.constant 0 : index
    %c0_301 = arith.constant 0 : index
    %587 = vector.load %arg6[%c0_300, %c0_301] : memref<128x512xf32, #tpu.memory_space<vmem>>, vector<128x512xf32>
    %cst_302 = arith.constant dense<0.000000e+00> : vector<8x512xf32>
    %588 = tpu.matmul %586, %587, %cst_302 {dimension_numbers = #tpu.dot_dimension_numbers<[1], [0], [0], [1], [0, 0, 1, 1], [], []>} : vector<8x128xf32>, vector<128x512xf32>, vector<8x512xf32> -> vector<8x512xf32>
    %589 = arith.addf %585, %588 : vector<8x512xf32>
    %590 = vector.extract_strided_slice %589 {offsets = [0, 0], sizes = [8, 128], strides = [1, 1]} : vector<8x512xf32> to vector<8x128xf32>
    %591 = arith.negf %590 : vector<8x128xf32>
    %592 = math.exp %591 : vector<8x128xf32>
    %cst_303 = arith.constant 1.000000e+00 : f32
    %593 = vector.broadcast %cst_303 : f32 to vector<8x128xf32>
    %594 = arith.addf %593, %592 : vector<8x128xf32>
    %595 = arith.divf %593, %594 : vector<8x128xf32>
    %596 = vector.extract_strided_slice %589 {offsets = [0, 128], sizes = [8, 128], strides = [1, 1]} : vector<8x512xf32> to vector<8x128xf32>
    %597 = arith.negf %596 : vector<8x128xf32>
    %598 = math.exp %597 : vector<8x128xf32>
    %cst_304 = arith.constant 1.000000e+00 : f32
    %599 = vector.broadcast %cst_304 : f32 to vector<8x128xf32>
    %600 = arith.addf %599, %598 : vector<8x128xf32>
    %601 = arith.divf %599, %600 : vector<8x128xf32>
    %602 = vector.extract_strided_slice %589 {offsets = [0, 256], sizes = [8, 128], strides = [1, 1]} : vector<8x512xf32> to vector<8x128xf32>
    %603 = math.tanh %602 : vector<8x128xf32>
    %604 = vector.extract_strided_slice %589 {offsets = [0, 384], sizes = [8, 128], strides = [1, 1]} : vector<8x512xf32> to vector<8x128xf32>
    %605 = arith.negf %604 : vector<8x128xf32>
    %606 = math.exp %605 : vector<8x128xf32>
    %cst_305 = arith.constant 1.000000e+00 : f32
    %607 = vector.broadcast %cst_305 : f32 to vector<8x128xf32>
    %608 = arith.addf %607, %606 : vector<8x128xf32>
    %609 = arith.divf %607, %608 : vector<8x128xf32>
    %c0_306 = arith.constant 0 : index
    %c0_307 = arith.constant 0 : index
    %610 = vector.load %arg14[%c0_306, %c0_307] : memref<8x128xf32, #tpu.memory_space<vmem>>, vector<8x128xf32>
    %611 = arith.mulf %601, %610 : vector<8x128xf32>
    %612 = arith.mulf %595, %603 : vector<8x128xf32>
    %613 = arith.addf %611, %612 : vector<8x128xf32>
    %614 = math.tanh %613 : vector<8x128xf32>
    %615 = arith.mulf %609, %614 : vector<8x128xf32>
    %c0_308 = arith.constant 0 : index
    %c0_309 = arith.constant 0 : index
    %616 = vector.load %arg14[%c0_308, %c0_309] : memref<8x128xf32, #tpu.memory_space<vmem>>, vector<8x128xf32>
    tpu.vector_store %arg14[%c0_308, %c0_309], %613 {strides = array<i32>} : memref<8x128xf32, #tpu.memory_space<vmem>>, vector<8x128xf32>,
    %c0_310 = arith.constant 0 : index
    %c0_311 = arith.constant 0 : index
    %617 = vector.load %arg13[%c0_310, %c0_311] : memref<8x128xf32, #tpu.memory_space<vmem>>, vector<8x128xf32>
    tpu.vector_store %arg13[%c0_310, %c0_311], %615 {strides = array<i32>} : memref<8x128xf32, #tpu.memory_space<vmem>>, vector<8x128xf32>,
    %c8_i32_312 = arith.constant 8 : i32
    %c0_313 = arith.constant 0 : index
    %c0_314 = arith.constant 0 : index
    %618 = vector.load %arg13[%c0_313, %c0_314] : memref<8x128xf32, #tpu.memory_space<vmem>>, vector<8x128xf32>
    %c0_315 = arith.constant 0 : index
    %c0_316 = arith.constant 0 : index
    %619 = vector.load %arg8[%c0_315, %c0_316] : memref<128x128xf32, #tpu.memory_space<vmem>>, vector<128x128xf32>
    %cst_317 = arith.constant dense<0.000000e+00> : vector<8x128xf32>
    %620 = tpu.matmul %618, %619, %cst_317 {dimension_numbers = #tpu.dot_dimension_numbers<[1], [0], [0], [1], [0, 0, 1, 1], [], []>} : vector<8x128xf32>, vector<128x128xf32>, vector<8x128xf32> -> vector<8x128xf32>
    %c0_318 = arith.constant 0 : index
    %c0_319 = arith.constant 0 : index
    %621 = vector.load %arg9[%c0_318, %c0_319] : memref<1x128xf32, #tpu.memory_space<vmem>>, vector<1x128xf32>
    %622 = vector.broadcast %621 : vector<1x128xf32> to vector<8x128xf32>
    %623 = arith.addf %620, %622 : vector<8x128xf32>
    %c0_320 = arith.constant 0 : index
    %c0_321 = arith.constant 0 : index
    %624 = vector.load %arg10[%c0_320, %c0_321] : memref<8x128xf32, #tpu.memory_space<vmem>>, vector<8x128xf32>
    tpu.vector_store %arg10[%c0_320, %c0_321], %623 {strides = array<i32>} : memref<8x128xf32, #tpu.memory_space<vmem>>, vector<8x128xf32>,
    return
  }
  func.func @transform_0(%arg0: i32) -> (i32, i32, i32) {
    %c0_i32 = arith.constant 0 : i32
    %c0_i32_0 = arith.constant 0 : i32
    %c0_i32_1 = arith.constant 0 : i32
    %c0_i32_2 = arith.constant 0 : i32
    return %c0_i32, %c0_i32_0, %c0_i32_1 : i32, i32, i32
  }
  func.func @transform_1(%arg0: i32) -> (i32, i32) {
    %c0_i32 = arith.constant 0 : i32
    %c0_i32_0 = arith.constant 0 : i32
    %c0_i32_1 = arith.constant 0 : i32
    return %c0_i32, %c0_i32_0 : i32, i32
  }
  func.func @transform_2(%arg0: i32) -> (i32, i32) {
    %c0_i32 = arith.constant 0 : i32
    %c0_i32_0 = arith.constant 0 : i32
    %c0_i32_1 = arith.constant 0 : i32
    return %c0_i32, %c0_i32_0 : i32, i32
  }
  func.func @transform_3(%arg0: i32) -> (i32, i32) {
    %c0_i32 = arith.constant 0 : i32
    %c0_i32_0 = arith.constant 0 : i32
    %c0_i32_1 = arith.constant 0 : i32
    return %c0_i32, %c0_i32_0 : i32, i32
  }
  func.func @transform_4(%arg0: i32) -> (i32, i32) {
    %c0_i32 = arith.constant 0 : i32
    %c0_i32_0 = arith.constant 0 : i32
    %c0_i32_1 = arith.constant 0 : i32
    return %c0_i32, %c0_i32_0 : i32, i32
  }
  func.func @transform_5(%arg0: i32) -> (i32, i32) {
    %c0_i32 = arith.constant 0 : i32
    %c0_i32_0 = arith.constant 0 : i32
    %c0_i32_1 = arith.constant 0 : i32
    return %c0_i32, %c0_i32_0 : i32, i32
  }
  func.func @transform_6(%arg0: i32) -> (i32, i32) {
    %c0_i32 = arith.constant 0 : i32
    %c0_i32_0 = arith.constant 0 : i32
    %c0_i32_1 = arith.constant 0 : i32
    return %c0_i32, %c0_i32_0 : i32, i32
  }
  func.func @transform_7(%arg0: i32) -> (i32, i32) {
    %c0_i32 = arith.constant 0 : i32
    %c0_i32_0 = arith.constant 0 : i32
    %c0_i32_1 = arith.constant 0 : i32
    return %c0_i32, %c0_i32_0 : i32, i32
  }
  func.func @transform_8(%arg0: i32) -> (i32, i32) {
    %c0_i32 = arith.constant 0 : i32
    %c0_i32_0 = arith.constant 0 : i32
    %c0_i32_1 = arith.constant 0 : i32
    return %c0_i32, %c0_i32_0 : i32, i32
  }
  func.func @transform_9(%arg0: i32) -> (i32, i32) {
    %c0_i32 = arith.constant 0 : i32
    %c0_i32_0 = arith.constant 0 : i32
    %c0_i32_1 = arith.constant 0 : i32
    return %c0_i32, %c0_i32_0 : i32, i32
  }
}

</mosaic_0001>

<bundles_post_ra>
// kernel: franpena_forward.1
= control target key start
LH: loop header
LB: loop body
LE: loop exit
PB: predicated region body
PF: predicated region fallthrough
CT: control target
= control target key end

     0   :  { %v6326_v3 = vmov 0.0   ;;  %vm70_vm0 = vcmask 130048   ;;  %vm6328_vm1 = vmmov 0   ;;  %s8540_s1 = inlined_call_operand.vmem [shape: f32[16,512], index: 1, kind: input, shape index: {}]   ;;  %s8541_s0 = inlined_call_operand.vmem [shape: f32[8,8,16], index: 0, kind: input, shape index: {}]   ;;  %s8542_s2 = inlined_call_operand.vmem [shape: f32[128,512], index: 2, kind: input, shape index: {}]   ;;  %s8543_s3 = inlined_call_operand.vmem [shape: f32[1,512], index: 3, kind: input, shape index: {}]   ;;  %s8544_s4 = inlined_call_operand.vmem [shape: f32[128,512], index: 4, kind: input, shape index: {}]   ;;  %s8545_s5 = inlined_call_operand.vmem [shape: f32[128,512], index: 5, kind: input, shape index: {}]   ;;  %s8546_s6 = inlined_call_operand.vmem [shape: f32[1,512], index: 6, kind: input, shape index: {}]   ;;  %s8547_s7 = inlined_call_operand.vmem [shape: f32[128,128], index: 7, kind: input, shape index: {}]   ;;  %s8548_s8 = inlined_call_operand.vmem [shape: f32[1,128], index: 8, kind: input, shape index: {}]   ;;  %s8549_s9 = inlined_call_operand.vmem [shape: f32[8,128], index: 9, kind: output, shape index: {}]  }
   0x1   :  { %v41_v0 = vld [vmem:[%s8540_s1 + $0x8] sm:$0xff]  ;;  %v43_v2 = vld [vmem:[%s8540_s1 + $0x18] sm:$0xff]  ;;  %159 = vmatprep.mubr.f32.mxu0 %v6326_v3  ;;  %272 = vmatprep.mubr.f32.mxu1 %v6326_v3  ;;  %v40_v6 = vld [vmem:[%s8540_s1] sm:$0xff] }
   0x2   :  { %v45_v1 = vld [vmem:[%s8540_s1 + $0x28] sm:$0xff]  ;;  %v47_v5 = vld [vmem:[%s8540_s1 + $0x38] sm:$0xff]  ;;  %v44_v7 = vld [vmem:[%s8540_s1 + $0x20] sm:$0xff] }
   0x3   :  { %v4819_v4 = vpack.c.bf16 %v45_v1, %v41_v0  ;;  %v4823_v8 = vpack.c.bf16 %v47_v5, %v43_v2  ;;  %v4821_v9 = vpack.c.bf16 %v44_v7, %v40_v6  ;;  %v42_v10 = vld [vmem:[%s8540_s1 + $0x10] sm:$0xff]  ;;  %v32_v12 = vld [vmem:[%s8541_s0] sm:$0xff]  ;;  %v361_v14 = vld [vmem:[%s8542_s2 + $0x8] sm:$0xff] }
   0x4   :  { %v46_v11 = vld [vmem:[%s8540_s1 + $0x30] sm:$0xff]  ;;  %v365_v15 = vld [vmem:[%s8542_s2 + $0x28] sm:$0xff]  ;;  %v363_v16 = vld [vmem:[%s8542_s2 + $0x18] sm:$0xff] }
   0x5   :  { %4820 = vmatprep.subr.bf16.mxu0 %v4819_v4  ;;  %v4825_v13 = vpack.c.bf16 %v46_v11, %v42_v10  ;;  %4824 = vmatprep.subr.bf16.mxu1 %v4823_v8  ;;  %v6417_v17 = vpack.c.bf16 %v365_v15, %v361_v14  ;;  %v367_v18 = vld [vmem:[%s8542_s2 + $0x38] sm:$0xff]  ;;  %v360_v19 = vld [vmem:[%s8542_s2] sm:$0xff]  ;;  %v362_v23 = vld [vmem:[%s8542_s2 + $0x10] sm:$0xff] }
   0x6   :  { %4822 = vmatpush1.bf16.msra.mxu0 %v4821_v9  ;;  %v364_v20 = vld [vmem:[%s8542_s2 + $0x20] sm:$0xff]  ;;  %v6428_v21 = vpack.c.bf16 %v367_v18, %v363_v16  ;;  %v366_v24 = vld [vmem:[%s8542_s2 + $0x30] sm:$0xff]  ;;  %v369_v26 = vld [vmem:[%s8542_s2 + $0x48] sm:$0xff] }
   0x7   :  { %4826 = vmatpush1.bf16.msra.mxu1 %v4825_v13  ;;  %v6430_v22 = vpack.c.bf16 %v364_v20, %v360_v19  ;;  %4828 = vmatprep.subr.bf16.mxu0 %v6417_v17  ;;  %v6439_v25 = vpack.c.bf16 %v366_v24, %v362_v23  ;;  %v373_v27 = vld [vmem:[%s8542_s2 + $0x68] sm:$0xff]  ;;  %v371_v28 = vld [vmem:[%s8542_s2 + $0x58] sm:$0xff]  ;;  %v368_v31 = vld [vmem:[%s8542_s2 + $0x40] sm:$0xff] }
   0x8   :  { %4860 = vmatprep.subr.bf16.mxu1 %v6428_v21  ;;  %v6452_v29 = vpack.c.bf16 %v373_v27, %v369_v26  ;;  %v375_v30 = vld [vmem:[%s8542_s2 + $0x78] sm:$0xff]  ;;  %v372_v32 = vld [vmem:[%s8542_s2 + $0x60] sm:$0xff]  ;;  %v33_v33 = vld [vmem:[%s8541_s0 + $0x8] sm:$0xff] }
   0x9   :  { %4702 = vmatmul.mubr.msk.f32.vlgmr.msra.gmra.mrb[0].mxu0 %vm70_vm0, %v32_v12  ;;  %v6468_v34 = vpack.c.bf16 %v375_v30, %v371_v28  ;;  %v6470_v35 = vpack.c.bf16 %v372_v32, %v368_v31  ;;  %v370_v36 = vld [vmem:[%s8542_s2 + $0x50] sm:$0xff]  ;;  %v377_v39 = vld [vmem:[%s8542_s2 + $0x88] sm:$0xff]  ;;  %v379_v41 = vld [vmem:[%s8542_s2 + $0x98] sm:$0xff] }
   0xa   :  { %4710 = vmatmul.mubr.msk.f32.vlgmr.msra.gmra.mrb[0].mxu1 %vm70_vm0, %v32_v12  ;;  %4830 = vmatpush1.bf16.msra.mxu0 %v6430_v22  ;;  %v374_v37 = vld [vmem:[%s8542_s2 + $0x70] sm:$0xff]  ;;  %v381_v40 = vld [vmem:[%s8542_s2 + $0xa8] sm:$0xff]  ;;  %v383_v43 = vld [vmem:[%s8542_s2 + $0xb8] sm:$0xff] }
   0xb   :  { %4862 = vmatpush1.bf16.msra.mxu1 %v6439_v25  ;;  %165 = vmatprep.mubr.f32.mxu0 %v6326_v3  ;;  %v6480_v38 = vpack.c.bf16 %v374_v37, %v370_v36  ;;  %v6493_v42 = vpack.c.bf16 %v381_v40, %v377_v39  ;;  %v376_v44 = vld [vmem:[%s8542_s2 + $0x80] sm:$0xff]  ;;  %v34_v46 = vld [vmem:[%s8541_s0 + $0x10] sm:$0xff]  ;;  %v6509_v47 = vpack.c.bf16 %v383_v43, %v379_v41  ;;  %v385_v51 = vld [vmem:[%s8542_s2 + $0xc8] sm:$0xff] }
   0xc   :  { %278 = vmatprep.mubr.f32.mxu1 %v6326_v3  ;;  %4832 = vmatprep.subr.bf16.mxu0 %v6452_v29  ;;  %v380_v45 = vld [vmem:[%s8542_s2 + $0xa0] sm:$0xff]  ;;  %v378_v48 = vld [vmem:[%s8542_s2 + $0x90] sm:$0xff]  ;;  %v389_v52 = vld [vmem:[%s8542_s2 + $0xe8] sm:$0xff] }
   0xd   :  { %4703 = vmatmul.mubr.msk.f32.gmra.mrb[2].mxu0 %vm70_vm0, %v33_v33  ;;  %4864 = vmatprep.subr.bf16.mxu1 %v6468_v34  ;;  %v382_v49 = vld [vmem:[%s8542_s2 + $0xb0] sm:$0xff]  ;;  %v6519_v50 = vpack.c.bf16 %v380_v45, %v376_v44  ;;  %v387_v53 = vld [vmem:[%s8542_s2 + $0xd8] sm:$0xff]  ;;  %v384_v56 = vld [vmem:[%s8542_s2 + $0xc0] sm:$0xff]  ;;  %v6545_v58 = vpack.c.bf16 %v389_v52, %v385_v51 }
   0xe   :  { %4711 = vmatmul.mubr.msk.f32.gmra.mrb[2].mxu1 %vm70_vm0, %v33_v33  ;;  %4834 = vmatpush1.bf16.msra.mxu0 %v6470_v35  ;;  %v6532_v54 = vpack.c.bf16 %v382_v49, %v378_v48  ;;  %v391_v55 = vld [vmem:[%s8542_s2 + $0xf8] sm:$0xff]  ;;  %v388_v57 = vld [vmem:[%s8542_s2 + $0xe0] sm:$0xff]  ;;  %v386_v59 = vld [vmem:[%s8542_s2 + $0xd0] sm:$0xff] }
   0xf   :  { %4866 = vmatpush1.bf16.msra.mxu1 %v6480_v38  ;;  %171 = vmatprep.mubr.f32.mxu0 %v6326_v3  ;;  %v390_v60 = vld [vmem:[%s8542_s2 + $0xf0] sm:$0xff]  ;;  %v6555_v61 = vpack.c.bf16 %v391_v55, %v387_v53  ;;  %v393_v62 = vld [vmem:[%s8542_s2 + $0x108] sm:$0xff]  ;;  %v35_v0 = vld [vmem:[%s8541_s0 + $0x18] sm:$0xff]  ;;  %v6568_v1 = vpack.c.bf16 %v388_v57, %v384_v56 }
  0x10   :  { %284 = vmatprep.mubr.f32.mxu1 %v6326_v3  ;;  %4836 = vmatprep.subr.bf16.mxu0 %v6493_v42  ;;  %v397_v63 = vld [vmem:[%s8542_s2 + $0x128] sm:$0xff]  ;;  %v395_v2 = vld [vmem:[%s8542_s2 + $0x118] sm:$0xff]  ;;  %v6578_v5 = vpack.c.bf16 %v390_v60, %v386_v59  ;;  %v392_v6 = vld [vmem:[%s8542_s2 + $0x100] sm:$0xff] }
  0x11   :  { %4704 = vmatmul.mubr.msk.f32.gmra.mrb[4].mxu0 %vm70_vm0, %v34_v46  ;;  %4868 = vmatprep.subr.bf16.mxu1 %v6509_v47  ;;  %v399_v4 = vld [vmem:[%s8542_s2 + $0x138] sm:$0xff]  ;;  %v396_v7 = vld [vmem:[%s8542_s2 + $0x120] sm:$0xff]  ;;  %v6588_v8 = vpack.c.bf16 %v397_v63, %v393_v62  ;;  %v394_v9 = vld [vmem:[%s8542_s2 + $0x110] sm:$0xff] }
  0x12   :  { %4712 = vmatmul.mubr.msk.f32.gmra.mrb[4].mxu1 %vm70_vm0, %v34_v46  ;;  %4838 = vmatpush1.bf16.msra.mxu0 %v6519_v50  ;;  %v398_v10 = vld [vmem:[%s8542_s2 + $0x130] sm:$0xff]  ;;  %v6598_v11 = vpack.c.bf16 %v399_v4, %v395_v2  ;;  %v401_v12 = vld [vmem:[%s8542_s2 + $0x148] sm:$0xff]  ;;  %v36_v14 = vld [vmem:[%s8541_s0 + $0x20] sm:$0xff]  ;;  %v6611_v15 = vpack.c.bf16 %v396_v7, %v392_v6  ;;  %v50_v7 = vlaneseq }
  0x13   :  { %4870 = vmatpush1.bf16.msra.mxu1 %v6532_v54  ;;  %177 = vmatprep.mubr.f32.mxu0 %v6326_v3  ;;  %v405_v13 = vld [vmem:[%s8542_s2 + $0x168] sm:$0xff]  ;;  %v403_v16 = vld [vmem:[%s8542_s2 + $0x158] sm:$0xff]  ;;  %v6621_v19 = vpack.c.bf16 %v398_v10, %v394_v9  ;;  %v400_v20 = vld [vmem:[%s8542_s2 + $0x140] sm:$0xff] }
  0x14   :  { %290 = vmatprep.mubr.f32.mxu1 %v6326_v3  ;;  %4840 = vmatprep.subr.bf16.mxu0 %v6545_v58  ;;  %v407_v18 = vld [vmem:[%s8542_s2 + $0x178] sm:$0xff]  ;;  %v404_v23 = vld [vmem:[%s8542_s2 + $0x160] sm:$0xff]  ;;  %v6631_v24 = vpack.c.bf16 %v405_v13, %v401_v12  ;;  %v402_v26 = vld [vmem:[%s8542_s2 + $0x150] sm:$0xff]  ;;  %v6787_v9 = vshrl.u32 %v50_v7, 7 }
  0x15   :  { %4705 = vmatmul.mubr.msk.f32.gmra.mrb[6].mxu0 %vm70_vm0, %v35_v0  ;;  %4872 = vmatprep.subr.bf16.mxu1 %v6555_v61  ;;  %v406_v27 = vld [vmem:[%s8542_s2 + $0x170] sm:$0xff]  ;;  %v6641_v28 = vpack.c.bf16 %v407_v18, %v403_v16  ;;  %v409_v30 = vld [vmem:[%s8542_s2 + $0x188] sm:$0xff]  ;;  %v6654_v33 = vpack.c.bf16 %v404_v23, %v400_v20  ;;  %v411_v36 = vld [vmem:[%s8542_s2 + $0x198] sm:$0xff] }
  0x16   :  { %4713 = vmatmul.mubr.msk.f32.gmra.mrb[6].mxu1 %vm70_vm0, %v35_v0  ;;  %4842 = vmatpush1.bf16.msra.mxu0 %v6568_v1  ;;  %v413_v31 = vld [vmem:[%s8542_s2 + $0x1a8] sm:$0xff]  ;;  %v415_v37 = vld [vmem:[%s8542_s2 + $0x1b8] sm:$0xff]  ;;  %v6664_v39 = vpack.c.bf16 %v406_v27, %v402_v26  ;;  %v408_v40 = vld [vmem:[%s8542_s2 + $0x180] sm:$0xff]  ;;  %v52_v10 = vsub.s32 0, %v6787_v9  ;;  %v56_v13 = vsub.s32 1, %v6787_v9  ;;  %v64_v16 = vsub.s32 3, %v6787_v9 }
  0x17   :  { %4874 = vmatpush1.bf16.msra.mxu1 %v6578_v5  ;;  %183 = vmatprep.mubr.f32.mxu0 %v6326_v3  ;;  %v37_v32 = vld [vmem:[%s8541_s0 + $0x28] sm:$0xff]  ;;  %v412_v41 = vld [vmem:[%s8542_s2 + $0x1a0] sm:$0xff]  ;;  %v6674_v43 = vpack.c.bf16 %v413_v31, %v409_v30  ;;  %v410_v44 = vld [vmem:[%s8542_s2 + $0x190] sm:$0xff]  ;;  %v6684_v46 = vpack.c.bf16 %v415_v37, %v411_v36  ;;  %v60_v36 = vsub.s32 2, %v6787_v9 }
  0x18   :  { %296 = vmatprep.mubr.f32.mxu1 %v6326_v3  ;;  %4844 = vmatprep.subr.bf16.mxu0 %v6588_v8  ;;  %v414_v45 = vld [vmem:[%s8542_s2 + $0x1b0] sm:$0xff]  ;;  %v417_v48 = vld [vmem:[%s8542_s2 + $0x1c8] sm:$0xff]  ;;  %v6697_v52 = vpack.c.bf16 %v412_v41, %v408_v40  ;;  %v419_v53 = vld [vmem:[%s8542_s2 + $0x1d8] sm:$0xff] }
  0x19   :  { %4706 = vmatmul.mubr.msk.f32.gmra.mrb[8].mxu0 %vm70_vm0, %v36_v14  ;;  %4876 = vmatprep.subr.bf16.mxu1 %v6598_v11  ;;  %v421_v49 = vld [vmem:[%s8542_s2 + $0x1e8] sm:$0xff]  ;;  %v38_v51 = vld [vmem:[%s8541_s0 + $0x30] sm:$0xff]  ;;  %v423_v55 = vld [vmem:[%s8542_s2 + $0x1f8] sm:$0xff]  ;;  %v6707_v56 = vpack.c.bf16 %v414_v45, %v410_v44 }
  0x1a   :  { %4714 = vmatmul.mubr.msk.f32.gmra.mrb[8].mxu1 %vm70_vm0, %v36_v14  ;;  %4846 = vmatpush1.bf16.msra.mxu0 %v6611_v15  ;;  %v416_v57 = vld [vmem:[%s8542_s2 + $0x1c0] sm:$0xff]  ;;  %v6717_v60 = vpack.c.bf16 %v421_v49, %v417_v48  ;;  %v418_v62 = vld [vmem:[%s8542_s2 + $0x1d0] sm:$0xff]  ;;  %v6727_v0 = vpack.c.bf16 %v423_v55, %v419_v53  ;;  %v39_v2 = vld [vmem:[%s8541_s0 + $0x38] sm:$0xff] }
  0x1b   :  { %4878 = vmatpush1.bf16.msra.mxu1 %v6621_v19  ;;  %189 = vmatprep.mubr.f32.mxu0 %v6326_v3  ;;  %v420_v59 = vld [vmem:[%s8542_s2 + $0x1e0] sm:$0xff]  ;;  %v422_v63 = vld [vmem:[%s8542_s2 + $0x1f0] sm:$0xff] }
  0x1c   :  { %302 = vmatprep.mubr.f32.mxu1 %v6326_v3  ;;  %4848 = vmatprep.subr.bf16.mxu0 %v6631_v24  ;;  %v6734_v4 = vpack.c.bf16 %v420_v59, %v416_v57  ;;  %v6738_v6 = vpack.c.bf16 %v422_v63, %v418_v62  ;;  %v48_v12 = vld [vmem:[%s8543_s3] sm:$0xf] }
  0x1d   :  { %4707 = vmatmul.mubr.msk.f32.gmra.mrb[10].mxu0 %vm70_vm0, %v37_v32  ;;  %4880 = vmatprep.subr.bf16.mxu1 %v6641_v28  ;;  %v6796_v14 = vrot.slane %v48_v12, %v52_v10  ;;  %v6813_v40 = vrot.slane %v48_v12, %v60_v36 }
  0x1e   :  { %4715 = vmatmul.mubr.msk.f32.gmra.mrb[10].mxu1 %vm70_vm0, %v37_v32  ;;  %4850 = vmatpush1.bf16.msra.mxu0 %v6654_v33  ;;  %v6807_v32 = vrot.slane %v48_v12, %v64_v16 }
  0x1f   :  { %4882 = vmatpush1.bf16.msra.mxu1 %v6664_v39  ;;  %195 = vmatprep.mubr.f32.mxu0 %v6326_v3 }
  0x20   :  { %308 = vmatprep.mubr.f32.mxu1 %v6326_v3  ;;  %4852 = vmatprep.subr.bf16.mxu0 %v6674_v43 }
  0x21   :  { %4708 = vmatmul.mubr.msk.f32.gmra.mrb[12].mxu0 %vm70_vm0, %v38_v51  ;;  %4884 = vmatprep.subr.bf16.mxu1 %v6684_v46 }
  0x22   :  { %4716 = vmatmul.mubr.msk.f32.gmra.mrb[12].mxu1 %vm70_vm0, %v38_v51  ;;  %4854 = vmatpush1.bf16.msra.mxu0 %v6697_v52 }
  0x23   :  { %4886 = vmatpush1.bf16.msra.mxu1 %v6707_v56  ;;  %201 = vmatprep.mubr.f32.mxu0 %v6326_v3 }
  0x24   :  { %314 = vmatprep.mubr.f32.mxu1 %v6326_v3  ;;  %4856 = vmatprep.subr.bf16.mxu0 %v6717_v60 }
  0x25   :  { %4709 = vmatmul.mubr.msk.f32.gmra.mrb[14].mxu0 %vm70_vm0, %v39_v2  ;;  %4888 = vmatprep.subr.bf16.mxu1 %v6727_v0 }
  0x26   :  { %4717 = vmatmul.mubr.msk.f32.gmra.mrb[14].mxu1 %vm70_vm0, %v39_v2  ;;  %4858 = vmatpush1.bf16.msra.mxu0 %v6734_v4 }
  0x27   :  { %4890 = vmatpush1.bf16.msra.mxu1 %v6738_v6  ;;  %488 = vmatprep.mubr.f32.mxu0 %v6326_v3 }
  0x28   :  { %559 = vmatprep.mubr.f32.mxu1 %v6326_v3  ;;  %4892 = vmatprep.subr.bf16.mxu0 %v6417_v17 }
  0x29   :  { %489 = vmatmul.mubr.f32.vlgmr.msra.gmra.mrb[0].mxu0 %v6326_v3  ;;  %4924 = vmatprep.subr.bf16.mxu1 %v6428_v21 }
  0x2a   :  { %560 = vmatmul.mubr.f32.vlgmr.msra.gmra.mrb[0].mxu1 %v6326_v3  ;;  %4894 = vmatpush1.bf16.msra.mxu0 %v6430_v22 }
  0x2b   :  { %4926 = vmatpush1.bf16.msra.mxu1 %v6439_v25  ;;  %4896 = vmatprep.subr.bf16.mxu0 %v6452_v29 }
  0x2c   :  { %4928 = vmatprep.subr.bf16.mxu1 %v6468_v34  ;;  %732 = vmatprep.mubr.f32.mxu0 %v6326_v3 }
  0x2d   :  { %803 = vmatprep.mubr.f32.mxu1 %v6326_v3 }
  0x2e   :  { %4898 = vmatpush1.bf16.msra.mxu0 %v6470_v35 }
  0x2f   :  { %4930 = vmatpush1.bf16.msra.mxu1 %v6480_v38  ;;  %4900 = vmatprep.subr.bf16.mxu0 %v6493_v42 }
  0x30   :  { %4932 = vmatprep.subr.bf16.mxu1 %v6509_v47 }
  0x32   :  { %4902 = vmatpush1.bf16.msra.mxu0 %v6519_v50 }
  0x33   :  { %4934 = vmatpush1.bf16.msra.mxu1 %v6532_v54  ;;  %4904 = vmatprep.subr.bf16.mxu0 %v6545_v58 }
  0x34   :  { %4936 = vmatprep.subr.bf16.mxu1 %v6555_v61 }
  0x36   :  { %4906 = vmatpush1.bf16.msra.mxu0 %v6568_v1 }
  0x37   :  { %4938 = vmatpush1.bf16.msra.mxu1 %v6578_v5  ;;  %4908 = vmatprep.subr.bf16.mxu0 %v6588_v8 }
  0x38   :  { %4940 = vmatprep.subr.bf16.mxu1 %v6598_v11 }
  0x3a   :  { %4910 = vmatpush1.bf16.msra.mxu0 %v6611_v15 }
  0x3b   :  { %4942 = vmatpush1.bf16.msra.mxu1 %v6621_v19  ;;  %4912 = vmatprep.subr.bf16.mxu0 %v6631_v24 }
  0x3c   :  { %4944 = vmatprep.subr.bf16.mxu1 %v6641_v28 }
  0x3e   :  { %4914 = vmatpush1.bf16.msra.mxu0 %v6654_v33 }
  0x3f   :  { %4946 = vmatpush1.bf16.msra.mxu1 %v6664_v39  ;;  %4916 = vmatprep.subr.bf16.mxu0 %v6674_v43 }
  0x40   :  { %4948 = vmatprep.subr.bf16.mxu1 %v6684_v46 }
  0x42   :  { %4918 = vmatpush1.bf16.msra.mxu0 %v6697_v52 }
  0x43   :  { %4950 = vmatpush1.bf16.msra.mxu1 %v6707_v56  ;;  %4920 = vmatprep.subr.bf16.mxu0 %v6717_v60 }
  0x44   :  { %4952 = vmatprep.subr.bf16.mxu1 %v6727_v0 }
  0x46   :  { %4922 = vmatpush1.bf16.msra.mxu0 %v6734_v4 }
  0x47   :  { %4954 = vmatpush1.bf16.msra.mxu1 %v6738_v6  ;;  %4956 = vmatprep.subr.bf16.mxu0 %v6417_v17  ;;  %v6800_v17 = vrot.slane %v48_v12, %v56_v13 }
  0x48   :  { %4988 = vmatprep.subr.bf16.mxu1 %v6428_v21 }
  0xfc   :  { %v490_v21 = vpop.f32.mrb[0].mxu0 }
  0xfd   :  { %v5939_v18 = vadd.f32 %v490_v21, %v6796_v14  ;;  %v561_v20 = vpop.f32.mrb[0].mxu1  ;;  %v492_v23 = vpop.f32.mrb[1].mxu0 }
  0xfe   :  { %v5940_v26 = vadd.f32 %v492_v23, %v6800_v17  ;;  %v563_v27 = vpop.f32.mrb[1].mxu1  ;;  %v5955_v44 = vadd.f32 %v561_v20, %v6813_v40 }
  0xff   :  { %v4718_v30 = vmul.f32 -1.442695, %v5939_v18  ;;  %v5956_v37 = vadd.f32 %v563_v27, %v6807_v32 }
 0x100   :  { %v4719_v31 = vmul.f32 -1.442695, %v5940_v26 }
 0x101   :  { %6070 = vpow2.f32 %v4718_v30  ;;  %v4720_v41 = vmul.f32 -1.442695, %v5956_v37 }
 0x102   :  { %6072 = vpow2.f32 %v4719_v31 }
 0x103   :  { %6074 = vpow2.f32 %v4720_v41 }
 0x104   :  { %6076 = vtanh.f32 %v5955_v44 }
 0x10b   :  { %v6071_v45 = vpop.eup %6070 }
 0x10c   :  { %v6073_v48 = vpop.eup %6072  ;;  %v573_v49 = vadd.f32 1.0, %v6071_v45 }
 0x10d   :  { %v579_v51 = vadd.f32 1.0, %v6073_v48  ;;  %v6075_v53 = vpop.eup %6074 }
 0x10e   :  { %6078 = vrcp.f32 %v573_v49  ;;  %v6077_v55 = vpop.eup %6076  ;;  %v586_v63 = vadd.f32 1.0, %v6075_v53 }
 0x10f   :  { %6080 = vrcp.f32 %v579_v51 }
 0x110   :  { %6082 = vrcp.f32 %v586_v63 }
 0x118   :  { %v6079_v57 = vpop.eup %6078 }
 0x119   :  { %v6081_v59 = vpop.eup %6080  ;;  %v591_v62 = vmul.f32 %v6079_v57, %v6077_v55 }
 0x11a   :  { %v590_v2 = vmul.f32 0.0, %v6081_v59  ;;  %v6083_v12 = vpop.eup %6082 }
 0x11c   :  { %v6816_v7 = vadd.f32 %v591_v62, %v590_v2 }
 0x11e   :  { %6084 = vtanh.f32 %v6816_v7 }
 0x128   :  { %v6085_v21 = vpop.eup %6084 }
 0x129   :  { %v6819_v18 = vmul.f32 %v6085_v21, %v6083_v12  ;;  %v1099_v12 = vld [vmem:[%s8542_s2 + $0x28] sm:$0xff]  ;;  %v1097_v21 = vld [vmem:[%s8542_s2 + $0x18] sm:$0xff] }
 0x12b   :  { %733 = vmatmul.mubr.f32.vlgmr.msra.gmra.mrb[2].mxu0 %v6819_v18  ;;  %804 = vmatmul.mubr.f32.vlgmr.msra.gmra.mrb[2].mxu1 %v6819_v18 }
 0x12c   :  { %4958 = vmatpush1.bf16.msra.mxu0 %v6430_v22  ;;  %4990 = vmatpush1.bf16.msra.mxu1 %v6439_v25 }
 0x12d   :  { %4960 = vmatprep.subr.bf16.mxu0 %v6452_v29  ;;  %4992 = vmatprep.subr.bf16.mxu1 %v6468_v34 }
 0x12e   :  { %977 = vmatprep.mubr.f32.mxu0 %v6326_v3  ;;  %1048 = vmatprep.mubr.f32.mxu1 %v6326_v3 }
 0x130   :  { %4962 = vmatpush1.bf16.msra.mxu0 %v6470_v35  ;;  %4994 = vmatpush1.bf16.msra.mxu1 %v6480_v38 }
 0x131   :  { %4964 = vmatprep.subr.bf16.mxu0 %v6493_v42  ;;  %4996 = vmatprep.subr.bf16.mxu1 %v6509_v47 }
 0x134   :  { %4966 = vmatpush1.bf16.msra.mxu0 %v6519_v50  ;;  %4998 = vmatpush1.bf16.msra.mxu1 %v6532_v54 }
 0x135   :  { %4968 = vmatprep.subr.bf16.mxu0 %v6545_v58  ;;  %5000 = vmatprep.subr.bf16.mxu1 %v6555_v61 }
 0x138   :  { %4970 = vmatpush1.bf16.msra.mxu0 %v6568_v1  ;;  %5002 = vmatpush1.bf16.msra.mxu1 %v6578_v5 }
 0x139   :  { %4972 = vmatprep.subr.bf16.mxu0 %v6588_v8  ;;  %5004 = vmatprep.subr.bf16.mxu1 %v6598_v11 }
 0x13c   :  { %4974 = vmatpush1.bf16.msra.mxu0 %v6611_v15  ;;  %5006 = vmatpush1.bf16.msra.mxu1 %v6621_v19 }
 0x13d   :  { %4976 = vmatprep.subr.bf16.mxu0 %v6631_v24  ;;  %5008 = vmatprep.subr.bf16.mxu1 %v6641_v28 }
 0x140   :  { %4978 = vmatpush1.bf16.msra.mxu0 %v6654_v33  ;;  %5010 = vmatpush1.bf16.msra.mxu1 %v6664_v39 }
 0x141   :  { %4980 = vmatprep.subr.bf16.mxu0 %v6674_v43  ;;  %5012 = vmatprep.subr.bf16.mxu1 %v6684_v46 }
 0x144   :  { %4982 = vmatpush1.bf16.msra.mxu0 %v6697_v52  ;;  %5014 = vmatpush1.bf16.msra.mxu1 %v6707_v56 }
 0x145   :  { %4984 = vmatprep.subr.bf16.mxu0 %v6717_v60  ;;  %5016 = vmatprep.subr.bf16.mxu1 %v6727_v0 }
 0x148   :  { %4986 = vmatpush1.bf16.msra.mxu0 %v6734_v4  ;;  %5018 = vmatpush1.bf16.msra.mxu1 %v6738_v6 }
 0x1fe   :  { %v734_v22 = vpop.f32.mrb[2].mxu0  ;;  %v805_v25 = vpop.f32.mrb[2].mxu1 }
 0x1ff   :  { %v5941_v29 = vadd.f32 %v734_v22, %v6796_v14  ;;  %v736_v34 = vpop.f32.mrb[3].mxu0  ;;  %v807_v35 = vpop.f32.mrb[3].mxu1  ;;  %v5957_v30 = vadd.f32 %v805_v25, %v6813_v40  ;;  %v1101_v25 = vld [vmem:[%s8542_s2 + $0x38] sm:$0xff] }
 0x200   :  { %v5942_v38 = vadd.f32 %v736_v34, %v6800_v17  ;;  %v5958_v26 = vadd.f32 %v807_v35, %v6807_v32  ;;  %v1098_v34 = vld [vmem:[%s8542_s2 + $0x20] sm:$0xff]  ;;  %v6889_v35 = vpack.c.bf16 %v1101_v25, %v1097_v21  ;;  %v1362_v21 = vld [vmem:[%s8542_s2 + $0xb8] sm:$0xff] }
 0x201   :  { %v4721_v20 = vmul.f32 -1.442695, %v5941_v29  ;;  %v1094_v29 = vld [vmem:[%s8542_s2] sm:$0xff] }
 0x202   :  { %v4722_v23 = vmul.f32 -1.442695, %v5942_v38  ;;  %v4723_v27 = vmul.f32 -1.442695, %v5958_v26  ;;  %v6891_v38 = vpack.c.bf16 %v1098_v34, %v1094_v29  ;;  %5052 = vmatprep.subr.bf16.mxu1 %v6889_v35  ;;  %v1355_v25 = vld [vmem:[%s8542_s2 + $0x80] sm:$0xff] }
 0x203   :  { %6086 = vpow2.f32 %v4721_v20  ;;  %v1096_v20 = vld [vmem:[%s8542_s2 + $0x10] sm:$0xff]  ;;  %v1359_v29 = vld [vmem:[%s8542_s2 + $0xa0] sm:$0xff] }
 0x204   :  { %6088 = vpow2.f32 %v4722_v23  ;;  %v1100_v23 = vld [vmem:[%s8542_s2 + $0x30] sm:$0xff] }
 0x205   :  { %6090 = vpow2.f32 %v4723_v27  ;;  %v6900_v26 = vpack.c.bf16 %v1100_v23, %v1096_v20  ;;  %v1103_v27 = vld [vmem:[%s8542_s2 + $0x48] sm:$0xff]  ;;  %v7009_v20 = vpack.c.bf16 %v1359_v29, %v1355_v25  ;;  %v1357_v23 = vld [vmem:[%s8542_s2 + $0x90] sm:$0xff] }
 0x206   :  { %6092 = vtanh.f32 %v5957_v30  ;;  %v1107_v30 = vld [vmem:[%s8542_s2 + $0x68] sm:$0xff]  ;;  %v1385_v25 = vld [vmem:[%s8542_s2 + $0x170] sm:$0xff] }
 0x207   :  { %v1388_v29 = vld [vmem:[%s8542_s2 + $0x188] sm:$0xff] }
 0x20d   :  { %v6087_v31 = vpop.eup %6086 }
 0x20e   :  { %v6089_v37 = vpop.eup %6088  ;;  %v817_v41 = vadd.f32 1.0, %v6087_v31  ;;  %v1105_v31 = vld [vmem:[%s8542_s2 + $0x58] sm:$0xff] }
 0x20f   :  { %v823_v44 = vadd.f32 1.0, %v6089_v37  ;;  %v6091_v45 = vpop.eup %6090  ;;  %v6914_v37 = vpack.c.bf16 %v1107_v30, %v1103_v27  ;;  %v1361_v27 = vld [vmem:[%s8542_s2 + $0xb0] sm:$0xff] }
 0x210   :  { %6094 = vrcp.f32 %v817_v41  ;;  %v6093_v48 = vpop.eup %6092  ;;  %v830_v55 = vadd.f32 1.0, %v6091_v45  ;;  %v1109_v41 = vld [vmem:[%s8542_s2 + $0x78] sm:$0xff]  ;;  %v1106_v45 = vld [vmem:[%s8542_s2 + $0x60] sm:$0xff]  ;;  %v7018_v30 = vpack.c.bf16 %v1361_v27, %v1357_v23  ;;  %v1392_v27 = vld [vmem:[%s8542_s2 + $0x1a8] sm:$0xff] }
 0x211   :  { %6096 = vrcp.f32 %v823_v44  ;;  %v1102_v44 = vld [vmem:[%s8542_s2 + $0x40] sm:$0xff] }
 0x212   :  { %6098 = vrcp.f32 %v830_v55 }
 0x21a   :  { %v6095_v49 = vpop.eup %6094 }
 0x21b   :  { %v6097_v51 = vpop.eup %6096  ;;  %v835_v53 = vmul.f32 %v6095_v49, %v6093_v48  ;;  %v6925_v48 = vpack.c.bf16 %v1109_v41, %v1105_v31  ;;  %v6927_v49 = vpack.c.bf16 %v1106_v45, %v1102_v44  ;;  %v1364_v31 = vld [vmem:[%s8542_s2 + $0xc8] sm:$0xff]  ;;  %v1366_v44 = vld [vmem:[%s8542_s2 + $0xd8] sm:$0xff] }
 0x21c   :  { %v834_v57 = vmul.f32 %v6097_v51, %v6816_v7  ;;  %v6099_v62 = vpop.eup %6098  ;;  %v1095_v7 = vld [vmem:[%s8542_s2 + $0x8] sm:$0xff]  ;;  %v1104_v51 = vld [vmem:[%s8542_s2 + $0x50] sm:$0xff] }
 0x21d   :  { %v6878_v22 = vpack.c.bf16 %v1099_v12, %v1095_v7  ;;  %v1358_v7 = vld [vmem:[%s8542_s2 + $0x98] sm:$0xff]  ;;  %v1368_v41 = vld [vmem:[%s8542_s2 + $0xe8] sm:$0xff] }
 0x21e   :  { %v6860_v59 = vadd.f32 %v835_v53, %v834_v57  ;;  %v1108_v53 = vld [vmem:[%s8542_s2 + $0x70] sm:$0xff]  ;;  %v7007_v34 = vpack.c.bf16 %v1362_v21, %v1358_v7  ;;  %v7032_v45 = vpack.c.bf16 %v1368_v41, %v1364_v31  ;;  %v1390_v31 = vld [vmem:[%s8542_s2 + $0x198] sm:$0xff] }
 0x21f   :  { %5020 = vmatprep.subr.bf16.mxu0 %v6878_v22  ;;  %v6936_v55 = vpack.c.bf16 %v1108_v53, %v1104_v51  ;;  %v1370_v51 = vld [vmem:[%s8542_s2 + $0xf8] sm:$0xff]  ;;  %v1363_v53 = vld [vmem:[%s8542_s2 + $0xc0] sm:$0xff]  ;;  %v1381_v21 = vld [vmem:[%s8542_s2 + $0x150] sm:$0xff] }
 0x220   :  { %6100 = vtanh.f32 %v6860_v59  ;;  %v7129_v23 = vpack.c.bf16 %v1385_v25, %v1381_v21  ;;  %v1394_v41 = vld [vmem:[%s8542_s2 + $0x1b8] sm:$0xff] }
 0x22a   :  { %v6101_v63 = vpop.eup %6100 }
 0x22b   :  { %v6863_v2 = vmul.f32 %v6101_v63, %v6099_v62  ;;  %v1360_v63 = vld [vmem:[%s8542_s2 + $0xa8] sm:$0xff] }
 0x22d   :  { %978 = vmatmul.mubr.f32.vlgmr.msra.gmra.mrb[4].mxu0 %v6863_v2  ;;  %1049 = vmatmul.mubr.f32.vlgmr.msra.gmra.mrb[4].mxu1 %v6863_v2 }
 0x22e   :  { %1222 = vmatprep.mubr.f32.mxu0 %v6326_v3  ;;  %1293 = vmatprep.mubr.f32.mxu1 %v6326_v3 }
 0x22f   :  { %5022 = vmatpush1.bf16.msra.mxu0 %v6891_v38  ;;  %5054 = vmatpush1.bf16.msra.mxu1 %v6900_v26 }
 0x230   :  { %5024 = vmatprep.subr.bf16.mxu0 %v6914_v37  ;;  %5056 = vmatprep.subr.bf16.mxu1 %v6925_v48 }
 0x233   :  { %5026 = vmatpush1.bf16.msra.mxu0 %v6927_v49  ;;  %5058 = vmatpush1.bf16.msra.mxu1 %v6936_v55 }
 0x234   :  { %5028 = vmatprep.subr.bf16.mxu0 %v6493_v42  ;;  %5060 = vmatprep.subr.bf16.mxu1 %v6509_v47 }
 0x237   :  { %5030 = vmatpush1.bf16.msra.mxu0 %v6519_v50  ;;  %5062 = vmatpush1.bf16.msra.mxu1 %v6532_v54 }
 0x238   :  { %5032 = vmatprep.subr.bf16.mxu0 %v6545_v58  ;;  %5064 = vmatprep.subr.bf16.mxu1 %v6555_v61 }
 0x23b   :  { %5034 = vmatpush1.bf16.msra.mxu0 %v6568_v1  ;;  %5066 = vmatpush1.bf16.msra.mxu1 %v6578_v5 }
 0x23c   :  { %5036 = vmatprep.subr.bf16.mxu0 %v6588_v8  ;;  %5068 = vmatprep.subr.bf16.mxu1 %v6598_v11 }
 0x23f   :  { %5038 = vmatpush1.bf16.msra.mxu0 %v6611_v15  ;;  %5070 = vmatpush1.bf16.msra.mxu1 %v6621_v19 }
 0x240   :  { %5040 = vmatprep.subr.bf16.mxu0 %v6631_v24  ;;  %5072 = vmatprep.subr.bf16.mxu1 %v6641_v28 }
 0x243   :  { %5042 = vmatpush1.bf16.msra.mxu0 %v6654_v33  ;;  %5074 = vmatpush1.bf16.msra.mxu1 %v6664_v39 }
 0x244   :  { %5044 = vmatprep.subr.bf16.mxu0 %v6674_v43  ;;  %5076 = vmatprep.subr.bf16.mxu1 %v6684_v46 }
 0x247   :  { %5046 = vmatpush1.bf16.msra.mxu0 %v6697_v52  ;;  %5078 = vmatpush1.bf16.msra.mxu1 %v6707_v56 }
 0x248   :  { %5048 = vmatprep.subr.bf16.mxu0 %v6717_v60  ;;  %5080 = vmatprep.subr.bf16.mxu1 %v6727_v0 }
 0x24b   :  { %5050 = vmatpush1.bf16.msra.mxu0 %v6734_v4  ;;  %5082 = vmatpush1.bf16.msra.mxu1 %v6738_v6 }
 0x24c   :  { %5084 = vmatprep.subr.bf16.mxu0 %v6878_v22  ;;  %5116 = vmatprep.subr.bf16.mxu1 %v6889_v35 }
 0x300   :  { %v979_v42 = vpop.f32.mrb[4].mxu0  ;;  %v1050_v47 = vpop.f32.mrb[4].mxu1 }
 0x301   :  { %v5943_v50 = vadd.f32 %v979_v42, %v6796_v14  ;;  %v981_v54 = vpop.f32.mrb[5].mxu0  ;;  %v1052_v58 = vpop.f32.mrb[5].mxu1  ;;  %v5959_v15 = vadd.f32 %v1050_v47, %v6813_v40  ;;  %v1367_v42 = vld [vmem:[%s8542_s2 + $0xe0] sm:$0xff]  ;;  %v7043_v47 = vpack.c.bf16 %v1370_v51, %v1366_v44  ;;  %v7141_v44 = vpack.c.bf16 %v1392_v27, %v1388_v29 }
 0x302   :  { %v5944_v61 = vadd.f32 %v981_v54, %v6800_v17  ;;  %v5960_v8 = vadd.f32 %v1052_v58, %v6807_v32  ;;  %v1365_v54 = vld [vmem:[%s8542_s2 + $0xd0] sm:$0xff]  ;;  %v7143_v51 = vpack.c.bf16 %v1394_v41, %v1390_v31 }
 0x303   :  { %v4724_v1 = vmul.f32 -1.442695, %v5943_v50  ;;  %v7045_v50 = vpack.c.bf16 %v1367_v42, %v1363_v53  ;;  %v1369_v58 = vld [vmem:[%s8542_s2 + $0xf0] sm:$0xff]  ;;  %v1387_v53 = vld [vmem:[%s8542_s2 + $0x180] sm:$0xff] }
 0x304   :  { %v4725_v5 = vmul.f32 -1.442695, %v5944_v61  ;;  %v4726_v11 = vmul.f32 -1.442695, %v5960_v8  ;;  %v7054_v61 = vpack.c.bf16 %v1369_v58, %v1365_v54  ;;  %v1374_v8 = vld [vmem:[%s8542_s2 + $0x118] sm:$0xff]  ;;  %v1391_v42 = vld [vmem:[%s8542_s2 + $0x1a0] sm:$0xff] }
 0x305   :  { %6102 = vpow2.f32 %v4724_v1  ;;  %v1372_v1 = vld [vmem:[%s8542_s2 + $0x108] sm:$0xff]  ;;  %v1389_v54 = vld [vmem:[%s8542_s2 + $0x190] sm:$0xff]  ;;  %v7155_v58 = vpack.c.bf16 %v1391_v42, %v1387_v53 }
 0x306   :  { %6104 = vpow2.f32 %v4725_v5  ;;  %v1376_v5 = vld [vmem:[%s8542_s2 + $0x128] sm:$0xff] }
 0x307   :  { %6106 = vpow2.f32 %v4726_v11  ;;  %v7068_v11 = vpack.c.bf16 %v1376_v5, %v1372_v1  ;;  %v1393_v1 = vld [vmem:[%s8542_s2 + $0x1b0] sm:$0xff]  ;;  %v1396_v5 = vld [vmem:[%s8542_s2 + $0x1c8] sm:$0xff] }
 0x308   :  { %6108 = vtanh.f32 %v5959_v15  ;;  %v1378_v15 = vld [vmem:[%s8542_s2 + $0x138] sm:$0xff] }
 0x30f   :  { %v6103_v19 = vpop.eup %6102 }
 0x310   :  { %v6105_v24 = vpop.eup %6104  ;;  %v1062_v28 = vadd.f32 1.0, %v6103_v19  ;;  %v1371_v19 = vld [vmem:[%s8542_s2 + $0x100] sm:$0xff] }
 0x311   :  { %v1068_v33 = vadd.f32 1.0, %v6105_v24  ;;  %v6107_v39 = vpop.eup %6106  ;;  %v1375_v24 = vld [vmem:[%s8542_s2 + $0x120] sm:$0xff] }
 0x312   :  { %6110 = vrcp.f32 %v1062_v28  ;;  %v6109_v43 = vpop.eup %6108  ;;  %v1075_v60 = vadd.f32 1.0, %v6107_v39  ;;  %v7079_v28 = vpack.c.bf16 %v1378_v15, %v1374_v8  ;;  %v1373_v39 = vld [vmem:[%s8542_s2 + $0x110] sm:$0xff]  ;;  %v1400_v8 = vld [vmem:[%s8542_s2 + $0x1e8] sm:$0xff]  ;;  %v7168_v15 = vpack.c.bf16 %v1393_v1, %v1389_v54 }
 0x313   :  { %6112 = vrcp.f32 %v1068_v33  ;;  %v7081_v33 = vpack.c.bf16 %v1375_v24, %v1371_v19  ;;  %v7170_v19 = vpack.c.bf16 %v1400_v8, %v1396_v5  ;;  %v1398_v24 = vld [vmem:[%s8542_s2 + $0x1d8] sm:$0xff] }
 0x314   :  { %6114 = vrcp.f32 %v1075_v60  ;;  %v1382_v60 = vld [vmem:[%s8542_s2 + $0x158] sm:$0xff] }
 0x31c   :  { %v6111_v46 = vpop.eup %6110 }
 0x31d   :  { %v6113_v52 = vpop.eup %6112  ;;  %v1080_v56 = vmul.f32 %v6111_v46, %v6109_v43  ;;  %v1377_v43 = vld [vmem:[%s8542_s2 + $0x130] sm:$0xff] }
 0x31e   :  { %v1079_v0 = vmul.f32 %v6113_v52, %v6860_v59  ;;  %v6115_v6 = vpop.eup %6114  ;;  %v1356_v59 = vld [vmem:[%s8542_s2 + $0x88] sm:$0xff]  ;;  %v7090_v46 = vpack.c.bf16 %v1377_v43, %v1373_v39  ;;  %v1402_v39 = vld [vmem:[%s8542_s2 + $0x1f8] sm:$0xff]  ;;  %v1395_v43 = vld [vmem:[%s8542_s2 + $0x1c0] sm:$0xff] }
 0x31f   :  { %v6996_v12 = vpack.c.bf16 %v1360_v63, %v1356_v59  ;;  %v1380_v52 = vld [vmem:[%s8542_s2 + $0x148] sm:$0xff]  ;;  %v1383_v59 = vld [vmem:[%s8542_s2 + $0x160] sm:$0xff] }
 0x320   :  { %v6972_v4 = vadd.f32 %v1080_v56, %v1079_v0  ;;  %v1384_v56 = vld [vmem:[%s8542_s2 + $0x168] sm:$0xff] }
 0x321   :  { %v7103_v0 = vpack.c.bf16 %v1384_v56, %v1380_v52  ;;  %v7182_v52 = vpack.c.bf16 %v1402_v39, %v1398_v24  ;;  %v1399_v56 = vld [vmem:[%s8542_s2 + $0x1e0] sm:$0xff] }
 0x322   :  { %6116 = vtanh.f32 %v6972_v4 }
 0x32c   :  { %v6117_v57 = vpop.eup %6116 }
 0x32d   :  { %v6975_v62 = vmul.f32 %v6117_v57, %v6115_v6  ;;  %v1386_v6 = vld [vmem:[%s8542_s2 + $0x178] sm:$0xff]  ;;  %v1379_v57 = vld [vmem:[%s8542_s2 + $0x140] sm:$0xff] }
 0x32e   :  { %v7115_v63 = vpack.c.bf16 %v1386_v6, %v1382_v60  ;;  %v7117_v7 = vpack.c.bf16 %v1383_v59, %v1379_v57  ;;  %v1397_v60 = vld [vmem:[%s8542_s2 + $0x1d0] sm:$0xff]  ;;  %v7194_v57 = vpack.c.bf16 %v1399_v56, %v1395_v43 }
 0x32f   :  { %1223 = vmatmul.mubr.f32.vlgmr.msra.gmra.mrb[6].mxu0 %v6975_v62  ;;  %1294 = vmatmul.mubr.f32.vlgmr.msra.gmra.mrb[6].mxu1 %v6975_v62  ;;  %v1401_v6 = vld [vmem:[%s8542_s2 + $0x1f0] sm:$0xff] }
 0x330   :  { %5086 = vmatpush1.bf16.msra.mxu0 %v6891_v38  ;;  %5118 = vmatpush1.bf16.msra.mxu1 %v6900_v26  ;;  %v7198_v59 = vpack.c.bf16 %v1401_v6, %v1397_v60 }
 0x331   :  { %5088 = vmatprep.subr.bf16.mxu0 %v6914_v37  ;;  %5120 = vmatprep.subr.bf16.mxu1 %v6925_v48 }
 0x332   :  { %1467 = vmatprep.mubr.f32.mxu0 %v6326_v3  ;;  %1538 = vmatprep.mubr.f32.mxu1 %v6326_v3 }
 0x334   :  { %5090 = vmatpush1.bf16.msra.mxu0 %v6927_v49  ;;  %5122 = vmatpush1.bf16.msra.mxu1 %v6936_v55 }
 0x335   :  { %5092 = vmatprep.subr.bf16.mxu0 %v6996_v12  ;;  %5124 = vmatprep.subr.bf16.mxu1 %v7007_v34 }
 0x338   :  { %5094 = vmatpush1.bf16.msra.mxu0 %v7009_v20  ;;  %5126 = vmatpush1.bf16.msra.mxu1 %v7018_v30 }
 0x339   :  { %5096 = vmatprep.subr.bf16.mxu0 %v7032_v45  ;;  %5128 = vmatprep.subr.bf16.mxu1 %v7043_v47 }
 0x33c   :  { %5098 = vmatpush1.bf16.msra.mxu0 %v7045_v50  ;;  %5130 = vmatpush1.bf16.msra.mxu1 %v7054_v61 }
 0x33d   :  { %5100 = vmatprep.subr.bf16.mxu0 %v7068_v11  ;;  %5132 = vmatprep.subr.bf16.mxu1 %v7079_v28 }
 0x340   :  { %5102 = vmatpush1.bf16.msra.mxu0 %v7081_v33  ;;  %5134 = vmatpush1.bf16.msra.mxu1 %v7090_v46 }
 0x341   :  { %5104 = vmatprep.subr.bf16.mxu0 %v7103_v0  ;;  %5136 = vmatprep.subr.bf16.mxu1 %v7115_v63 }
 0x344   :  { %5106 = vmatpush1.bf16.msra.mxu0 %v7117_v7  ;;  %5138 = vmatpush1.bf16.msra.mxu1 %v7129_v23 }
 0x345   :  { %5108 = vmatprep.subr.bf16.mxu0 %v7141_v44  ;;  %5140 = vmatprep.subr.bf16.mxu1 %v7143_v51 }
 0x348   :  { %5110 = vmatpush1.bf16.msra.mxu0 %v7155_v58  ;;  %5142 = vmatpush1.bf16.msra.mxu1 %v7168_v15 }
 0x349   :  { %5112 = vmatprep.subr.bf16.mxu0 %v7170_v19  ;;  %5144 = vmatprep.subr.bf16.mxu1 %v7182_v52 }
 0x34c   :  { %5114 = vmatpush1.bf16.msra.mxu0 %v7194_v57  ;;  %5146 = vmatpush1.bf16.msra.mxu1 %v7198_v59 }
 0x34d   :  { %5148 = vmatprep.subr.bf16.mxu0 %v6878_v22  ;;  %5180 = vmatprep.subr.bf16.mxu1 %v6889_v35 }
 0x402   :  { %v1224_v21 = vpop.f32.mrb[6].mxu0  ;;  %v1295_v25 = vpop.f32.mrb[6].mxu1 }
 0x403   :  { %v5945_v29 = vadd.f32 %v1224_v21, %v6796_v14  ;;  %v1226_v27 = vpop.f32.mrb[7].mxu0  ;;  %v1297_v31 = vpop.f32.mrb[7].mxu1  ;;  %v5961_v5 = vadd.f32 %v1295_v25, %v6813_v40 }
 0x404   :  { %v5946_v41 = vadd.f32 %v1226_v27, %v6800_v17  ;;  %v5962_v54 = vadd.f32 %v1297_v31, %v6807_v32 }
 0x405   :  { %v4727_v53 = vmul.f32 -1.442695, %v5945_v29 }
 0x406   :  { %v4728_v42 = vmul.f32 -1.442695, %v5946_v41  ;;  %v4729_v1 = vmul.f32 -1.442695, %v5962_v54 }
 0x407   :  { %6118 = vpow2.f32 %v4727_v53 }
 0x408   :  { %6120 = vpow2.f32 %v4728_v42 }
 0x409   :  { %6122 = vpow2.f32 %v4729_v1 }
 0x40a   :  { %6124 = vtanh.f32 %v5961_v5 }
 0x411   :  { %v6119_v8 = vpop.eup %6118 }
 0x412   :  { %v6121_v24 = vpop.eup %6120  ;;  %v1307_v39 = vadd.f32 1.0, %v6119_v8 }
 0x413   :  { %v1313_v43 = vadd.f32 1.0, %v6121_v24  ;;  %v6123_v56 = vpop.eup %6122 }
 0x414   :  { %6126 = vrcp.f32 %v1307_v39  ;;  %v6125_v60 = vpop.eup %6124  ;;  %v1320_v27 = vadd.f32 1.0, %v6123_v56 }
 0x415   :  { %6128 = vrcp.f32 %v1313_v43 }
 0x416   :  { %6130 = vrcp.f32 %v1320_v27 }
 0x41e   :  { %v6127_v6 = vpop.eup %6126 }
 0x41f   :  { %v6129_v21 = vpop.eup %6128  ;;  %v1325_v29 = vmul.f32 %v6127_v6, %v6125_v60 }
 0x420   :  { %v1324_v41 = vmul.f32 %v6129_v21, %v6972_v4  ;;  %v6131_v25 = vpop.eup %6130 }
 0x422   :  { %v7210_v31 = vadd.f32 %v1325_v29, %v1324_v41 }
 0x424   :  { %6132 = vtanh.f32 %v7210_v31 }
 0x42e   :  { %v6133_v53 = vpop.eup %6132 }
 0x42f   :  { %v7213_v42 = vmul.f32 %v6133_v53, %v6131_v25 }
 0x431   :  { %1468 = vmatmul.mubr.f32.vlgmr.msra.gmra.mrb[8].mxu0 %v7213_v42  ;;  %1539 = vmatmul.mubr.f32.vlgmr.msra.gmra.mrb[8].mxu1 %v7213_v42 }
 0x432   :  { %5150 = vmatpush1.bf16.msra.mxu0 %v6891_v38  ;;  %5182 = vmatpush1.bf16.msra.mxu1 %v6900_v26 }
 0x433   :  { %5152 = vmatprep.subr.bf16.mxu0 %v6914_v37  ;;  %5184 = vmatprep.subr.bf16.mxu1 %v6925_v48 }
 0x434   :  { %1712 = vmatprep.mubr.f32.mxu0 %v6326_v3  ;;  %1783 = vmatprep.mubr.f32.mxu1 %v6326_v3 }
 0x436   :  { %5154 = vmatpush1.bf16.msra.mxu0 %v6927_v49  ;;  %5186 = vmatpush1.bf16.msra.mxu1 %v6936_v55 }
 0x437   :  { %5156 = vmatprep.subr.bf16.mxu0 %v6996_v12  ;;  %5188 = vmatprep.subr.bf16.mxu1 %v7007_v34 }
 0x43a   :  { %5158 = vmatpush1.bf16.msra.mxu0 %v7009_v20  ;;  %5190 = vmatpush1.bf16.msra.mxu1 %v7018_v30 }
 0x43b   :  { %5160 = vmatprep.subr.bf16.mxu0 %v7032_v45  ;;  %5192 = vmatprep.subr.bf16.mxu1 %v7043_v47 }
 0x43e   :  { %5162 = vmatpush1.bf16.msra.mxu0 %v7045_v50  ;;  %5194 = vmatpush1.bf16.msra.mxu1 %v7054_v61 }
 0x43f   :  { %5164 = vmatprep.subr.bf16.mxu0 %v7068_v11  ;;  %5196 = vmatprep.subr.bf16.mxu1 %v7079_v28 }
 0x442   :  { %5166 = vmatpush1.bf16.msra.mxu0 %v7081_v33  ;;  %5198 = vmatpush1.bf16.msra.mxu1 %v7090_v46 }
 0x443   :  { %5168 = vmatprep.subr.bf16.mxu0 %v7103_v0  ;;  %5200 = vmatprep.subr.bf16.mxu1 %v7115_v63 }
 0x446   :  { %5170 = vmatpush1.bf16.msra.mxu0 %v7117_v7  ;;  %5202 = vmatpush1.bf16.msra.mxu1 %v7129_v23 }
 0x447   :  { %5172 = vmatprep.subr.bf16.mxu0 %v7141_v44  ;;  %5204 = vmatprep.subr.bf16.mxu1 %v7143_v51 }
 0x44a   :  { %5174 = vmatpush1.bf16.msra.mxu0 %v7155_v58  ;;  %5206 = vmatpush1.bf16.msra.mxu1 %v7168_v15 }
 0x44b   :  { %5176 = vmatprep.subr.bf16.mxu0 %v7170_v19  ;;  %5208 = vmatprep.subr.bf16.mxu1 %v7182_v52 }
 0x44e   :  { %5178 = vmatpush1.bf16.msra.mxu0 %v7194_v57  ;;  %5210 = vmatpush1.bf16.msra.mxu1 %v7198_v59 }
 0x44f   :  { %5212 = vmatprep.subr.bf16.mxu0 %v6878_v22  ;;  %5244 = vmatprep.subr.bf16.mxu1 %v6889_v35 }
 0x504   :  { %v1469_v4 = vpop.f32.mrb[8].mxu0  ;;  %v1540_v54 = vpop.f32.mrb[8].mxu1 }
 0x505   :  { %v5947_v1 = vadd.f32 %v1469_v4, %v6796_v14  ;;  %v1471_v5 = vpop.f32.mrb[9].mxu0  ;;  %v1542_v8 = vpop.f32.mrb[9].mxu1  ;;  %v5963_v6 = vadd.f32 %v1540_v54, %v6813_v40 }
 0x506   :  { %v5948_v24 = vadd.f32 %v1471_v5, %v6800_v17  ;;  %v5964_v56 = vadd.f32 %v1542_v8, %v6807_v32 }
 0x507   :  { %v4730_v39 = vmul.f32 -1.442695, %v5947_v1 }
 0x508   :  { %v4731_v43 = vmul.f32 -1.442695, %v5948_v24  ;;  %v4732_v60 = vmul.f32 -1.442695, %v5964_v56 }
 0x509   :  { %6134 = vpow2.f32 %v4730_v39 }
 0x50a   :  { %6136 = vpow2.f32 %v4731_v43 }
 0x50b   :  { %6138 = vpow2.f32 %v4732_v60 }
 0x50c   :  { %6140 = vtanh.f32 %v5963_v6 }
 0x513   :  { %v6135_v22 = vpop.eup %6134 }
 0x514   :  { %v6137_v21 = vpop.eup %6136  ;;  %v1552_v35 = vadd.f32 1.0, %v6135_v22 }
 0x515   :  { %v1558_v29 = vadd.f32 1.0, %v6137_v21  ;;  %v6139_v27 = vpop.eup %6138 }
 0x516   :  { %6142 = vrcp.f32 %v1552_v35  ;;  %v6141_v41 = vpop.eup %6140  ;;  %v1565_v1 = vadd.f32 1.0, %v6139_v27 }
 0x517   :  { %6144 = vrcp.f32 %v1558_v29 }
 0x518   :  { %6146 = vrcp.f32 %v1565_v1 }
 0x520   :  { %v6143_v25 = vpop.eup %6142 }
 0x521   :  { %v6145_v53 = vpop.eup %6144  ;;  %v1570_v4 = vmul.f32 %v6143_v25, %v6141_v41 }
 0x522   :  { %v1569_v5 = vmul.f32 %v6145_v53, %v7210_v31  ;;  %v6147_v54 = vpop.eup %6146 }
 0x524   :  { %v7256_v8 = vadd.f32 %v1570_v4, %v1569_v5 }
 0x526   :  { %6148 = vtanh.f32 %v7256_v8 }
 0x530   :  { %v6149_v24 = vpop.eup %6148 }
 0x531   :  { %v7259_v39 = vmul.f32 %v6149_v24, %v6147_v54 }
 0x533   :  { %1713 = vmatmul.mubr.f32.vlgmr.msra.gmra.mrb[10].mxu0 %v7259_v39  ;;  %1784 = vmatmul.mubr.f32.vlgmr.msra.gmra.mrb[10].mxu1 %v7259_v39 }
 0x534   :  { %5214 = vmatpush1.bf16.msra.mxu0 %v6891_v38  ;;  %5246 = vmatpush1.bf16.msra.mxu1 %v6900_v26 }
 0x535   :  { %5216 = vmatprep.subr.bf16.mxu0 %v6914_v37  ;;  %5248 = vmatprep.subr.bf16.mxu1 %v6925_v48 }
 0x536   :  { %1957 = vmatprep.mubr.f32.mxu0 %v6326_v3  ;;  %2028 = vmatprep.mubr.f32.mxu1 %v6326_v3 }
 0x538   :  { %5218 = vmatpush1.bf16.msra.mxu0 %v6927_v49  ;;  %5250 = vmatpush1.bf16.msra.mxu1 %v6936_v55 }
 0x539   :  { %5220 = vmatprep.subr.bf16.mxu0 %v6996_v12  ;;  %5252 = vmatprep.subr.bf16.mxu1 %v7007_v34 }
 0x53c   :  { %5222 = vmatpush1.bf16.msra.mxu0 %v7009_v20  ;;  %5254 = vmatpush1.bf16.msra.mxu1 %v7018_v30 }
 0x53d   :  { %5224 = vmatprep.subr.bf16.mxu0 %v7032_v45  ;;  %5256 = vmatprep.subr.bf16.mxu1 %v7043_v47 }
 0x540   :  { %5226 = vmatpush1.bf16.msra.mxu0 %v7045_v50  ;;  %5258 = vmatpush1.bf16.msra.mxu1 %v7054_v61 }
 0x541   :  { %5228 = vmatprep.subr.bf16.mxu0 %v7068_v11  ;;  %5260 = vmatprep.subr.bf16.mxu1 %v7079_v28 }
 0x544   :  { %5230 = vmatpush1.bf16.msra.mxu0 %v7081_v33  ;;  %5262 = vmatpush1.bf16.msra.mxu1 %v7090_v46 }
 0x545   :  { %5232 = vmatprep.subr.bf16.mxu0 %v7103_v0  ;;  %5264 = vmatprep.subr.bf16.mxu1 %v7115_v63 }
 0x548   :  { %5234 = vmatpush1.bf16.msra.mxu0 %v7117_v7  ;;  %5266 = vmatpush1.bf16.msra.mxu1 %v7129_v23 }
 0x549   :  { %5236 = vmatprep.subr.bf16.mxu0 %v7141_v44  ;;  %5268 = vmatprep.subr.bf16.mxu1 %v7143_v51 }
 0x54c   :  { %5238 = vmatpush1.bf16.msra.mxu0 %v7155_v58  ;;  %5270 = vmatpush1.bf16.msra.mxu1 %v7168_v15 }
 0x54d   :  { %5240 = vmatprep.subr.bf16.mxu0 %v7170_v19  ;;  %5272 = vmatprep.subr.bf16.mxu1 %v7182_v52 }
 0x550   :  { %5242 = vmatpush1.bf16.msra.mxu0 %v7194_v57  ;;  %5274 = vmatpush1.bf16.msra.mxu1 %v7198_v59 }
 0x606   :  { %v1714_v38 = vpop.f32.mrb[10].mxu0  ;;  %v1785_v26 = vpop.f32.mrb[10].mxu1 }
 0x607   :  { %v5949_v37 = vadd.f32 %v1714_v38, %v6796_v14  ;;  %v1716_v48 = vpop.f32.mrb[11].mxu0  ;;  %v1787_v49 = vpop.f32.mrb[11].mxu1  ;;  %v5965_v6 = vadd.f32 %v1785_v26, %v6813_v40 }
 0x608   :  { %v5950_v55 = vadd.f32 %v1716_v48, %v6800_v17  ;;  %v5966_v56 = vadd.f32 %v1787_v49, %v6807_v32  ;;  %v2077_v48 = vld [vmem:[%s8542_s2 + $0x18] sm:$0xff] }
 0x609   :  { %v4733_v31 = vmul.f32 -1.442695, %v5949_v37  ;;  %v2079_v37 = vld [vmem:[%s8542_s2 + $0x28] sm:$0xff] }
 0x60a   :  { %v4734_v43 = vmul.f32 -1.442695, %v5950_v55  ;;  %v4735_v60 = vmul.f32 -1.442695, %v5966_v56  ;;  %v2081_v55 = vld [vmem:[%s8542_s2 + $0x38] sm:$0xff] }
 0x60b   :  { %6150 = vpow2.f32 %v4733_v31  ;;  %v2074_v31 = vld [vmem:[%s8542_s2] sm:$0xff]  ;;  %v5307_v56 = vpack.c.bf16 %v2081_v55, %v2077_v48 }
 0x60c   :  { %6152 = vpow2.f32 %v4734_v43  ;;  %v2078_v43 = vld [vmem:[%s8542_s2 + $0x20] sm:$0xff] }
 0x60d   :  { %6154 = vpow2.f32 %v4735_v60  ;;  %v5277_v60 = vpack.c.bf16 %v2078_v43, %v2074_v31  ;;  %5308 = vmatprep.subr.bf16.mxu1 %v5307_v56  ;;  %v2321_v43 = vld [vmem:[%s8544_s4] sm:$0xff] }
 0x60e   :  { %6156 = vtanh.f32 %v5965_v6  ;;  %v2076_v6 = vld [vmem:[%s8542_s2 + $0x10] sm:$0xff]  ;;  %v2325_v56 = vld [vmem:[%s8544_s4 + $0x20] sm:$0xff] }
 0x615   :  { %v6151_v22 = vpop.eup %6150 }
 0x616   :  { %v6153_v21 = vpop.eup %6152  ;;  %v1797_v35 = vadd.f32 1.0, %v6151_v22  ;;  %v2080_v22 = vld [vmem:[%s8542_s2 + $0x30] sm:$0xff] }
 0x617   :  { %v1803_v29 = vadd.f32 1.0, %v6153_v21  ;;  %v6155_v27 = vpop.eup %6154  ;;  %v5309_v21 = vpack.c.bf16 %v2080_v22, %v2076_v6  ;;  %v2330_v6 = vld [vmem:[%s8544_s4 + $0x48] sm:$0xff] }
 0x618   :  { %6158 = vrcp.f32 %v1797_v35  ;;  %v6157_v41 = vpop.eup %6156  ;;  %v1810_v1 = vadd.f32 1.0, %v6155_v27  ;;  %v2083_v35 = vld [vmem:[%s8542_s2 + $0x48] sm:$0xff]  ;;  %v2085_v27 = vld [vmem:[%s8542_s2 + $0x58] sm:$0xff] }
 0x619   :  { %6160 = vrcp.f32 %v1803_v29  ;;  %v2087_v29 = vld [vmem:[%s8542_s2 + $0x68] sm:$0xff] }
 0x61a   :  { %6162 = vrcp.f32 %v1810_v1  ;;  %v2334_v22 = vld [vmem:[%s8544_s4 + $0x68] sm:$0xff] }
 0x622   :  { %v6159_v25 = vpop.eup %6158 }
 0x623   :  { %v6161_v53 = vpop.eup %6160  ;;  %v1815_v4 = vmul.f32 %v6159_v25, %v6157_v41  ;;  %v5279_v41 = vpack.c.bf16 %v2087_v29, %v2083_v35  ;;  %v2089_v25 = vld [vmem:[%s8542_s2 + $0x78] sm:$0xff] }
 0x624   :  { %v1814_v5 = vmul.f32 %v6161_v53, %v7256_v8  ;;  %v6163_v24 = vpop.eup %6162  ;;  %v2075_v8 = vld [vmem:[%s8542_s2 + $0x8] sm:$0xff]  ;;  %v2082_v53 = vld [vmem:[%s8542_s2 + $0x40] sm:$0xff]  ;;  %v5311_v1 = vpack.c.bf16 %v2089_v25, %v2085_v27  ;;  %v2336_v35 = vld [vmem:[%s8544_s4 + $0x78] sm:$0xff] }
 0x625   :  { %v5275_v49 = vpack.c.bf16 %v2079_v37, %v2075_v8 }
 0x626   :  { %v7300_v54 = vadd.f32 %v1815_v4, %v1814_v5  ;;  %v2086_v4 = vld [vmem:[%s8542_s2 + $0x60] sm:$0xff] }
 0x627   :  { %5276 = vmatprep.subr.bf16.mxu0 %v5275_v49  ;;  %v5281_v5 = vpack.c.bf16 %v2086_v4, %v2082_v53  ;;  %v2329_v53 = vld [vmem:[%s8544_s4 + $0x40] sm:$0xff] }
 0x628   :  { %6164 = vtanh.f32 %v7300_v54  ;;  %v2333_v4 = vld [vmem:[%s8544_s4 + $0x60] sm:$0xff] }
 0x632   :  { %v6165_v38 = vpop.eup %6164 }
 0x633   :  { %v7303_v26 = vmul.f32 %v6165_v38, %v6163_v24  ;;  %v2084_v24 = vld [vmem:[%s8542_s2 + $0x50] sm:$0xff] }
 0x634   :  { %v2088_v38 = vld [vmem:[%s8542_s2 + $0x70] sm:$0xff] }
 0x635   :  { %1958 = vmatmul.mubr.f32.vlgmr.msra.gmra.mrb[12].mxu0 %v7303_v26  ;;  %2029 = vmatmul.mubr.f32.vlgmr.msra.gmra.mrb[12].mxu1 %v7303_v26  ;;  %v5313_v8 = vpack.c.bf16 %v2088_v38, %v2084_v24  ;;  %v2331_v38 = vld [vmem:[%s8544_s4 + $0x50] sm:$0xff] }
 0x636   :  { %2202 = vmatprep.mubr.f32.mxu0 %v6326_v3  ;;  %2273 = vmatprep.mubr.f32.mxu1 %v6326_v3 }
 0x637   :  { %5278 = vmatpush1.bf16.msra.mxu0 %v5277_v60  ;;  %5310 = vmatpush1.bf16.msra.mxu1 %v5309_v21  ;;  %v2323_v60 = vld [vmem:[%s8544_s4 + $0x10] sm:$0xff]  ;;  %v2332_v21 = vld [vmem:[%s8544_s4 + $0x58] sm:$0xff] }
 0x638   :  { %5280 = vmatprep.subr.bf16.mxu0 %v5279_v41  ;;  %5312 = vmatprep.subr.bf16.mxu1 %v5311_v1  ;;  %v5341_v41 = vpack.c.bf16 %v2325_v56, %v2321_v43  ;;  %v5375_v24 = vpack.c.bf16 %v2336_v35, %v2332_v21  ;;  %v2355_v21 = vld [vmem:[%s8544_s4 + $0x110] sm:$0xff] }
 0x639   :  { %v2359_v35 = vld [vmem:[%s8544_s4 + $0x130] sm:$0xff] }
 0x63b   :  { %5282 = vmatpush1.bf16.msra.mxu0 %v5281_v5  ;;  %5314 = vmatpush1.bf16.msra.mxu1 %v5313_v8  ;;  %v5343_v5 = vpack.c.bf16 %v2334_v22, %v2330_v6  ;;  %v2335_v8 = vld [vmem:[%s8544_s4 + $0x70] sm:$0xff] }
 0x63c   :  { %5284 = vmatprep.subr.bf16.mxu0 %v6996_v12  ;;  %5316 = vmatprep.subr.bf16.mxu1 %v7007_v34  ;;  %v2322_v12 = vld [vmem:[%s8544_s4 + $0x8] sm:$0xff] }
 0x63d   :  { %v2326_v34 = vld [vmem:[%s8544_s4 + $0x28] sm:$0xff] }
 0x63f   :  { %5286 = vmatpush1.bf16.msra.mxu0 %v7009_v20  ;;  %5318 = vmatpush1.bf16.msra.mxu1 %v7018_v30  ;;  %v2324_v20 = vld [vmem:[%s8544_s4 + $0x18] sm:$0xff] }
 0x640   :  { %5288 = vmatprep.subr.bf16.mxu0 %v7032_v45  ;;  %5320 = vmatprep.subr.bf16.mxu1 %v7043_v47  ;;  %v2328_v30 = vld [vmem:[%s8544_s4 + $0x38] sm:$0xff]  ;;  %v5339_v45 = vpack.c.bf16 %v2326_v34, %v2322_v12  ;;  %v2338_v12 = vld [vmem:[%s8544_s4 + $0x88] sm:$0xff] }
 0x641   :  { %v5371_v47 = vpack.c.bf16 %v2328_v30, %v2324_v20  ;;  %v2342_v34 = vld [vmem:[%s8544_s4 + $0xa8] sm:$0xff]  ;;  %v2340_v20 = vld [vmem:[%s8544_s4 + $0x98] sm:$0xff] }
 0x642   :  { %v2344_v30 = vld [vmem:[%s8544_s4 + $0xb8] sm:$0xff] }
 0x643   :  { %5290 = vmatpush1.bf16.msra.mxu0 %v7045_v50  ;;  %5322 = vmatpush1.bf16.msra.mxu1 %v7054_v61 }
 0x644   :  { %5292 = vmatprep.subr.bf16.mxu0 %v7068_v11  ;;  %5324 = vmatprep.subr.bf16.mxu1 %v7079_v28 }
 0x647   :  { %5294 = vmatpush1.bf16.msra.mxu0 %v7081_v33  ;;  %5326 = vmatpush1.bf16.msra.mxu1 %v7090_v46 }
 0x648   :  { %5296 = vmatprep.subr.bf16.mxu0 %v7103_v0  ;;  %5328 = vmatprep.subr.bf16.mxu1 %v7115_v63 }
 0x64b   :  { %5298 = vmatpush1.bf16.msra.mxu0 %v7117_v7  ;;  %5330 = vmatpush1.bf16.msra.mxu1 %v7129_v23 }
 0x64c   :  { %5300 = vmatprep.subr.bf16.mxu0 %v7141_v44  ;;  %5332 = vmatprep.subr.bf16.mxu1 %v7143_v51 }
 0x64f   :  { %5302 = vmatpush1.bf16.msra.mxu0 %v7155_v58  ;;  %5334 = vmatpush1.bf16.msra.mxu1 %v7168_v15 }
 0x650   :  { %5304 = vmatprep.subr.bf16.mxu0 %v7170_v19  ;;  %5336 = vmatprep.subr.bf16.mxu1 %v7182_v52 }
 0x653   :  { %5306 = vmatpush1.bf16.msra.mxu0 %v7194_v57  ;;  %5338 = vmatpush1.bf16.msra.mxu1 %v7198_v59 }
 0x654   :  { %5340 = vmatprep.subr.bf16.mxu0 %v5339_v45  ;;  %5372 = vmatprep.subr.bf16.mxu1 %v5371_v47  ;;  %v5345_v45 = vpack.c.bf16 %v2333_v4, %v2329_v53  ;;  %v5377_v47 = vpack.c.bf16 %v2335_v8, %v2331_v38  ;;  %v5389_v4 = vpack.c.bf16 %v2359_v35, %v2355_v21  ;;  %v2685_v21 = vld [vmem:[%s8545_s5 + $0x68] sm:$0xff]  ;;  %v2683_v35 = vld [vmem:[%s8545_s5 + $0x58] sm:$0xff] }
 0x708   :  { %v1959_v50 = vpop.f32.mrb[12].mxu0  ;;  %v2030_v61 = vpop.f32.mrb[12].mxu1 }
 0x709   :  { %v5951_v11 = vadd.f32 %v1959_v50, %v6796_v14  ;;  %v1961_v28 = vpop.f32.mrb[13].mxu0  ;;  %v2032_v33 = vpop.f32.mrb[13].mxu1  ;;  %v5967_v44 = vadd.f32 %v2030_v61, %v6813_v40  ;;  %v2337_v50 = vld [vmem:[%s8544_s4 + $0x80] sm:$0xff] }
 0x70a   :  { %v5952_v46 = vadd.f32 %v1961_v28, %v6800_v17  ;;  %v5968_v7 = vadd.f32 %v2032_v33, %v6807_v32  ;;  %v2341_v61 = vld [vmem:[%s8544_s4 + $0xa0] sm:$0xff]  ;;  %v5379_v28 = vpack.c.bf16 %v2344_v30, %v2340_v20  ;;  %v2339_v33 = vld [vmem:[%s8544_s4 + $0x90] sm:$0xff]  ;;  %v2370_v20 = vld [vmem:[%s8544_s4 + $0x188] sm:$0xff] }
 0x70b   :  { %v4736_v0 = vmul.f32 -1.442695, %v5951_v11  ;;  %v5347_v11 = vpack.c.bf16 %v2342_v34, %v2338_v12  ;;  %v2363_v12 = vld [vmem:[%s8544_s4 + $0x150] sm:$0xff]  ;;  %v2374_v30 = vld [vmem:[%s8544_s4 + $0x1a8] sm:$0xff] }
 0x70c   :  { %v4737_v63 = vmul.f32 -1.442695, %v5952_v46  ;;  %v4738_v23 = vmul.f32 -1.442695, %v5968_v7  ;;  %v2343_v46 = vld [vmem:[%s8544_s4 + $0xb0] sm:$0xff]  ;;  %v2348_v7 = vld [vmem:[%s8544_s4 + $0xd8] sm:$0xff] }
 0x70d   :  { %6166 = vpow2.f32 %v4736_v0  ;;  %v2346_v0 = vld [vmem:[%s8544_s4 + $0xc8] sm:$0xff]  ;;  %v2367_v34 = vld [vmem:[%s8544_s4 + $0x170] sm:$0xff] }
 0x70e   :  { %6168 = vpow2.f32 %v4737_v63  ;;  %v2350_v63 = vld [vmem:[%s8544_s4 + $0xe8] sm:$0xff] }
 0x70f   :  { %6170 = vpow2.f32 %v4738_v23  ;;  %v2352_v23 = vld [vmem:[%s8544_s4 + $0xf8] sm:$0xff] }
 0x710   :  { %6172 = vtanh.f32 %v5967_v44  ;;  %v5349_v44 = vpack.c.bf16 %v2341_v61, %v2337_v50  ;;  %v5393_v61 = vpack.c.bf16 %v2367_v34, %v2363_v12  ;;  %v2693_v12 = vld [vmem:[%s8545_s5 + $0xa8] sm:$0xff]  ;;  %v2691_v34 = vld [vmem:[%s8545_s5 + $0x98] sm:$0xff] }
 0x717   :  { %v6167_v51 = vpop.eup %6166 }
 0x718   :  { %v6169_v58 = vpop.eup %6168  ;;  %v2042_v15 = vadd.f32 1.0, %v6167_v51  ;;  %v5381_v51 = vpack.c.bf16 %v2343_v46, %v2339_v33  ;;  %v5363_v33 = vpack.c.bf16 %v2374_v30, %v2370_v20  ;;  %v2695_v30 = vld [vmem:[%s8545_s5 + $0xb8] sm:$0xff] }
 0x719   :  { %v2048_v19 = vadd.f32 1.0, %v6169_v58  ;;  %v6171_v52 = vpop.eup %6170  ;;  %v2345_v58 = vld [vmem:[%s8544_s4 + $0xc0] sm:$0xff] }
 0x71a   :  { %6174 = vrcp.f32 %v2042_v15  ;;  %v6173_v57 = vpop.eup %6172  ;;  %v2055_v49 = vadd.f32 1.0, %v6171_v52  ;;  %v2349_v15 = vld [vmem:[%s8544_s4 + $0xe0] sm:$0xff]  ;;  %v5383_v52 = vpack.c.bf16 %v2352_v23, %v2348_v7  ;;  %v2378_v7 = vld [vmem:[%s8544_s4 + $0x1c8] sm:$0xff] }
 0x71b   :  { %6176 = vrcp.f32 %v2048_v19  ;;  %v5351_v19 = vpack.c.bf16 %v2350_v63, %v2346_v0  ;;  %v5353_v43 = vpack.c.bf16 %v2349_v15, %v2345_v58  ;;  %v2371_v0 = vld [vmem:[%s8544_s4 + $0x190] sm:$0xff]  ;;  %v2382_v23 = vld [vmem:[%s8544_s4 + $0x1e8] sm:$0xff] }
 0x71c   :  { %6178 = vrcp.f32 %v2055_v49  ;;  %v2356_v49 = vld [vmem:[%s8544_s4 + $0x118] sm:$0xff]  ;;  %v2375_v63 = vld [vmem:[%s8544_s4 + $0x1b0] sm:$0xff] }
 0x71d   :  { %v5397_v15 = vpack.c.bf16 %v2375_v63, %v2371_v0  ;;  %v2701_v0 = vld [vmem:[%s8545_s5 + $0xe8] sm:$0xff]  ;;  %v2699_v63 = vld [vmem:[%s8545_s5 + $0xd8] sm:$0xff] }
 0x724   :  { %v6175_v59 = vpop.eup %6174 }
 0x725   :  { %v6177_v37 = vpop.eup %6176  ;;  %v2060_v48 = vmul.f32 %v6175_v59, %v6173_v57  ;;  %v2347_v57 = vld [vmem:[%s8544_s4 + $0xd0] sm:$0xff] }
 0x726   :  { %v2059_v55 = vmul.f32 %v6177_v37, %v7300_v54  ;;  %v2327_v54 = vld [vmem:[%s8544_s4 + $0x30] sm:$0xff]  ;;  %v6179_v29 = vpop.eup %6178  ;;  %v2354_v37 = vld [vmem:[%s8544_s4 + $0x108] sm:$0xff] }
 0x727   :  { %v5373_v25 = vpack.c.bf16 %v2327_v54, %v2323_v60  ;;  %v2351_v59 = vld [vmem:[%s8544_s4 + $0xf0] sm:$0xff]  ;;  %v2353_v60 = vld [vmem:[%s8544_s4 + $0x100] sm:$0xff] }
 0x728   :  { %v7398_v31 = vadd.f32 %v2060_v48, %v2059_v55  ;;  %v2358_v48 = vld [vmem:[%s8544_s4 + $0x128] sm:$0xff]  ;;  %v2360_v55 = vld [vmem:[%s8544_s4 + $0x138] sm:$0xff]  ;;  %v5385_v56 = vpack.c.bf16 %v2351_v59, %v2347_v57  ;;  %v2357_v54 = vld [vmem:[%s8544_s4 + $0x120] sm:$0xff] }
 0x729   :  { %v5355_v6 = vpack.c.bf16 %v2358_v48, %v2354_v37  ;;  %v5387_v22 = vpack.c.bf16 %v2360_v55, %v2356_v49  ;;  %v5357_v53 = vpack.c.bf16 %v2357_v54, %v2353_v60  ;;  %v2381_v59 = vld [vmem:[%s8544_s4 + $0x1e0] sm:$0xff]  ;;  %v2379_v37 = vld [vmem:[%s8544_s4 + $0x1d0] sm:$0xff] }
 0x72a   :  { %6180 = vtanh.f32 %v7398_v31  ;;  %v2383_v48 = vld [vmem:[%s8544_s4 + $0x1f0] sm:$0xff] }
 0x72b   :  { %v5401_v55 = vpack.c.bf16 %v2383_v48, %v2379_v37  ;;  %v2674_v60 = vld [vmem:[%s8545_s5 + $0x10] sm:$0xff]  ;;  %v2709_v37 = vld [vmem:[%s8545_s5 + $0x128] sm:$0xff]  ;;  %v2707_v48 = vld [vmem:[%s8545_s5 + $0x118] sm:$0xff] }
 0x72c   :  { %v2678_v54 = vld [vmem:[%s8545_s5 + $0x30] sm:$0xff] }
 0x734   :  { %v6181_v27 = vpop.eup %6180 }
 0x735   :  { %v7431_v1 = vmul.f32 %v6181_v27, %v6179_v29  ;;  %v2362_v29 = vld [vmem:[%s8544_s4 + $0x148] sm:$0xff] }
 0x736   :  { %v2366_v27 = vld [vmem:[%s8544_s4 + $0x168] sm:$0xff] }
 0x737   :  { %2203 = vmatmul.mubr.f32.vlgmr.msra.gmra.mrb[14].mxu0 %v7431_v1  ;;  %2274 = vmatmul.mubr.f32.vlgmr.msra.gmra.mrb[14].mxu1 %v7431_v1  ;;  %v5359_v38 = vpack.c.bf16 %v2366_v27, %v2362_v29  ;;  %v2687_v27 = vld [vmem:[%s8545_s5 + $0x78] sm:$0xff] }
 0x738   :  { %5342 = vmatpush1.bf16.msra.mxu0 %v5341_v41  ;;  %5374 = vmatpush1.bf16.msra.mxu1 %v5373_v25  ;;  %v2364_v41 = vld [vmem:[%s8544_s4 + $0x158] sm:$0xff] }
 0x739   :  { %5344 = vmatprep.subr.bf16.mxu0 %v5343_v5  ;;  %5376 = vmatprep.subr.bf16.mxu1 %v5375_v24  ;;  %v2368_v25 = vld [vmem:[%s8544_s4 + $0x178] sm:$0xff]  ;;  %v2361_v5 = vld [vmem:[%s8544_s4 + $0x140] sm:$0xff] }
 0x73a   :  { %2471 = vmatprep.mubr.f32.mxu0 %v6326_v3  ;;  %2584 = vmatprep.mubr.f32.mxu1 %v6326_v3  ;;  %v2365_v24 = vld [vmem:[%s8544_s4 + $0x160] sm:$0xff]  ;;  %v5391_v8 = vpack.c.bf16 %v2368_v25, %v2364_v41 }
 0x73b   :  { %v5361_v50 = vpack.c.bf16 %v2365_v24, %v2361_v5  ;;  %v2680_v41 = vld [vmem:[%s8545_s5 + $0x40] sm:$0xff]  ;;  %v2682_v5 = vld [vmem:[%s8545_s5 + $0x50] sm:$0xff] }
 0x73c   :  { %5346 = vmatpush1.bf16.msra.mxu0 %v5345_v45  ;;  %5378 = vmatpush1.bf16.msra.mxu1 %v5377_v47  ;;  %v2372_v45 = vld [vmem:[%s8544_s4 + $0x198] sm:$0xff]  ;;  %v2684_v25 = vld [vmem:[%s8545_s5 + $0x60] sm:$0xff]  ;;  %v2686_v24 = vld [vmem:[%s8545_s5 + $0x70] sm:$0xff] }
 0x73d   :  { %5348 = vmatprep.subr.bf16.mxu0 %v5347_v11  ;;  %5380 = vmatprep.subr.bf16.mxu1 %v5379_v28  ;;  %v2376_v47 = vld [vmem:[%s8544_s4 + $0x1b8] sm:$0xff]  ;;  %v2369_v11 = vld [vmem:[%s8544_s4 + $0x180] sm:$0xff] }
 0x73e   :  { %v2373_v28 = vld [vmem:[%s8544_s4 + $0x1a0] sm:$0xff]  ;;  %v5395_v46 = vpack.c.bf16 %v2376_v47, %v2372_v45 }
 0x73f   :  { %v5365_v58 = vpack.c.bf16 %v2373_v28, %v2369_v11  ;;  %v2688_v45 = vld [vmem:[%s8545_s5 + $0x80] sm:$0xff]  ;;  %v2690_v11 = vld [vmem:[%s8545_s5 + $0x90] sm:$0xff] }
 0x740   :  { %5350 = vmatpush1.bf16.msra.mxu0 %v5349_v44  ;;  %5382 = vmatpush1.bf16.msra.mxu1 %v5381_v51  ;;  %v2380_v44 = vld [vmem:[%s8544_s4 + $0x1d8] sm:$0xff]  ;;  %v2692_v47 = vld [vmem:[%s8545_s5 + $0xa0] sm:$0xff]  ;;  %v2694_v28 = vld [vmem:[%s8545_s5 + $0xb0] sm:$0xff] }
 0x741   :  { %5352 = vmatprep.subr.bf16.mxu0 %v5351_v19  ;;  %5384 = vmatprep.subr.bf16.mxu1 %v5383_v52  ;;  %v2384_v51 = vld [vmem:[%s8544_s4 + $0x1f8] sm:$0xff]  ;;  %v2377_v19 = vld [vmem:[%s8544_s4 + $0x1c0] sm:$0xff]  ;;  %v5367_v52 = vpack.c.bf16 %v2382_v23, %v2378_v7 }
 0x742   :  { %v5399_v57 = vpack.c.bf16 %v2384_v51, %v2380_v44  ;;  %v5369_v49 = vpack.c.bf16 %v2381_v59, %v2377_v19  ;;  %v2703_v23 = vld [vmem:[%s8545_s5 + $0xf8] sm:$0xff]  ;;  %v2696_v44 = vld [vmem:[%s8545_s5 + $0xc0] sm:$0xff]  ;;  %v2698_v19 = vld [vmem:[%s8545_s5 + $0xd0] sm:$0xff] }
 0x743   :  { %v2700_v51 = vld [vmem:[%s8545_s5 + $0xe0] sm:$0xff] }
 0x744   :  { %5354 = vmatpush1.bf16.msra.mxu0 %v5353_v43  ;;  %5386 = vmatpush1.bf16.msra.mxu1 %v5385_v56 }
 0x745   :  { %5356 = vmatprep.subr.bf16.mxu0 %v5355_v6  ;;  %5388 = vmatprep.subr.bf16.mxu1 %v5387_v22  ;;  %v7646_v6 = vpack.c.bf16 %v2678_v54, %v2674_v60  ;;  %v2681_v22 = vld [vmem:[%s8545_s5 + $0x48] sm:$0xff] }
 0x746   :  { %v7660_v29 = vpack.c.bf16 %v2685_v21, %v2681_v22  ;;  %v2713_v60 = vld [vmem:[%s8545_s5 + $0x148] sm:$0xff] }
 0x747   :  { %v2717_v54 = vld [vmem:[%s8545_s5 + $0x168] sm:$0xff] }
 0x748   :  { %5358 = vmatpush1.bf16.msra.mxu0 %v5357_v53  ;;  %5390 = vmatpush1.bf16.msra.mxu1 %v5389_v4  ;;  %v7671_v53 = vpack.c.bf16 %v2687_v27, %v2683_v35  ;;  %v7673_v4 = vpack.c.bf16 %v2684_v25, %v2680_v41  ;;  %v7799_v21 = vpack.c.bf16 %v2717_v54, %v2713_v60  ;;  %v2715_v35 = vld [vmem:[%s8545_s5 + $0x158] sm:$0xff]  ;;  %v2712_v41 = vld [vmem:[%s8545_s5 + $0x140] sm:$0xff]  ;;  %v2730_v60 = vld [vmem:[%s8545_s5 + $0x1d0] sm:$0xff] }
 0x749   :  { %5360 = vmatprep.subr.bf16.mxu0 %v5359_v38  ;;  %5392 = vmatprep.subr.bf16.mxu1 %v5391_v8  ;;  %v7682_v38 = vpack.c.bf16 %v2686_v24, %v2682_v5  ;;  %v2689_v8 = vld [vmem:[%s8545_s5 + $0x88] sm:$0xff]  ;;  %v2719_v27 = vld [vmem:[%s8545_s5 + $0x178] sm:$0xff]  ;;  %v2716_v5 = vld [vmem:[%s8545_s5 + $0x160] sm:$0xff] }
 0x74a   :  { %v7696_v20 = vpack.c.bf16 %v2693_v12, %v2689_v8  ;;  %v7810_v25 = vpack.c.bf16 %v2719_v27, %v2715_v35  ;;  %v2714_v24 = vld [vmem:[%s8545_s5 + $0x150] sm:$0xff]  ;;  %v7822_v12 = vpack.c.bf16 %v2716_v5, %v2712_v41 }
 0x74b   :  { %v2718_v8 = vld [vmem:[%s8545_s5 + $0x170] sm:$0xff] }
 0x74c   :  { %5362 = vmatpush1.bf16.msra.mxu0 %v5361_v50  ;;  %5394 = vmatpush1.bf16.msra.mxu1 %v5393_v61  ;;  %v7707_v50 = vpack.c.bf16 %v2695_v30, %v2691_v34  ;;  %v7709_v61 = vpack.c.bf16 %v2692_v47, %v2688_v45  ;;  %v2721_v34 = vld [vmem:[%s8545_s5 + $0x188] sm:$0xff]  ;;  %v2723_v45 = vld [vmem:[%s8545_s5 + $0x198] sm:$0xff]  ;;  %v7835_v47 = vpack.c.bf16 %v2718_v8, %v2714_v24  ;;  %v2734_v54 = vld [vmem:[%s8545_s5 + $0x1f0] sm:$0xff] }
 0x74d   :  { %5364 = vmatprep.subr.bf16.mxu0 %v5363_v33  ;;  %5396 = vmatprep.subr.bf16.mxu1 %v5395_v46  ;;  %v7718_v33 = vpack.c.bf16 %v2694_v28, %v2690_v11  ;;  %v2697_v46 = vld [vmem:[%s8545_s5 + $0xc8] sm:$0xff]  ;;  %v2727_v28 = vld [vmem:[%s8545_s5 + $0x1b8] sm:$0xff]  ;;  %v7898_v35 = vpack.c.bf16 %v2734_v54, %v2730_v60 }
 0x74e   :  { %v7732_v7 = vpack.c.bf16 %v2701_v0, %v2697_v46  ;;  %v2725_v30 = vld [vmem:[%s8545_s5 + $0x1a8] sm:$0xff]  ;;  %v2720_v46 = vld [vmem:[%s8545_s5 + $0x180] sm:$0xff] }
 0x74f   :  { %v7837_v11 = vpack.c.bf16 %v2725_v30, %v2721_v34  ;;  %v2724_v0 = vld [vmem:[%s8545_s5 + $0x1a0] sm:$0xff] }
 0x750   :  { %5366 = vmatpush1.bf16.msra.mxu0 %v5365_v58  ;;  %5398 = vmatpush1.bf16.msra.mxu1 %v5397_v15  ;;  %v7743_v58 = vpack.c.bf16 %v2703_v23, %v2699_v63  ;;  %v7745_v15 = vpack.c.bf16 %v2700_v51, %v2696_v44  ;;  %v7849_v63 = vpack.c.bf16 %v2727_v28, %v2723_v45  ;;  %v2722_v23 = vld [vmem:[%s8545_s5 + $0x190] sm:$0xff] }
 0x751   :  { %5368 = vmatprep.subr.bf16.mxu0 %v5367_v52  ;;  %5400 = vmatprep.subr.bf16.mxu1 %v5399_v57  ;;  %v2702_v52 = vld [vmem:[%s8545_s5 + $0xf0] sm:$0xff]  ;;  %v2705_v57 = vld [vmem:[%s8545_s5 + $0x108] sm:$0xff]  ;;  %v7858_v51 = vpack.c.bf16 %v2724_v0, %v2720_v46 }
 0x752   :  { %v7757_v59 = vpack.c.bf16 %v2702_v52, %v2698_v19  ;;  %v2726_v44 = vld [vmem:[%s8545_s5 + $0x1b0] sm:$0xff]  ;;  %v2729_v52 = vld [vmem:[%s8545_s5 + $0x1c8] sm:$0xff] }
 0x753   :  { %v7862_v19 = vpack.c.bf16 %v2726_v44, %v2722_v23 }
 0x754   :  { %5370 = vmatpush1.bf16.msra.mxu0 %v5369_v49  ;;  %5402 = vmatpush1.bf16.msra.mxu1 %v5401_v55  ;;  %v2711_v49 = vld [vmem:[%s8545_s5 + $0x138] sm:$0xff]  ;;  %v7770_v55 = vpack.c.bf16 %v2709_v37, %v2705_v57  ;;  %v2733_v57 = vld [vmem:[%s8545_s5 + $0x1e8] sm:$0xff] }
 0x755   :  { %v2731_v37 = vld [vmem:[%s8545_s5 + $0x1d8] sm:$0xff] }
 0x757   :  { %2472 = vmatmul.mubr.f32.vlgmr.msra.gmra.mrb[16].mxu0 %v6819_v18  ;;  %2585 = vmatmul.mubr.f32.vlgmr.msra.gmra.mrb[16].mxu1 %v6819_v18  ;;  %v2673_v18 = vld [vmem:[%s8545_s5 + $0x8] sm:$0xff] }
 0x758   :  { %2477 = vmatprep.mubr.f32.mxu0 %v6326_v3  ;;  %2590 = vmatprep.mubr.f32.mxu1 %v6326_v3 }
 0x75b   :  { %2478 = vmatmul.mubr.f32.gmra.mrb[18].mxu0 %v6863_v2  ;;  %2591 = vmatmul.mubr.f32.gmra.mrb[18].mxu1 %v6863_v2  ;;  %v2677_v2 = vld [vmem:[%s8545_s5 + $0x28] sm:$0xff] }
 0x75c   :  { %2483 = vmatprep.mubr.f32.mxu0 %v6326_v3  ;;  %2596 = vmatprep.mubr.f32.mxu1 %v6326_v3 }
 0x75f   :  { %2484 = vmatmul.mubr.f32.gmra.mrb[20].mxu0 %v6975_v62  ;;  %2597 = vmatmul.mubr.f32.gmra.mrb[20].mxu1 %v6975_v62  ;;  %v2675_v62 = vld [vmem:[%s8545_s5 + $0x18] sm:$0xff] }
 0x760   :  { %2489 = vmatprep.mubr.f32.mxu0 %v6326_v3  ;;  %2602 = vmatprep.mubr.f32.mxu1 %v6326_v3 }
 0x763   :  { %2490 = vmatmul.mubr.f32.gmra.mrb[22].mxu0 %v7213_v42  ;;  %2603 = vmatmul.mubr.f32.gmra.mrb[22].mxu1 %v7213_v42  ;;  %v7624_v42 = vpack.c.bf16 %v2677_v2, %v2673_v18  ;;  %v7772_v18 = vpack.c.bf16 %v2711_v49, %v2707_v48  ;;  %v2704_v2 = vld [vmem:[%s8545_s5 + $0x100] sm:$0xff]  ;;  %v7876_v48 = vpack.c.bf16 %v2733_v57, %v2729_v52  ;;  %v2735_v49 = vld [vmem:[%s8545_s5 + $0x1f8] sm:$0xff] }
 0x764   :  { %2495 = vmatprep.mubr.f32.mxu0 %v6326_v3  ;;  %2608 = vmatprep.mubr.f32.mxu1 %v6326_v3 }
 0x765   :  { %5404 = vmatprep.subr.bf16.mxu0 %v7624_v42 }
 0x767   :  { %2496 = vmatmul.mubr.f32.gmra.mrb[24].mxu0 %v7259_v39  ;;  %2609 = vmatmul.mubr.f32.gmra.mrb[24].mxu1 %v7259_v39  ;;  %v2679_v39 = vld [vmem:[%s8545_s5 + $0x38] sm:$0xff] }
 0x768   :  { %2501 = vmatprep.mubr.f32.mxu0 %v6326_v3  ;;  %2614 = vmatprep.mubr.f32.mxu1 %v6326_v3  ;;  %v7635_v43 = vpack.c.bf16 %v2679_v39, %v2675_v62  ;;  %v2708_v62 = vld [vmem:[%s8545_s5 + $0x120] sm:$0xff]  ;;  %v2706_v39 = vld [vmem:[%s8545_s5 + $0x110] sm:$0xff] }
 0x76a   :  { %5436 = vmatprep.subr.bf16.mxu1 %v7635_v43 }
 0x76b   :  { %2502 = vmatmul.mubr.f32.gmra.mrb[26].mxu0 %v7303_v26  ;;  %2615 = vmatmul.mubr.f32.gmra.mrb[26].mxu1 %v7303_v26  ;;  %v2672_v26 = vld [vmem:[%s8545_s5] sm:$0xff] }
 0x76c   :  { %2507 = vmatprep.mubr.f32.mxu0 %v6326_v3  ;;  %2620 = vmatprep.mubr.f32.mxu1 %v6326_v3 }
 0x76d   :  { %5438 = vmatpush1.bf16.msra.mxu1 %v7646_v6 }
 0x76e   :  { %5440 = vmatprep.subr.bf16.mxu1 %v7671_v53 }
 0x76f   :  { %2508 = vmatmul.mubr.f32.gmra.mrb[28].mxu0 %v7431_v1  ;;  %2621 = vmatmul.mubr.f32.gmra.mrb[28].mxu1 %v7431_v1  ;;  %v2676_v1 = vld [vmem:[%s8545_s5 + $0x20] sm:$0xff] }
 0x770   :  { %2513 = vmatprep.mubr.f32.mxu0 %v6326_v3  ;;  %2626 = vmatprep.mubr.f32.mxu1 %v6326_v3  ;;  %v7637_v56 = vpack.c.bf16 %v2676_v1, %v2672_v26  ;;  %v7784_v26 = vpack.c.bf16 %v2708_v62, %v2704_v2  ;;  %v2710_v1 = vld [vmem:[%s8545_s5 + $0x130] sm:$0xff]  ;;  %v2728_v2 = vld [vmem:[%s8545_s5 + $0x1c0] sm:$0xff] }
 0x771   :  { %5442 = vmatpush1.bf16.msra.mxu1 %v7682_v38  ;;  %v7797_v22 = vpack.c.bf16 %v2710_v1, %v2706_v39  ;;  %v2732_v62 = vld [vmem:[%s8545_s5 + $0x1e0] sm:$0xff]  ;;  %v7887_v39 = vpack.c.bf16 %v2735_v49, %v2731_v37 }
 0x772   :  { %5406 = vmatpush1.bf16.msra.mxu0 %v7637_v56  ;;  %5444 = vmatprep.subr.bf16.mxu1 %v7707_v50  ;;  %v7889_v1 = vpack.c.bf16 %v2732_v62, %v2728_v2 }
 0x773   :  { %5408 = vmatprep.subr.bf16.mxu0 %v7660_v29 }
 0x775   :  { %5446 = vmatpush1.bf16.msra.mxu1 %v7718_v33 }
 0x776   :  { %5410 = vmatpush1.bf16.msra.mxu0 %v7673_v4  ;;  %5448 = vmatprep.subr.bf16.mxu1 %v7743_v58 }
 0x777   :  { %5412 = vmatprep.subr.bf16.mxu0 %v7696_v20 }
 0x779   :  { %5450 = vmatpush1.bf16.msra.mxu1 %v7757_v59 }
 0x77a   :  { %5414 = vmatpush1.bf16.msra.mxu0 %v7709_v61  ;;  %5452 = vmatprep.subr.bf16.mxu1 %v7772_v18 }
 0x77b   :  { %5416 = vmatprep.subr.bf16.mxu0 %v7732_v7 }
 0x77d   :  { %5454 = vmatpush1.bf16.msra.mxu1 %v7797_v22 }
 0x77e   :  { %5418 = vmatpush1.bf16.msra.mxu0 %v7745_v15  ;;  %5456 = vmatprep.subr.bf16.mxu1 %v7810_v25 }
 0x77f   :  { %5420 = vmatprep.subr.bf16.mxu0 %v7770_v55 }
 0x781   :  { %5458 = vmatpush1.bf16.msra.mxu1 %v7835_v47 }
 0x782   :  { %5422 = vmatpush1.bf16.msra.mxu0 %v7784_v26  ;;  %5460 = vmatprep.subr.bf16.mxu1 %v7849_v63 }
 0x783   :  { %5424 = vmatprep.subr.bf16.mxu0 %v7799_v21 }
 0x785   :  { %5462 = vmatpush1.bf16.msra.mxu1 %v7862_v19 }
 0x786   :  { %5426 = vmatpush1.bf16.msra.mxu0 %v7822_v12  ;;  %5464 = vmatprep.subr.bf16.mxu1 %v7887_v39 }
 0x787   :  { %5428 = vmatprep.subr.bf16.mxu0 %v7837_v11 }
 0x789   :  { %5466 = vmatpush1.bf16.msra.mxu1 %v7898_v35 }
 0x78a   :  { %5430 = vmatpush1.bf16.msra.mxu0 %v7858_v51  ;;  %5500 = vmatprep.subr.bf16.mxu1 %v7635_v43 }
 0x78b   :  { %5432 = vmatprep.subr.bf16.mxu0 %v7876_v48 }
 0x78e   :  { %5434 = vmatpush1.bf16.msra.mxu0 %v7889_v1 }
 0x78f   :  { %5468 = vmatprep.subr.bf16.mxu0 %v7624_v42 }
 0x80a   :  { %v2204_v27 = vpop.f32.mrb[14].mxu0  ;;  %v2275_v41 = vpop.f32.mrb[14].mxu1 }
 0x80b   :  { %v5953_v5 = vadd.f32 %v2204_v27, %v6796_v14  ;;  %v2206_v24 = vpop.f32.mrb[15].mxu0  ;;  %v2277_v8 = vpop.f32.mrb[15].mxu1  ;;  %v5969_v0 = vadd.f32 %v2275_v41, %v6813_v40 }
 0x80c   :  { %v5954_v34 = vadd.f32 %v2206_v24, %v6800_v17  ;;  %v5970_v28 = vadd.f32 %v2277_v8, %v6807_v32 }
 0x80d   :  { %v4739_v30 = vmul.f32 -1.442695, %v5953_v5 }
 0x80e   :  { %v4740_v45 = vmul.f32 -1.442695, %v5954_v34  ;;  %v4741_v46 = vmul.f32 -1.442695, %v5970_v28 }
 0x80f   :  { %6182 = vpow2.f32 %v4739_v30 }
 0x810   :  { %6184 = vpow2.f32 %v4740_v45 }
 0x811   :  { %6186 = vpow2.f32 %v4741_v46 }
 0x812   :  { %6188 = vtanh.f32 %v5969_v0 }
 0x819   :  { %v6183_v23 = vpop.eup %6182 }
 0x81a   :  { %v6185_v44 = vpop.eup %6184  ;;  %v2287_v52 = vadd.f32 1.0, %v6183_v23 }
 0x81b   :  { %v2293_v57 = vadd.f32 1.0, %v6185_v44  ;;  %v6187_v14 = vpop.eup %6186 }
 0x81c   :  { %6190 = vrcp.f32 %v2287_v52  ;;  %v6189_v37 = vpop.eup %6188  ;;  %v2300_v62 = vadd.f32 1.0, %v6187_v14 }
 0x81d   :  { %6192 = vrcp.f32 %v2293_v57 }
 0x81e   :  { %6194 = vrcp.f32 %v2300_v62 }
 0x826   :  { %v6191_v17 = vpop.eup %6190 }
 0x827   :  { %v6193_v49 = vpop.eup %6192  ;;  %v2305_v2 = vmul.f32 %v6191_v17, %v6189_v37 }
 0x828   :  { %v2304_v60 = vmul.f32 %v6193_v49, %v7398_v31  ;;  %v6195_v40 = vpop.eup %6194  ;;  %v2385_v31 = vld [vmem:[%s8546_s6] sm:$0xf] }
 0x829   :  { %v7953_v41 = vrot.slane %v2385_v31, %v52_v10  ;;  %v7957_v5 = vrot.slane %v2385_v31, %v56_v13  ;;  %v7963_v23 = vrot.slane %v2385_v31, %v64_v16  ;;  %v7968_v13 = vrot.slane %v2385_v31, %v60_v36 }
 0x82a   :  { %v2306_v32 = vadd.f32 %v2305_v2, %v2304_v60 }
 0x82c   :  { %6196 = vtanh.f32 %v2306_v32 }
 0x836   :  { %v6197_v54 = vpop.eup %6196 }
 0x837   :  { %v2308_v27 = vmul.f32 %v6197_v54, %v6195_v40 }
 0x839   :  { %2514 = vmatmul.mubr.f32.gmra.mrb[30].mxu0 %v2308_v27  ;;  %2627 = vmatmul.mubr.f32.gmra.mrb[30].mxu1 %v2308_v27 }
 0x83a   :  { %2800 = vmatprep.mubr.f32.mxu0 %v6326_v3  ;;  %2871 = vmatprep.mubr.f32.mxu1 %v6326_v3 }
 0x83d   :  { %2801 = vmatmul.mubr.f32.vlgmr.msra.gmra.mrb[16].mxu0 %v6326_v3  ;;  %2872 = vmatmul.mubr.f32.vlgmr.msra.gmra.mrb[16].mxu1 %v6326_v3 }
 0x83e   :  { %5470 = vmatpush1.bf16.msra.mxu0 %v7637_v56  ;;  %5502 = vmatpush1.bf16.msra.mxu1 %v7646_v6 }
 0x83f   :  { %5472 = vmatprep.subr.bf16.mxu0 %v7660_v29  ;;  %5504 = vmatprep.subr.bf16.mxu1 %v7671_v53 }
 0x840   :  { %3042 = vmatprep.mubr.f32.mxu0 %v6326_v3  ;;  %3113 = vmatprep.mubr.f32.mxu1 %v6326_v3 }
 0x842   :  { %5474 = vmatpush1.bf16.msra.mxu0 %v7673_v4  ;;  %5506 = vmatpush1.bf16.msra.mxu1 %v7682_v38 }
 0x843   :  { %5476 = vmatprep.subr.bf16.mxu0 %v7696_v20  ;;  %5508 = vmatprep.subr.bf16.mxu1 %v7707_v50 }
 0x846   :  { %5478 = vmatpush1.bf16.msra.mxu0 %v7709_v61  ;;  %5510 = vmatpush1.bf16.msra.mxu1 %v7718_v33 }
 0x847   :  { %5480 = vmatprep.subr.bf16.mxu0 %v7732_v7  ;;  %5512 = vmatprep.subr.bf16.mxu1 %v7743_v58 }
 0x84a   :  { %5482 = vmatpush1.bf16.msra.mxu0 %v7745_v15  ;;  %5514 = vmatpush1.bf16.msra.mxu1 %v7757_v59 }
 0x84b   :  { %5484 = vmatprep.subr.bf16.mxu0 %v7770_v55  ;;  %5516 = vmatprep.subr.bf16.mxu1 %v7772_v18 }
 0x84e   :  { %5486 = vmatpush1.bf16.msra.mxu0 %v7784_v26  ;;  %5518 = vmatpush1.bf16.msra.mxu1 %v7797_v22 }
 0x84f   :  { %5488 = vmatprep.subr.bf16.mxu0 %v7799_v21  ;;  %5520 = vmatprep.subr.bf16.mxu1 %v7810_v25 }
 0x852   :  { %5490 = vmatpush1.bf16.msra.mxu0 %v7822_v12  ;;  %5522 = vmatpush1.bf16.msra.mxu1 %v7835_v47 }
 0x853   :  { %5492 = vmatprep.subr.bf16.mxu0 %v7837_v11  ;;  %5524 = vmatprep.subr.bf16.mxu1 %v7849_v63 }
 0x856   :  { %5494 = vmatpush1.bf16.msra.mxu0 %v7858_v51  ;;  %5526 = vmatpush1.bf16.msra.mxu1 %v7862_v19 }
 0x857   :  { %5496 = vmatprep.subr.bf16.mxu0 %v7876_v48  ;;  %5528 = vmatprep.subr.bf16.mxu1 %v7887_v39 }
 0x85a   :  { %5498 = vmatpush1.bf16.msra.mxu0 %v7889_v1  ;;  %5530 = vmatpush1.bf16.msra.mxu1 %v7898_v35 }
 0x85b   :  { %5532 = vmatprep.subr.bf16.mxu0 %v7624_v42  ;;  %5564 = vmatprep.subr.bf16.mxu1 %v7635_v43 }
 0x910   :  { %v2802_v24 = vpop.f32.mrb[16].mxu0  ;;  %v2873_v8 = vpop.f32.mrb[16].mxu1 }
 0x911   :  { %v5971_v34 = vadd.f32 %v2802_v24, %v7953_v41  ;;  %v2804_v30 = vpop.f32.mrb[17].mxu0  ;;  %v2875_v45 = vpop.f32.mrb[17].mxu1  ;;  %v5987_v52 = vadd.f32 %v2873_v8, %v7968_v13 }
 0x912   :  { %v5972_v28 = vadd.f32 %v2804_v30, %v7957_v5  ;;  %v5988_v10 = vadd.f32 %v2875_v45, %v7963_v23 }
 0x913   :  { %v4742_v46 = vmul.f32 -1.442695, %v5971_v34 }
 0x914   :  { %v4743_v0 = vmul.f32 -1.442695, %v5972_v28  ;;  %v4744_v44 = vmul.f32 -1.442695, %v5988_v10 }
 0x915   :  { %6198 = vpow2.f32 %v4742_v46 }
 0x916   :  { %6200 = vpow2.f32 %v4743_v0 }
 0x917   :  { %6202 = vpow2.f32 %v4744_v44 }
 0x918   :  { %6204 = vtanh.f32 %v5987_v52 }
 0x91f   :  { %v6199_v57 = vpop.eup %6198 }
 0x920   :  { %v6201_v14 = vpop.eup %6200  ;;  %v2885_v37 = vadd.f32 1.0, %v6199_v57 }
 0x921   :  { %v2891_v17 = vadd.f32 1.0, %v6201_v14  ;;  %v6203_v16 = vpop.eup %6202 }
 0x922   :  { %6206 = vrcp.f32 %v2885_v37  ;;  %v6205_v49 = vpop.eup %6204  ;;  %v2898_v32 = vadd.f32 1.0, %v6203_v16 }
 0x923   :  { %6208 = vrcp.f32 %v2891_v17 }
 0x924   :  { %6210 = vrcp.f32 %v2898_v32 }
 0x92c   :  { %v6207_v2 = vpop.eup %6206 }
 0x92d   :  { %v6209_v62 = vpop.eup %6208  ;;  %v2903_v60 = vmul.f32 %v6207_v2, %v6205_v49 }
 0x92e   :  { %v2902_v9 = vmul.f32 0.0, %v6209_v62  ;;  %v6211_v40 = vpop.eup %6210 }
 0x930   :  { %v7971_v36 = vadd.f32 %v2903_v60, %v2902_v9 }
 0x932   :  { %6212 = vtanh.f32 %v7971_v36 }
 0x93c   :  { %v6213_v54 = vpop.eup %6212 }
 0x93d   :  { %v2906_v27 = vmul.f32 %v6213_v54, %v6211_v40  ;;  %v3640_v54 = vld [vmem:[%s8545_s5] sm:$0xff] }
 0x93f   :  { %3043 = vmatmul.mubr.f32.vlgmr.msra.gmra.mrb[18].mxu0 %v2906_v27  ;;  %3114 = vmatmul.mubr.f32.vlgmr.msra.gmra.mrb[18].mxu1 %v2906_v27  ;;  %v3644_v27 = vld [vmem:[%s8545_s5 + $0x20] sm:$0xff] }
 0x940   :  { %5534 = vmatpush1.bf16.msra.mxu0 %v7637_v56  ;;  %5566 = vmatpush1.bf16.msra.mxu1 %v7646_v6 }
 0x941   :  { %5536 = vmatprep.subr.bf16.mxu0 %v7660_v29  ;;  %5568 = vmatprep.subr.bf16.mxu1 %v7671_v53 }
 0x942   :  { %3284 = vmatprep.mubr.f32.mxu0 %v6326_v3  ;;  %3355 = vmatprep.mubr.f32.mxu1 %v6326_v3 }
 0x944   :  { %5538 = vmatpush1.bf16.msra.mxu0 %v7673_v4  ;;  %5570 = vmatpush1.bf16.msra.mxu1 %v7682_v38 }
 0x945   :  { %5540 = vmatprep.subr.bf16.mxu0 %v7696_v20  ;;  %5572 = vmatprep.subr.bf16.mxu1 %v7707_v50 }
 0x948   :  { %5542 = vmatpush1.bf16.msra.mxu0 %v7709_v61  ;;  %5574 = vmatpush1.bf16.msra.mxu1 %v7718_v33 }
 0x949   :  { %5544 = vmatprep.subr.bf16.mxu0 %v7732_v7  ;;  %5576 = vmatprep.subr.bf16.mxu1 %v7743_v58 }
 0x94c   :  { %5546 = vmatpush1.bf16.msra.mxu0 %v7745_v15  ;;  %5578 = vmatpush1.bf16.msra.mxu1 %v7757_v59 }
 0x94d   :  { %5548 = vmatprep.subr.bf16.mxu0 %v7770_v55  ;;  %5580 = vmatprep.subr.bf16.mxu1 %v7772_v18 }
 0x950   :  { %5550 = vmatpush1.bf16.msra.mxu0 %v7784_v26  ;;  %5582 = vmatpush1.bf16.msra.mxu1 %v7797_v22 }
 0x951   :  { %5552 = vmatprep.subr.bf16.mxu0 %v7799_v21  ;;  %5584 = vmatprep.subr.bf16.mxu1 %v7810_v25 }
 0x954   :  { %5554 = vmatpush1.bf16.msra.mxu0 %v7822_v12  ;;  %5586 = vmatpush1.bf16.msra.mxu1 %v7835_v47 }
 0x955   :  { %5556 = vmatprep.subr.bf16.mxu0 %v7837_v11  ;;  %5588 = vmatprep.subr.bf16.mxu1 %v7849_v63 }
 0x958   :  { %5558 = vmatpush1.bf16.msra.mxu0 %v7858_v51  ;;  %5590 = vmatpush1.bf16.msra.mxu1 %v7862_v19 }
 0x959   :  { %5560 = vmatprep.subr.bf16.mxu0 %v7876_v48  ;;  %5592 = vmatprep.subr.bf16.mxu1 %v7887_v39 }
 0x95c   :  { %5562 = vmatpush1.bf16.msra.mxu0 %v7889_v1  ;;  %5594 = vmatpush1.bf16.msra.mxu1 %v7898_v35 }
 0x95d   :  { %5596 = vmatprep.subr.bf16.mxu0 %v7624_v42  ;;  %5628 = vmatprep.subr.bf16.mxu1 %v7635_v43 }
 0xa12   :  { %v3044_v31 = vpop.f32.mrb[18].mxu0  ;;  %v3115_v24 = vpop.f32.mrb[18].mxu1 }
 0xa13   :  { %v5973_v8 = vadd.f32 %v3044_v31, %v7953_v41  ;;  %v3046_v34 = vpop.f32.mrb[19].mxu0  ;;  %v3117_v30 = vpop.f32.mrb[19].mxu1  ;;  %v5989_v44 = vadd.f32 %v3115_v24, %v7968_v13  ;;  %v8080_v24 = vpack.c.bf16 %v3644_v27, %v3640_v54  ;;  %v3683_v54 = vld [vmem:[%s8545_s5 + $0x158] sm:$0xff] }
 0xa14   :  { %v5974_v45 = vadd.f32 %v3046_v34, %v7957_v5  ;;  %v5990_v0 = vadd.f32 %v3117_v30, %v7963_v23  ;;  %v3646_v34 = vld [vmem:[%s8545_s5 + $0x30] sm:$0xff] }
 0xa15   :  { %v4745_v28 = vmul.f32 -1.442695, %v5973_v8  ;;  %v3642_v8 = vld [vmem:[%s8545_s5 + $0x10] sm:$0xff] }
 0xa16   :  { %v4746_v46 = vmul.f32 -1.442695, %v5974_v45  ;;  %v4747_v10 = vmul.f32 -1.442695, %v5990_v0  ;;  %v8089_v30 = vpack.c.bf16 %v3646_v34, %v3642_v8  ;;  %v3649_v45 = vld [vmem:[%s8545_s5 + $0x48] sm:$0xff]  ;;  %v3687_v8 = vld [vmem:[%s8545_s5 + $0x178] sm:$0xff] }
 0xa17   :  { %6214 = vpow2.f32 %v4745_v28  ;;  %v3653_v28 = vld [vmem:[%s8545_s5 + $0x68] sm:$0xff]  ;;  %v3680_v34 = vld [vmem:[%s8545_s5 + $0x140] sm:$0xff] }
 0xa18   :  { %6216 = vpow2.f32 %v4746_v46  ;;  %v3651_v46 = vld [vmem:[%s8545_s5 + $0x58] sm:$0xff]  ;;  %v8103_v0 = vpack.c.bf16 %v3653_v28, %v3649_v45  ;;  %v3684_v45 = vld [vmem:[%s8545_s5 + $0x160] sm:$0xff]  ;;  %v8258_v28 = vpack.c.bf16 %v3687_v8, %v3683_v54 }
 0xa19   :  { %6218 = vpow2.f32 %v4747_v10  ;;  %v3655_v10 = vld [vmem:[%s8545_s5 + $0x78] sm:$0xff] }
 0xa1a   :  { %6220 = vtanh.f32 %v5989_v44  ;;  %v3648_v44 = vld [vmem:[%s8545_s5 + $0x40] sm:$0xff] }
 0xa21   :  { %v6215_v42 = vpop.eup %6214 }
 0xa22   :  { %v6217_v52 = vpop.eup %6216  ;;  %v3127_v43 = vadd.f32 1.0, %v6215_v42  ;;  %v3652_v42 = vld [vmem:[%s8545_s5 + $0x60] sm:$0xff] }
 0xa23   :  { %v3133_v57 = vadd.f32 1.0, %v6217_v52  ;;  %v6219_v14 = vpop.eup %6218  ;;  %v8114_v52 = vpack.c.bf16 %v3655_v10, %v3651_v46  ;;  %v8260_v46 = vpack.c.bf16 %v3684_v45, %v3680_v34  ;;  %v3682_v10 = vld [vmem:[%s8545_s5 + $0x150] sm:$0xff] }
 0xa24   :  { %6222 = vrcp.f32 %v3127_v43  ;;  %v6221_v37 = vpop.eup %6220  ;;  %v3140_v2 = vadd.f32 1.0, %v6219_v14  ;;  %v8116_v43 = vpack.c.bf16 %v3652_v42, %v3648_v44  ;;  %v3654_v14 = vld [vmem:[%s8545_s5 + $0x70] sm:$0xff]  ;;  %v3689_v42 = vld [vmem:[%s8545_s5 + $0x188] sm:$0xff] }
 0xa25   :  { %6224 = vrcp.f32 %v3133_v57  ;;  %v3650_v57 = vld [vmem:[%s8545_s5 + $0x50] sm:$0xff] }
 0xa26   :  { %6226 = vrcp.f32 %v3140_v2  ;;  %v3686_v44 = vld [vmem:[%s8545_s5 + $0x170] sm:$0xff] }
 0xa2e   :  { %v6223_v17 = vpop.eup %6222 }
 0xa2f   :  { %v6225_v16 = vpop.eup %6224  ;;  %v3145_v49 = vmul.f32 %v6223_v17, %v6221_v37  ;;  %v8125_v37 = vpack.c.bf16 %v3654_v14, %v3650_v57  ;;  %v3657_v17 = vld [vmem:[%s8545_s5 + $0x88] sm:$0xff]  ;;  %v8272_v57 = vpack.c.bf16 %v3686_v44, %v3682_v10 }
 0xa30   :  { %v3144_v62 = vmul.f32 %v6225_v16, %v7971_v36  ;;  %v6227_v32 = vpop.eup %6226  ;;  %v3647_v36 = vld [vmem:[%s8545_s5 + $0x38] sm:$0xff]  ;;  %v3661_v16 = vld [vmem:[%s8545_s5 + $0xa8] sm:$0xff] }
 0xa31   :  { %v8139_v2 = vpack.c.bf16 %v3661_v16, %v3657_v17  ;;  %v3693_v14 = vld [vmem:[%s8545_s5 + $0x1a8] sm:$0xff]  ;;  %v3691_v17 = vld [vmem:[%s8545_s5 + $0x198] sm:$0xff] }
 0xa32   :  { %v8013_v60 = vadd.f32 %v3145_v49, %v3144_v62  ;;  %v3659_v49 = vld [vmem:[%s8545_s5 + $0x98] sm:$0xff] }
 0xa33   :  { %v3663_v62 = vld [vmem:[%s8545_s5 + $0xb8] sm:$0xff] }
 0xa34   :  { %6228 = vtanh.f32 %v8013_v60  ;;  %v3695_v16 = vld [vmem:[%s8545_s5 + $0x1b8] sm:$0xff] }
 0xa3e   :  { %v6229_v9 = vpop.eup %6228 }
 0xa3f   :  { %v3148_v40 = vmul.f32 %v6229_v9, %v6227_v32  ;;  %v3660_v32 = vld [vmem:[%s8545_s5 + $0xa0] sm:$0xff]  ;;  %v8150_v9 = vpack.c.bf16 %v3663_v62, %v3659_v49  ;;  %v8284_v49 = vpack.c.bf16 %v3693_v14, %v3689_v42  ;;  %v8286_v62 = vpack.c.bf16 %v3695_v16, %v3691_v17 }
 0xa41   :  { %3285 = vmatmul.mubr.f32.vlgmr.msra.gmra.mrb[20].mxu0 %v3148_v40  ;;  %3356 = vmatmul.mubr.f32.vlgmr.msra.gmra.mrb[20].mxu1 %v3148_v40 }
 0xa42   :  { %5598 = vmatpush1.bf16.msra.mxu0 %v7637_v56  ;;  %5630 = vmatpush1.bf16.msra.mxu1 %v7646_v6 }
 0xa43   :  { %5600 = vmatprep.subr.bf16.mxu0 %v7660_v29  ;;  %5632 = vmatprep.subr.bf16.mxu1 %v7671_v53 }
 0xa44   :  { %3526 = vmatprep.mubr.f32.mxu0 %v6326_v3  ;;  %3597 = vmatprep.mubr.f32.mxu1 %v6326_v3 }
 0xa46   :  { %5602 = vmatpush1.bf16.msra.mxu0 %v7673_v4  ;;  %5634 = vmatpush1.bf16.msra.mxu1 %v7682_v38 }
 0xa47   :  { %5604 = vmatprep.subr.bf16.mxu0 %v7696_v20  ;;  %5636 = vmatprep.subr.bf16.mxu1 %v7707_v50 }
 0xa4a   :  { %5606 = vmatpush1.bf16.msra.mxu0 %v7709_v61  ;;  %5638 = vmatpush1.bf16.msra.mxu1 %v7718_v33 }
 0xa4b   :  { %5608 = vmatprep.subr.bf16.mxu0 %v7732_v7  ;;  %5640 = vmatprep.subr.bf16.mxu1 %v7743_v58 }
 0xa4e   :  { %5610 = vmatpush1.bf16.msra.mxu0 %v7745_v15  ;;  %5642 = vmatpush1.bf16.msra.mxu1 %v7757_v59 }
 0xa4f   :  { %5612 = vmatprep.subr.bf16.mxu0 %v7770_v55  ;;  %5644 = vmatprep.subr.bf16.mxu1 %v7772_v18 }
 0xa52   :  { %5614 = vmatpush1.bf16.msra.mxu0 %v7784_v26  ;;  %5646 = vmatpush1.bf16.msra.mxu1 %v7797_v22 }
 0xa53   :  { %5616 = vmatprep.subr.bf16.mxu0 %v7799_v21  ;;  %5648 = vmatprep.subr.bf16.mxu1 %v7810_v25 }
 0xa56   :  { %5618 = vmatpush1.bf16.msra.mxu0 %v7822_v12  ;;  %5650 = vmatpush1.bf16.msra.mxu1 %v7835_v47 }
 0xa57   :  { %5620 = vmatprep.subr.bf16.mxu0 %v7837_v11  ;;  %5652 = vmatprep.subr.bf16.mxu1 %v7849_v63 }
 0xa5a   :  { %5622 = vmatpush1.bf16.msra.mxu0 %v7858_v51  ;;  %5654 = vmatpush1.bf16.msra.mxu1 %v7862_v19 }
 0xa5b   :  { %5624 = vmatprep.subr.bf16.mxu0 %v7876_v48  ;;  %5656 = vmatprep.subr.bf16.mxu1 %v7887_v39  ;;  %v3641_v48 = vld [vmem:[%s8545_s5 + $0x8] sm:$0xff] }
 0xa5c   :  { %v3645_v39 = vld [vmem:[%s8545_s5 + $0x28] sm:$0xff] }
 0xa5e   :  { %5626 = vmatpush1.bf16.msra.mxu0 %v7889_v1  ;;  %5658 = vmatpush1.bf16.msra.mxu1 %v7898_v35  ;;  %v3643_v1 = vld [vmem:[%s8545_s5 + $0x18] sm:$0xff]  ;;  %v8067_v35 = vpack.c.bf16 %v3645_v39, %v3641_v48  ;;  %v3678_v48 = vld [vmem:[%s8545_s5 + $0x130] sm:$0xff] }
 0xa5f   :  { %v8078_v31 = vpack.c.bf16 %v3647_v36, %v3643_v1  ;;  %v3681_v1 = vld [vmem:[%s8545_s5 + $0x148] sm:$0xff] }
 0xa60   :  { %5660 = vmatprep.subr.bf16.mxu0 %v8067_v35  ;;  %v3685_v36 = vld [vmem:[%s8545_s5 + $0x168] sm:$0xff] }
 0xa61   :  { %5692 = vmatprep.subr.bf16.mxu1 %v8078_v31  ;;  %v8246_v27 = vpack.c.bf16 %v3685_v36, %v3681_v1 }
 0xb14   :  { %v3286_v56 = vpop.f32.mrb[20].mxu0  ;;  %v3357_v6 = vpop.f32.mrb[20].mxu1 }
 0xb15   :  { %v5975_v29 = vadd.f32 %v3286_v56, %v7953_v41  ;;  %v3288_v53 = vpop.f32.mrb[21].mxu0  ;;  %v3359_v4 = vpop.f32.mrb[21].mxu1  ;;  %v5991_v7 = vadd.f32 %v3357_v6, %v7968_v13  ;;  %v3658_v56 = vld [vmem:[%s8545_s5 + $0x90] sm:$0xff] }
 0xb16   :  { %v5976_v38 = vadd.f32 %v3288_v53, %v7957_v5  ;;  %v5992_v61 = vadd.f32 %v3359_v4, %v7963_v23  ;;  %v3662_v6 = vld [vmem:[%s8545_s5 + $0xb0] sm:$0xff]  ;;  %v3665_v53 = vld [vmem:[%s8545_s5 + $0xc8] sm:$0xff] }
 0xb17   :  { %v4748_v20 = vmul.f32 -1.442695, %v5975_v29  ;;  %v8161_v29 = vpack.c.bf16 %v3662_v6, %v3658_v56  ;;  %v3669_v4 = vld [vmem:[%s8545_s5 + $0xe8] sm:$0xff]  ;;  %v3690_v56 = vld [vmem:[%s8545_s5 + $0x190] sm:$0xff] }
 0xb18   :  { %v4749_v50 = vmul.f32 -1.442695, %v5976_v38  ;;  %v4750_v33 = vmul.f32 -1.442695, %v5992_v61  ;;  %v3667_v38 = vld [vmem:[%s8545_s5 + $0xd8] sm:$0xff]  ;;  %v3664_v61 = vld [vmem:[%s8545_s5 + $0xc0] sm:$0xff] }
 0xb19   :  { %6230 = vpow2.f32 %v4748_v20  ;;  %v8175_v20 = vpack.c.bf16 %v3669_v4, %v3665_v53  ;;  %v3694_v53 = vld [vmem:[%s8545_s5 + $0x1b0] sm:$0xff]  ;;  %v3697_v4 = vld [vmem:[%s8545_s5 + $0x1c8] sm:$0xff] }
 0xb1a   :  { %6232 = vpow2.f32 %v4749_v50  ;;  %v3671_v50 = vld [vmem:[%s8545_s5 + $0xf8] sm:$0xff] }
 0xb1b   :  { %6234 = vpow2.f32 %v4750_v33  ;;  %v3668_v33 = vld [vmem:[%s8545_s5 + $0xe0] sm:$0xff] }
 0xb1c   :  { %6236 = vtanh.f32 %v5991_v7  ;;  %v8186_v7 = vpack.c.bf16 %v3671_v50, %v3667_v38  ;;  %v3701_v38 = vld [vmem:[%s8545_s5 + $0x1e8] sm:$0xff]  ;;  %v8311_v50 = vpack.c.bf16 %v3694_v53, %v3690_v56 }
 0xb23   :  { %v6231_v58 = vpop.eup %6230 }
 0xb24   :  { %v6233_v15 = vpop.eup %6232  ;;  %v3369_v59 = vadd.f32 1.0, %v6231_v58  ;;  %v8188_v58 = vpack.c.bf16 %v3668_v33, %v3664_v61  ;;  %v8313_v61 = vpack.c.bf16 %v3701_v38, %v3697_v4  ;;  %v3699_v33 = vld [vmem:[%s8545_s5 + $0x1d8] sm:$0xff] }
 0xb25   :  { %v3375_v55 = vadd.f32 1.0, %v6233_v15  ;;  %v6235_v18 = vpop.eup %6234  ;;  %v3666_v15 = vld [vmem:[%s8545_s5 + $0xd0] sm:$0xff] }
 0xb26   :  { %6238 = vrcp.f32 %v3369_v59  ;;  %v6237_v26 = vpop.eup %6236  ;;  %v3382_v12 = vadd.f32 1.0, %v6235_v18  ;;  %v3670_v59 = vld [vmem:[%s8545_s5 + $0xf0] sm:$0xff]  ;;  %v3673_v18 = vld [vmem:[%s8545_s5 + $0x108] sm:$0xff] }
 0xb27   :  { %6240 = vrcp.f32 %v3375_v55  ;;  %v8197_v55 = vpack.c.bf16 %v3670_v59, %v3666_v15  ;;  %v3703_v15 = vld [vmem:[%s8545_s5 + $0x1f8] sm:$0xff]  ;;  %v3696_v59 = vld [vmem:[%s8545_s5 + $0x1c0] sm:$0xff] }
 0xb28   :  { %6242 = vrcp.f32 %v3382_v12  ;;  %v3672_v12 = vld [vmem:[%s8545_s5 + $0x100] sm:$0xff] }
 0xb30   :  { %v6239_v22 = vpop.eup %6238 }
 0xb31   :  { %v6241_v21 = vpop.eup %6240  ;;  %v3387_v25 = vmul.f32 %v6239_v22, %v6237_v26  ;;  %v3677_v26 = vld [vmem:[%s8545_s5 + $0x128] sm:$0xff]  ;;  %v3675_v22 = vld [vmem:[%s8545_s5 + $0x118] sm:$0xff] }
 0xb32   :  { %v3386_v47 = vmul.f32 %v6241_v21, %v8013_v60  ;;  %v6243_v63 = vpop.eup %6242  ;;  %v3656_v60 = vld [vmem:[%s8545_s5 + $0x80] sm:$0xff]  ;;  %v8211_v21 = vpack.c.bf16 %v3677_v26, %v3673_v18  ;;  %v8325_v18 = vpack.c.bf16 %v3703_v15, %v3699_v33 }
 0xb33   :  { %v8152_v40 = vpack.c.bf16 %v3660_v32, %v3656_v60  ;;  %v3688_v60 = vld [vmem:[%s8545_s5 + $0x180] sm:$0xff] }
 0xb34   :  { %v8053_v11 = vadd.f32 %v3387_v25, %v3386_v47  ;;  %v3679_v25 = vld [vmem:[%s8545_s5 + $0x138] sm:$0xff]  ;;  %v3676_v47 = vld [vmem:[%s8545_s5 + $0x120] sm:$0xff] }
 0xb35   :  { %v3692_v32 = vld [vmem:[%s8545_s5 + $0x1a0] sm:$0xff] }
 0xb36   :  { %6244 = vtanh.f32 %v8053_v11  ;;  %v8298_v6 = vpack.c.bf16 %v3692_v32, %v3688_v60  ;;  %v3700_v26 = vld [vmem:[%s8545_s5 + $0x1e0] sm:$0xff] }
 0xb40   :  { %v6245_v51 = vpop.eup %6244 }
 0xb41   :  { %v3390_v19 = vmul.f32 %v6245_v51, %v6243_v63  ;;  %v8222_v63 = vpack.c.bf16 %v3679_v25, %v3675_v22  ;;  %v8224_v51 = vpack.c.bf16 %v3676_v47, %v3672_v12  ;;  %v3698_v22 = vld [vmem:[%s8545_s5 + $0x1d0] sm:$0xff]  ;;  %v8337_v12 = vpack.c.bf16 %v3700_v26, %v3696_v59 }
 0xb42   :  { %v3702_v25 = vld [vmem:[%s8545_s5 + $0x1f0] sm:$0xff] }
 0xb43   :  { %3527 = vmatmul.mubr.f32.vlgmr.msra.gmra.mrb[22].mxu0 %v3390_v19  ;;  %3598 = vmatmul.mubr.f32.vlgmr.msra.gmra.mrb[22].mxu1 %v3390_v19  ;;  %v3674_v19 = vld [vmem:[%s8545_s5 + $0x110] sm:$0xff]  ;;  %v8341_v47 = vpack.c.bf16 %v3702_v25, %v3698_v22 }
 0xb44   :  { %3768 = vmatprep.mubr.f32.mxu0 %v6326_v3  ;;  %3839 = vmatprep.mubr.f32.mxu1 %v6326_v3  ;;  %v8233_v39 = vpack.c.bf16 %v3678_v48, %v3674_v19 }
 0xb45   :  { %5662 = vmatpush1.bf16.msra.mxu0 %v8080_v24  ;;  %5694 = vmatpush1.bf16.msra.mxu1 %v8089_v30 }
 0xb46   :  { %5664 = vmatprep.subr.bf16.mxu0 %v8103_v0  ;;  %5696 = vmatprep.subr.bf16.mxu1 %v8114_v52 }
 0xb49   :  { %5666 = vmatpush1.bf16.msra.mxu0 %v8116_v43  ;;  %5698 = vmatpush1.bf16.msra.mxu1 %v8125_v37 }
 0xb4a   :  { %5668 = vmatprep.subr.bf16.mxu0 %v8139_v2  ;;  %5700 = vmatprep.subr.bf16.mxu1 %v8150_v9 }
 0xb4d   :  { %5670 = vmatpush1.bf16.msra.mxu0 %v8152_v40  ;;  %5702 = vmatpush1.bf16.msra.mxu1 %v8161_v29 }
 0xb4e   :  { %5672 = vmatprep.subr.bf16.mxu0 %v8175_v20  ;;  %5704 = vmatprep.subr.bf16.mxu1 %v8186_v7 }
 0xb51   :  { %5674 = vmatpush1.bf16.msra.mxu0 %v8188_v58  ;;  %5706 = vmatpush1.bf16.msra.mxu1 %v8197_v55 }
 0xb52   :  { %5676 = vmatprep.subr.bf16.mxu0 %v8211_v21  ;;  %5708 = vmatprep.subr.bf16.mxu1 %v8222_v63 }
 0xb55   :  { %5678 = vmatpush1.bf16.msra.mxu0 %v8224_v51  ;;  %5710 = vmatpush1.bf16.msra.mxu1 %v8233_v39 }
 0xb56   :  { %5680 = vmatprep.subr.bf16.mxu0 %v8246_v27  ;;  %5712 = vmatprep.subr.bf16.mxu1 %v8258_v28 }
 0xb59   :  { %5682 = vmatpush1.bf16.msra.mxu0 %v8260_v46  ;;  %5714 = vmatpush1.bf16.msra.mxu1 %v8272_v57 }
 0xb5a   :  { %5684 = vmatprep.subr.bf16.mxu0 %v8284_v49  ;;  %5716 = vmatprep.subr.bf16.mxu1 %v8286_v62 }
 0xb5d   :  { %5686 = vmatpush1.bf16.msra.mxu0 %v8298_v6  ;;  %5718 = vmatpush1.bf16.msra.mxu1 %v8311_v50 }
 0xb5e   :  { %5688 = vmatprep.subr.bf16.mxu0 %v8313_v61  ;;  %5720 = vmatprep.subr.bf16.mxu1 %v8325_v18 }
 0xb61   :  { %5690 = vmatpush1.bf16.msra.mxu0 %v8337_v12  ;;  %5722 = vmatpush1.bf16.msra.mxu1 %v8341_v47 }
 0xb62   :  { %5724 = vmatprep.subr.bf16.mxu0 %v8067_v35  ;;  %5756 = vmatprep.subr.bf16.mxu1 %v8078_v31 }
 0xc16   :  { %v3528_v19 = vpop.f32.mrb[22].mxu0  ;;  %v3599_v48 = vpop.f32.mrb[22].mxu1 }
 0xc17   :  { %v5977_v1 = vadd.f32 %v3528_v19, %v7953_v41  ;;  %v3530_v36 = vpop.f32.mrb[23].mxu0  ;;  %v3601_v54 = vpop.f32.mrb[23].mxu1  ;;  %v5993_v42 = vadd.f32 %v3599_v48, %v7968_v13 }
 0xc18   :  { %v5978_v8 = vadd.f32 %v3530_v36, %v7957_v5  ;;  %v5994_v10 = vadd.f32 %v3601_v54, %v7963_v23 }
 0xc19   :  { %v4751_v34 = vmul.f32 -1.442695, %v5977_v1 }
 0xc1a   :  { %v4752_v45 = vmul.f32 -1.442695, %v5978_v8  ;;  %v4753_v44 = vmul.f32 -1.442695, %v5994_v10 }
 0xc1b   :  { %6246 = vpow2.f32 %v4751_v34 }
 0xc1c   :  { %6248 = vpow2.f32 %v4752_v45 }
 0xc1d   :  { %6250 = vpow2.f32 %v4753_v44 }
 0xc1e   :  { %6252 = vtanh.f32 %v5993_v42 }
 0xc25   :  { %v6247_v14 = vpop.eup %6246 }
 0xc26   :  { %v6249_v17 = vpop.eup %6248  ;;  %v3611_v16 = vadd.f32 1.0, %v6247_v14 }
 0xc27   :  { %v3617_v60 = vadd.f32 1.0, %v6249_v17  ;;  %v6251_v32 = vpop.eup %6250 }
 0xc28   :  { %6254 = vrcp.f32 %v3611_v16  ;;  %v6253_v56 = vpop.eup %6252  ;;  %v3624_v33 = vadd.f32 1.0, %v6251_v32 }
 0xc29   :  { %6256 = vrcp.f32 %v3617_v60 }
 0xc2a   :  { %6258 = vrcp.f32 %v3624_v33 }
 0xc32   :  { %v6255_v53 = vpop.eup %6254 }
 0xc33   :  { %v6257_v4 = vpop.eup %6256  ;;  %v3629_v38 = vmul.f32 %v6255_v53, %v6253_v56 }
 0xc34   :  { %v3628_v15 = vmul.f32 %v6257_v4, %v8053_v11  ;;  %v6259_v26 = vpop.eup %6258 }
 0xc36   :  { %v8353_v59 = vadd.f32 %v3629_v38, %v3628_v15 }
 0xc38   :  { %6260 = vtanh.f32 %v8353_v59 }
 0xc42   :  { %v6261_v22 = vpop.eup %6260 }
 0xc43   :  { %v3632_v25 = vmul.f32 %v6261_v22, %v6259_v26 }
 0xc45   :  { %3769 = vmatmul.mubr.f32.vlgmr.msra.gmra.mrb[24].mxu0 %v3632_v25  ;;  %3840 = vmatmul.mubr.f32.vlgmr.msra.gmra.mrb[24].mxu1 %v3632_v25 }
 0xc46   :  { %5726 = vmatpush1.bf16.msra.mxu0 %v8080_v24  ;;  %5758 = vmatpush1.bf16.msra.mxu1 %v8089_v30 }
 0xc47   :  { %5728 = vmatprep.subr.bf16.mxu0 %v8103_v0  ;;  %5760 = vmatprep.subr.bf16.mxu1 %v8114_v52 }
 0xc48   :  { %4010 = vmatprep.mubr.f32.mxu0 %v6326_v3  ;;  %4081 = vmatprep.mubr.f32.mxu1 %v6326_v3 }
 0xc4a   :  { %5730 = vmatpush1.bf16.msra.mxu0 %v8116_v43  ;;  %5762 = vmatpush1.bf16.msra.mxu1 %v8125_v37 }
 0xc4b   :  { %5732 = vmatprep.subr.bf16.mxu0 %v8139_v2  ;;  %5764 = vmatprep.subr.bf16.mxu1 %v8150_v9 }
 0xc4e   :  { %5734 = vmatpush1.bf16.msra.mxu0 %v8152_v40  ;;  %5766 = vmatpush1.bf16.msra.mxu1 %v8161_v29 }
 0xc4f   :  { %5736 = vmatprep.subr.bf16.mxu0 %v8175_v20  ;;  %5768 = vmatprep.subr.bf16.mxu1 %v8186_v7 }
 0xc52   :  { %5738 = vmatpush1.bf16.msra.mxu0 %v8188_v58  ;;  %5770 = vmatpush1.bf16.msra.mxu1 %v8197_v55 }
 0xc53   :  { %5740 = vmatprep.subr.bf16.mxu0 %v8211_v21  ;;  %5772 = vmatprep.subr.bf16.mxu1 %v8222_v63 }
 0xc56   :  { %5742 = vmatpush1.bf16.msra.mxu0 %v8224_v51  ;;  %5774 = vmatpush1.bf16.msra.mxu1 %v8233_v39 }
 0xc57   :  { %5744 = vmatprep.subr.bf16.mxu0 %v8246_v27  ;;  %5776 = vmatprep.subr.bf16.mxu1 %v8258_v28 }
 0xc5a   :  { %5746 = vmatpush1.bf16.msra.mxu0 %v8260_v46  ;;  %5778 = vmatpush1.bf16.msra.mxu1 %v8272_v57 }
 0xc5b   :  { %5748 = vmatprep.subr.bf16.mxu0 %v8284_v49  ;;  %5780 = vmatprep.subr.bf16.mxu1 %v8286_v62 }
 0xc5e   :  { %5750 = vmatpush1.bf16.msra.mxu0 %v8298_v6  ;;  %5782 = vmatpush1.bf16.msra.mxu1 %v8311_v50 }
 0xc5f   :  { %5752 = vmatprep.subr.bf16.mxu0 %v8313_v61  ;;  %5784 = vmatprep.subr.bf16.mxu1 %v8325_v18 }
 0xc62   :  { %5754 = vmatpush1.bf16.msra.mxu0 %v8337_v12  ;;  %5786 = vmatpush1.bf16.msra.mxu1 %v8341_v47 }
 0xc63   :  { %5788 = vmatprep.subr.bf16.mxu0 %v8067_v35  ;;  %5820 = vmatprep.subr.bf16.mxu1 %v8078_v31 }
 0xd18   :  { %v3770_v11 = vpop.f32.mrb[24].mxu0  ;;  %v3841_v19 = vpop.f32.mrb[24].mxu1 }
 0xd19   :  { %v5979_v48 = vadd.f32 %v3770_v11, %v7953_v41  ;;  %v3772_v1 = vpop.f32.mrb[25].mxu0  ;;  %v3843_v36 = vpop.f32.mrb[25].mxu1  ;;  %v5995_v44 = vadd.f32 %v3841_v19, %v7968_v13 }
 0xd1a   :  { %v5980_v54 = vadd.f32 %v3772_v1, %v7957_v5  ;;  %v5996_v45 = vadd.f32 %v3843_v36, %v7963_v23 }
 0xd1b   :  { %v4754_v8 = vmul.f32 -1.442695, %v5979_v48 }
 0xd1c   :  { %v4755_v34 = vmul.f32 -1.442695, %v5980_v54  ;;  %v4756_v10 = vmul.f32 -1.442695, %v5996_v45 }
 0xd1d   :  { %6262 = vpow2.f32 %v4754_v8 }
 0xd1e   :  { %6264 = vpow2.f32 %v4755_v34 }
 0xd1f   :  { %6266 = vpow2.f32 %v4756_v10 }
 0xd20   :  { %6268 = vtanh.f32 %v5995_v44 }
 0xd27   :  { %v6263_v42 = vpop.eup %6262 }
 0xd28   :  { %v6265_v14 = vpop.eup %6264  ;;  %v3853_v17 = vadd.f32 1.0, %v6263_v42 }
 0xd29   :  { %v3859_v16 = vadd.f32 1.0, %v6265_v14  ;;  %v6267_v60 = vpop.eup %6266 }
 0xd2a   :  { %6270 = vrcp.f32 %v3853_v17  ;;  %v6269_v32 = vpop.eup %6268  ;;  %v3866_v38 = vadd.f32 1.0, %v6267_v60 }
 0xd2b   :  { %6272 = vrcp.f32 %v3859_v16 }
 0xd2c   :  { %6274 = vrcp.f32 %v3866_v38 }
 0xd34   :  { %v6271_v56 = vpop.eup %6270 }
 0xd35   :  { %v6273_v53 = vpop.eup %6272  ;;  %v3871_v4 = vmul.f32 %v6271_v56, %v6269_v32 }
 0xd36   :  { %v3870_v33 = vmul.f32 %v6273_v53, %v8353_v59  ;;  %v6275_v26 = vpop.eup %6274 }
 0xd38   :  { %v8395_v15 = vadd.f32 %v3871_v4, %v3870_v33 }
 0xd3a   :  { %6276 = vtanh.f32 %v8395_v15 }
 0xd44   :  { %v6277_v22 = vpop.eup %6276 }
 0xd45   :  { %v3874_v25 = vmul.f32 %v6277_v22, %v6275_v26  ;;  %v4607_v22 = vld [vmem:[%s8547_s7 + $0x18] sm:$0xff] }
 0xd47   :  { %4011 = vmatmul.mubr.f32.vlgmr.msra.gmra.mrb[26].mxu0 %v3874_v25  ;;  %4082 = vmatmul.mubr.f32.vlgmr.msra.gmra.mrb[26].mxu1 %v3874_v25 }
 0xd48   :  { %5790 = vmatpush1.bf16.msra.mxu0 %v8080_v24  ;;  %5822 = vmatpush1.bf16.msra.mxu1 %v8089_v30 }
 0xd49   :  { %5792 = vmatprep.subr.bf16.mxu0 %v8103_v0  ;;  %5824 = vmatprep.subr.bf16.mxu1 %v8114_v52 }
 0xd4a   :  { %4252 = vmatprep.mubr.f32.mxu0 %v6326_v3  ;;  %4323 = vmatprep.mubr.f32.mxu1 %v6326_v3 }
 0xd4c   :  { %5794 = vmatpush1.bf16.msra.mxu0 %v8116_v43  ;;  %5826 = vmatpush1.bf16.msra.mxu1 %v8125_v37 }
 0xd4d   :  { %5796 = vmatprep.subr.bf16.mxu0 %v8139_v2  ;;  %5828 = vmatprep.subr.bf16.mxu1 %v8150_v9 }
 0xd50   :  { %5798 = vmatpush1.bf16.msra.mxu0 %v8152_v40  ;;  %5830 = vmatpush1.bf16.msra.mxu1 %v8161_v29 }
 0xd51   :  { %5800 = vmatprep.subr.bf16.mxu0 %v8175_v20  ;;  %5832 = vmatprep.subr.bf16.mxu1 %v8186_v7 }
 0xd54   :  { %5802 = vmatpush1.bf16.msra.mxu0 %v8188_v58  ;;  %5834 = vmatpush1.bf16.msra.mxu1 %v8197_v55 }
 0xd55   :  { %5804 = vmatprep.subr.bf16.mxu0 %v8211_v21  ;;  %5836 = vmatprep.subr.bf16.mxu1 %v8222_v63 }
 0xd58   :  { %5806 = vmatpush1.bf16.msra.mxu0 %v8224_v51  ;;  %5838 = vmatpush1.bf16.msra.mxu1 %v8233_v39 }
 0xd59   :  { %5808 = vmatprep.subr.bf16.mxu0 %v8246_v27  ;;  %5840 = vmatprep.subr.bf16.mxu1 %v8258_v28 }
 0xd5c   :  { %5810 = vmatpush1.bf16.msra.mxu0 %v8260_v46  ;;  %5842 = vmatpush1.bf16.msra.mxu1 %v8272_v57 }
 0xd5d   :  { %5812 = vmatprep.subr.bf16.mxu0 %v8284_v49  ;;  %5844 = vmatprep.subr.bf16.mxu1 %v8286_v62 }
 0xd60   :  { %5814 = vmatpush1.bf16.msra.mxu0 %v8298_v6  ;;  %5846 = vmatpush1.bf16.msra.mxu1 %v8311_v50 }
 0xd61   :  { %5816 = vmatprep.subr.bf16.mxu0 %v8313_v61  ;;  %5848 = vmatprep.subr.bf16.mxu1 %v8325_v18 }
 0xd64   :  { %5818 = vmatpush1.bf16.msra.mxu0 %v8337_v12  ;;  %5850 = vmatpush1.bf16.msra.mxu1 %v8341_v47 }
 0xd65   :  { %5852 = vmatprep.subr.bf16.mxu0 %v8067_v35  ;;  %5884 = vmatprep.subr.bf16.mxu1 %v8078_v31 }
 0xe1a   :  { %v4012_v59 = vpop.f32.mrb[26].mxu0  ;;  %v4083_v11 = vpop.f32.mrb[26].mxu1 }
 0xe1b   :  { %v5981_v19 = vadd.f32 %v4012_v59, %v7953_v41  ;;  %v4014_v48 = vpop.f32.mrb[27].mxu0  ;;  %v4085_v1 = vpop.f32.mrb[27].mxu1  ;;  %v5997_v10 = vadd.f32 %v4083_v11, %v7968_v13  ;;  %v4608_v59 = vld [vmem:[%s8547_s7 + $0x20] sm:$0xff]  ;;  %v4609_v11 = vld [vmem:[%s8547_s7 + $0x28] sm:$0xff] }
 0xe1c   :  { %v5982_v36 = vadd.f32 %v4014_v48, %v7957_v5  ;;  %v5998_v34 = vadd.f32 %v4085_v1, %v7963_v23  ;;  %v4610_v48 = vld [vmem:[%s8547_s7 + $0x30] sm:$0xff]  ;;  %v4611_v1 = vld [vmem:[%s8547_s7 + $0x38] sm:$0xff] }
 0xe1d   :  { %v4757_v54 = vmul.f32 -1.442695, %v5981_v19  ;;  %v5922_v19 = vpack.c.bf16 %v4609_v11, %v4608_v59 }
 0xe1e   :  { %v4758_v8 = vmul.f32 -1.442695, %v5982_v36  ;;  %v4759_v45 = vmul.f32 -1.442695, %v5998_v34  ;;  %v5925_v36 = vpack.c.bf16 %v4611_v1, %v4610_v48 }
 0xe1f   :  { %6278 = vpow2.f32 %v4757_v54  ;;  %v4612_v54 = vld [vmem:[%s8547_s7 + $0x40] sm:$0xff] }
 0xe20   :  { %6280 = vpow2.f32 %v4758_v8  ;;  %v4613_v8 = vld [vmem:[%s8547_s7 + $0x48] sm:$0xff] }
 0xe21   :  { %6282 = vpow2.f32 %v4759_v45  ;;  %v5928_v34 = vpack.c.bf16 %v4613_v8, %v4612_v54  ;;  %v4614_v45 = vld [vmem:[%s8547_s7 + $0x50] sm:$0xff] }
 0xe22   :  { %6284 = vtanh.f32 %v5997_v10  ;;  %v4615_v10 = vld [vmem:[%s8547_s7 + $0x58] sm:$0xff] }
 0xe29   :  { %v6279_v35 = vpop.eup %6278 }
 0xe2a   :  { %v6281_v44 = vpop.eup %6280  ;;  %v4095_v31 = vadd.f32 1.0, %v6279_v35  ;;  %v4616_v35 = vld [vmem:[%s8547_s7 + $0x60] sm:$0xff] }
 0xe2b   :  { %v4101_v42 = vadd.f32 1.0, %v6281_v44  ;;  %v6283_v14 = vpop.eup %6282  ;;  %v5931_v44 = vpack.c.bf16 %v4615_v10, %v4614_v45 }
 0xe2c   :  { %6286 = vrcp.f32 %v4095_v31  ;;  %v6285_v17 = vpop.eup %6284  ;;  %v4108_v56 = vadd.f32 1.0, %v6283_v14  ;;  %v4617_v31 = vld [vmem:[%s8547_s7 + $0x68] sm:$0xff]  ;;  %v4618_v14 = vld [vmem:[%s8547_s7 + $0x70] sm:$0xff] }
 0xe2d   :  { %6288 = vrcp.f32 %v4101_v42  ;;  %v5934_v42 = vpack.c.bf16 %v4617_v31, %v4616_v35 }
 0xe2e   :  { %6290 = vrcp.f32 %v4108_v56 }
 0xe36   :  { %v6287_v16 = vpop.eup %6286 }
 0xe37   :  { %v6289_v60 = vpop.eup %6288  ;;  %v4113_v32 = vmul.f32 %v6287_v16, %v6285_v17  ;;  %v4619_v17 = vld [vmem:[%s8547_s7 + $0x78] sm:$0xff] }
 0xe38   :  { %v4112_v53 = vmul.f32 %v6289_v60, %v8395_v15  ;;  %v6291_v38 = vpop.eup %6290  ;;  %v4606_v15 = vld [vmem:[%s8547_s7 + $0x10] sm:$0xff]  ;;  %v5937_v16 = vpack.c.bf16 %v4619_v17, %v4618_v14 }
 0xe39   :  { %v5919_v25 = vpack.c.bf16 %v4607_v22, %v4606_v15 }
 0xe3a   :  { %v8437_v4 = vadd.f32 %v4113_v32, %v4112_v53 }
 0xe3c   :  { %6292 = vtanh.f32 %v8437_v4 }
 0xe46   :  { %v6293_v33 = vpop.eup %6292 }
 0xe47   :  { %v4116_v26 = vmul.f32 %v6293_v33, %v6291_v38 }
 0xe49   :  { %4253 = vmatmul.mubr.f32.vlgmr.msra.gmra.mrb[28].mxu0 %v4116_v26  ;;  %4324 = vmatmul.mubr.f32.vlgmr.msra.gmra.mrb[28].mxu1 %v4116_v26 }
 0xe4a   :  { %5854 = vmatpush1.bf16.msra.mxu0 %v8080_v24  ;;  %5886 = vmatpush1.bf16.msra.mxu1 %v8089_v30 }
 0xe4b   :  { %5856 = vmatprep.subr.bf16.mxu0 %v8103_v0  ;;  %5888 = vmatprep.subr.bf16.mxu1 %v8114_v52 }
 0xe4c   :  { %4494 = vmatprep.mubr.f32.mxu0 %v6326_v3  ;;  %4565 = vmatprep.mubr.f32.mxu1 %v6326_v3 }
 0xe4e   :  { %5858 = vmatpush1.bf16.msra.mxu0 %v8116_v43  ;;  %5890 = vmatpush1.bf16.msra.mxu1 %v8125_v37 }
 0xe4f   :  { %5860 = vmatprep.subr.bf16.mxu0 %v8139_v2  ;;  %5892 = vmatprep.subr.bf16.mxu1 %v8150_v9 }
 0xe52   :  { %5862 = vmatpush1.bf16.msra.mxu0 %v8152_v40  ;;  %5894 = vmatpush1.bf16.msra.mxu1 %v8161_v29 }
 0xe53   :  { %5864 = vmatprep.subr.bf16.mxu0 %v8175_v20  ;;  %5896 = vmatprep.subr.bf16.mxu1 %v8186_v7 }
 0xe56   :  { %5866 = vmatpush1.bf16.msra.mxu0 %v8188_v58  ;;  %5898 = vmatpush1.bf16.msra.mxu1 %v8197_v55 }
 0xe57   :  { %5868 = vmatprep.subr.bf16.mxu0 %v8211_v21  ;;  %5900 = vmatprep.subr.bf16.mxu1 %v8222_v63 }
 0xe5a   :  { %5870 = vmatpush1.bf16.msra.mxu0 %v8224_v51  ;;  %5902 = vmatpush1.bf16.msra.mxu1 %v8233_v39 }
 0xe5b   :  { %5872 = vmatprep.subr.bf16.mxu0 %v8246_v27  ;;  %5904 = vmatprep.subr.bf16.mxu1 %v8258_v28 }
 0xe5e   :  { %5874 = vmatpush1.bf16.msra.mxu0 %v8260_v46  ;;  %5906 = vmatpush1.bf16.msra.mxu1 %v8272_v57 }
 0xe5f   :  { %5876 = vmatprep.subr.bf16.mxu0 %v8284_v49  ;;  %5908 = vmatprep.subr.bf16.mxu1 %v8286_v62 }
 0xe62   :  { %5878 = vmatpush1.bf16.msra.mxu0 %v8298_v6  ;;  %5910 = vmatpush1.bf16.msra.mxu1 %v8311_v50 }
 0xe63   :  { %5880 = vmatprep.subr.bf16.mxu0 %v8313_v61  ;;  %5912 = vmatprep.subr.bf16.mxu1 %v8325_v18  ;;  %v4604_v61 = vld [vmem:[%s8547_s7] sm:$0xff]  ;;  %v4605_v18 = vld [vmem:[%s8547_s7 + $0x8] sm:$0xff] }
 0xe66   :  { %5882 = vmatpush1.bf16.msra.mxu0 %v8337_v12  ;;  %5914 = vmatpush1.bf16.msra.mxu1 %v8341_v47  ;;  %v5916_v12 = vpack.c.bf16 %v4605_v18, %v4604_v61  ;;  %v6327_v47 = vmov 0.0|0.0  }
 0xe67   :  { %5915 = vmatprep.subr.bf16.mxu0 %v6327_v47 }
 0xf1c   :  { %v4254_v24 = vpop.f32.mrb[28].mxu0  ;;  %v4325_v30 = vpop.f32.mrb[28].mxu1 }
 0xf1d   :  { %v5983_v0 = vadd.f32 %v4254_v24, %v7953_v41  ;;  %v4256_v52 = vpop.f32.mrb[29].mxu0  ;;  %v4327_v43 = vpop.f32.mrb[29].mxu1  ;;  %v5999_v20 = vadd.f32 %v4325_v30, %v7968_v13 }
 0xf1e   :  { %v5984_v37 = vadd.f32 %v4256_v52, %v7957_v5  ;;  %v6000_v40 = vadd.f32 %v4327_v43, %v7963_v23 }
 0xf1f   :  { %v4760_v2 = vmul.f32 -1.442695, %v5983_v0 }
 0xf20   :  { %v4761_v9 = vmul.f32 -1.442695, %v5984_v37  ;;  %v4762_v29 = vmul.f32 -1.442695, %v6000_v40 }
 0xf21   :  { %6294 = vpow2.f32 %v4760_v2 }
 0xf22   :  { %6296 = vpow2.f32 %v4761_v9 }
 0xf23   :  { %6298 = vpow2.f32 %v4762_v29 }
 0xf24   :  { %6300 = vtanh.f32 %v5999_v20 }
 0xf2b   :  { %v6295_v7 = vpop.eup %6294 }
 0xf2c   :  { %v6297_v58 = vpop.eup %6296  ;;  %v4337_v55 = vadd.f32 1.0, %v6295_v7 }
 0xf2d   :  { %v4343_v21 = vadd.f32 1.0, %v6297_v58  ;;  %v6299_v63 = vpop.eup %6298 }
 0xf2e   :  { %6302 = vrcp.f32 %v4337_v55  ;;  %v6301_v51 = vpop.eup %6300  ;;  %v4350_v46 = vadd.f32 1.0, %v6299_v63  ;;  %v4766_v55 = vld [vmem:[%s8548_s8] ss:$0 sm:$0xff] }
 0xf2f   :  { %6304 = vrcp.f32 %v4343_v21 }
 0xf30   :  { %6306 = vrcp.f32 %v4350_v46 }
 0xf38   :  { %v6303_v39 = vpop.eup %6302 }
 0xf39   :  { %v6305_v27 = vpop.eup %6304  ;;  %v4355_v28 = vmul.f32 %v6303_v39, %v6301_v51 }
 0xf3a   :  { %v4354_v57 = vmul.f32 %v6305_v27, %v8437_v4  ;;  %v6307_v62 = vpop.eup %6306 }
 0xf3c   :  { %v8477_v49 = vadd.f32 %v4355_v28, %v4354_v57 }
 0xf3e   :  { %6308 = vtanh.f32 %v8477_v49 }
 0xf48   :  { %v6309_v6 = vpop.eup %6308 }
 0xf49   :  { %v4358_v50 = vmul.f32 %v6309_v6, %v6307_v62 }
 0xf4b   :  { %4495 = vmatmul.mubr.f32.vlgmr.msra.gmra.mrb[30].mxu0 %v4358_v50  ;;  %4566 = vmatmul.mubr.f32.vlgmr.msra.gmra.mrb[30].mxu1 %v4358_v50 }
 0xf4c   :  { %5917 = vmatpush3.bf16.msra.mxu0 %v5916_v12  ;;  %4816 = vmatprep.mubr.msk.f32.mxu0 %vm6328_vm1, %v6326_v3 }
 0xf4d   :  { %5918 = vmatprep.subr.bf16.mxu0 %v6327_v47 }
 0xf50   :  { %5920 = vmatpush3.bf16.msra.mxu0 %v5919_v25 }
 0xf51   :  { %5921 = vmatprep.subr.bf16.mxu0 %v6327_v47 }
 0xf54   :  { %5923 = vmatpush3.bf16.msra.mxu0 %v5922_v19 }
 0xf55   :  { %5924 = vmatprep.subr.bf16.mxu0 %v6327_v47 }
 0xf58   :  { %5926 = vmatpush3.bf16.msra.mxu0 %v5925_v36 }
 0xf59   :  { %5927 = vmatprep.subr.bf16.mxu0 %v6327_v47 }
 0xf5c   :  { %5929 = vmatpush3.bf16.msra.mxu0 %v5928_v34 }
 0xf5d   :  { %5930 = vmatprep.subr.bf16.mxu0 %v6327_v47 }
 0xf60   :  { %5932 = vmatpush3.bf16.msra.mxu0 %v5931_v44 }
 0xf61   :  { %5933 = vmatprep.subr.bf16.mxu0 %v6327_v47 }
 0xf64   :  { %5935 = vmatpush3.bf16.msra.mxu0 %v5934_v42 }
 0xf65   :  { %5936 = vmatprep.subr.bf16.mxu0 %v6327_v47 }
 0xf68   :  { %5938 = vmatpush3.bf16.msra.mxu0 %v5937_v16 }
0x101e   :  { %v4496_v60 = vpop.f32.mrb[30].mxu0  ;;  %v4567_v32 = vpop.f32.mrb[30].mxu1 }
0x101f   :  { %v5985_v56 = vadd.f32 %v4496_v60, %v7953_v41  ;;  %v4498_v3 = vpop.f32.mrb[31].mxu0  ;;  %v4569_v53 = vpop.f32.mrb[31].mxu1  ;;  %v6001_v30 = vadd.f32 %v4567_v32, %v7968_v13 }
0x1020   :  { %v5986_v4 = vadd.f32 %v4498_v3, %v7957_v5  ;;  %v6002_v26 = vadd.f32 %v4569_v53, %v7963_v23 }
0x1021   :  { %v4763_v38 = vmul.f32 -1.442695, %v5985_v56 }
0x1022   :  { %v4764_v33 = vmul.f32 -1.442695, %v5986_v4  ;;  %v4765_v24 = vmul.f32 -1.442695, %v6002_v26 }
0x1023   :  { %6310 = vpow2.f32 %v4763_v38 }
0x1024   :  { %6312 = vpow2.f32 %v4764_v33 }
0x1025   :  { %6314 = vpow2.f32 %v4765_v24 }
0x1026   :  { %6316 = vtanh.f32 %v6001_v30 }
0x102d   :  { %v6311_v0 = vpop.eup %6310 }
0x102e   :  { %v6313_v52 = vpop.eup %6312  ;;  %v4579_v43 = vadd.f32 1.0, %v6311_v0 }
0x102f   :  { %v4585_v37 = vadd.f32 1.0, %v6313_v52  ;;  %v6315_v41 = vpop.eup %6314 }
0x1030   :  { %6318 = vrcp.f32 %v4579_v43  ;;  %v6317_v2 = vpop.eup %6316  ;;  %v4592_v29 = vadd.f32 1.0, %v6315_v41 }
0x1031   :  { %6320 = vrcp.f32 %v4585_v37 }
0x1032   :  { %6322 = vrcp.f32 %v4592_v29 }
0x103a   :  { %v6319_v5 = vpop.eup %6318 }
0x103b   :  { %v6321_v9 = vpop.eup %6320  ;;  %v4597_v40 = vmul.f32 %v6319_v5, %v6317_v2 }
0x103c   :  { %v4596_v20 = vmul.f32 %v6321_v9, %v8477_v49  ;;  %v6323_v13 = vpop.eup %6322 }
0x103e   :  { %v4598_v23 = vadd.f32 %v4597_v40, %v4596_v20 }
0x1040   :  { %6324 = vtanh.f32 %v4598_v23 }
0x104a   :  { %v6325_v7 = vpop.eup %6324 }
0x104b   :  { %v4600_v58 = vmul.f32 %v6325_v7, %v6323_v13 }
0x104d   :  { %4817 = vmatmul.mubr.f32.vlgmr.msra.gmra.mrb[32].mxu0 %v4600_v58 }
0x1120   :  { %v4693_v21 = vpop.f32.mrb[32].mxu0 }
0x1121   :  { %v4694_v63 = vadd.f32 %v4766_v55, %v4693_v21  ;;  %v4818_v51 = vpop.f32.mrb[33].mxu0 }
0x1123   :  { %4697 = vst [vmem:[%s8549_s9] sm:$0xff] %v4694_v63 }

</bundles_post_ra>
